<compile_context>
chip_gen: v5e
topology: v5e:2x2
jax: 0.10.0
libtpu: 0.0.40
codegen_flags: <defaults>
</compile_context>

<pallas_src>
import functools

import jax
import jax.numpy as jnp
from jax.experimental import pallas as pl
from jax.experimental.pallas import tpu as pltpu


def _linear_hardsig_kernel(pooled_ref, w_ref, b_ref, o_ref):
    # pooled_ref: (B, K)   pooled activations; same block every step -> resident
    # w_ref:      (K, TN)  pre-transposed weight tile (streamed, double-buffered)
    # b_ref:      (1, TN)  bias tile with the +3.0 already folded in
    # o_ref:      (B, TN)  lane-dense output tile
    y = jnp.dot(pooled_ref[...], w_ref[...], preferred_element_type=jnp.float32)
    o_ref[...] = jnp.clip(y + b_ref[...], 0.0, 6.0) * 0.5   # (t*3)/6 == t*0.5


def _default_tile_n():
    """Generation-aware output-tile width: 4 tiles on v7x (megacore), 2 otherwise."""
    try:
        kind = jax.devices()[0].device_kind.lower()
    except Exception:
        return 256
    if "v7" in kind or "7x" in kind:
        return 256        # 4 tiles of 256 -> 2 steps per TensorCore on v7x
    return 512            # 2 tiles of 512 on v5e / v6e (amortize step overhead)


def prepare_params(weight, bias, *, tn):
    """One-time parameter prep: transpose, pad N->multiple of tn, fold +3 into bias."""
    N, K = weight.shape
    n_pad = ((N + tn - 1) // tn) * tn
    w_t = jnp.zeros((K, n_pad), jnp.float32).at[:, :N].set(
        weight.T.astype(jnp.float32))
    b2 = jnp.zeros((1, n_pad), jnp.float32).at[:, :N].set(
        bias.astype(jnp.float32).reshape(1, N) + 3.0)
    return w_t, b2


def model_forward(x, w_t, b2, *, n_out, kh=12, kw=12, tn=512):
    """x: (B, C, H, W) f32.  w_t: (K, n_pad) pre-transposed weight.  b2: (1, n_pad)."""
    B, C, H, W = x.shape
    Ho, Wo = H // kh, W // kw
    K = C * Ho * Wo
    n_pad = w_t.shape[1]
    assert w_t.shape[0] == K, (
        f"flattened features {K} != prepared weight in_features {w_t.shape[0]}")
    assert n_pad % tn == 0

    # ---- avg-pool in XLA (tiny (B, K) result); flatten order matches torch's
    # pooled.reshape(B, -1): feature index = c*Ho*Wo + i*Wo + j ----
    xc = x[:, :, : Ho * kh, : Wo * kw]
    pooled = xc.reshape(B, C, Ho, kh, Wo, kw).mean(axis=(3, 5)).reshape(B, K)

    out = pl.pallas_call(
        _linear_hardsig_kernel,
        out_shape=jax.ShapeDtypeStruct((B, n_pad), jnp.float32),
        grid=(n_pad // tn,),
        in_specs=[
            pl.BlockSpec((B, K), lambda j: (0, 0)),    # pooled: VMEM-resident
            pl.BlockSpec((K, tn), lambda j: (0, j)),   # weight: streamed tiles
            pl.BlockSpec((1, tn), lambda j: (0, j)),   # bias:   streamed tiles
        ],
        out_specs=pl.BlockSpec((B, tn), lambda j: (0, j)),
        compiler_params=pltpu.CompilerParams(
            dimension_semantics=("parallel",),          # megacore-shardable
        ),
        cost_estimate=pl.CostEstimate(
            flops=2 * B * K * n_pad,
            transcendentals=0,
            bytes_accessed=4 * (K * n_pad + B * K + n_pad + B * n_pad),
        ),
    )(pooled, w_t, b2)

    return out[:, :n_out, None]                         # drop pad cols, unsqueeze(-1)


def _reference(x, weight, bias, *, kh=12, kw=12):
    B, C, H, W = x.shape
    Ho, Wo = H // kh, W // kw
    xc = x[:, :, : Ho * kh, : Wo * kw]
    pooled = xc.reshape(B, C, Ho, kh, Wo, kw).mean(axis=(3, 5))   # (B,C,Ho,Wo)
    flat = pooled.reshape(B, -1)
    y = flat @ weight.T + bias
    t = jnp.clip(y + 3.0, 0.0, 6.0)
    return ((t * 3.0) / 6.0)[..., None]


if __name__ == "__main__":
    # Small shapes consistent with the module: C*Ho*Wo must equal 1440.
    B, C, H, W = 2, 40, 72, 72          # pooled -> (2, 40, 6, 6) -> 1440 features
    K_in, N_out = 1440, 1000

    key = jax.random.PRNGKey(0)
    kx, kw_, kb = jax.random.split(key, 3)
    x = jax.random.normal(kx, (B, C, H, W), dtype=jnp.float32)

    # Deterministic parameter init (matches Linear(1440, 1000) shapes).
    bound = 1.0 / (K_in ** 0.5)
    weight = jax.random.uniform(kw_, (N_out, K_in), jnp.float32, -bound, bound)
    bias = jax.random.uniform(kb, (N_out,), jnp.float32, -bound, bound)

    # One-time parameter prep (hoisted out of the per-call path).
    tn = _default_tile_n()
    w_t, b2 = prepare_params(weight, bias, tn=tn)
    w_t, b2 = jax.block_until_ready((w_t, b2))

    fwd = jax.jit(functools.partial(model_forward, n_out=N_out, tn=tn))
    out = jax.block_until_ready(fwd(x, w_t, b2))

    ref = _reference(x, weight, bias)
    assert out.shape == (B, N_out, 1), out.shape
    assert jnp.allclose(out, ref, atol=1e-4, rtol=1e-4), float(
        jnp.max(jnp.abs(out - ref)))

    print("KERNEL_OK")
</pallas_src>

<mosaic_0001>
module attributes {stable_mosaic.version = 11 : i64} {
  func.func @_linear_hardsig_kernel(%arg0: i32, %arg1: memref<2x1440xf32, #tpu.memory_space<vmem>>, %arg2: memref<1440x512xf32, #tpu.memory_space<vmem>>, %arg3: memref<1x512xf32, #tpu.memory_space<vmem>>, %arg4: memref<2x512xf32, #tpu.memory_space<vmem>>) attributes {dimension_semantics = [#tpu.dimension_semantics<parallel>], iteration_bounds = array<i64: 2>, scalar_prefetch = 0 : i64, scratch_operands = 0 : i64, tpu.core_type = #tpu.core_type<tc>, window_params = [{pipeline_mode = #tpu.pipeline_mode<synchronous>, transform_indices = @transform_0, window_bounds = array<i64: 2, 1440>}, {transform_indices = @transform_1, window_bounds = array<i64: 1440, 512>}, {transform_indices = @transform_2, window_bounds = array<i64: 1, 512>}, {transform_indices = @transform_3, window_bounds = array<i64: 2, 512>}]} {
    %c0 = arith.constant 0 : index
    %c0_0 = arith.constant 0 : index
    %0 = vector.load %arg1[%c0, %c0_0] : memref<2x1440xf32, #tpu.memory_space<vmem>>, vector<2x1440xf32>
    %c0_1 = arith.constant 0 : index
    %c0_2 = arith.constant 0 : index
    %1 = vector.load %arg2[%c0_1, %c0_2] : memref<1440x512xf32, #tpu.memory_space<vmem>>, vector<1440x512xf32>
    %cst = arith.constant dense<0.000000e+00> : vector<2x512xf32>
    %2 = tpu.matmul %0, %1, %cst {dimension_numbers = #tpu.dot_dimension_numbers<[1], [0], [0], [1], [0, 0, 1, 1], [], []>} : vector<2x1440xf32>, vector<1440x512xf32>, vector<2x512xf32> -> vector<2x512xf32>
    %c0_3 = arith.constant 0 : index
    %c0_4 = arith.constant 0 : index
    %3 = vector.load %arg3[%c0_3, %c0_4] : memref<1x512xf32, #tpu.memory_space<vmem>>, vector<1x512xf32>
    %4 = vector.broadcast %3 : vector<1x512xf32> to vector<2x512xf32>
    %5 = arith.addf %2, %4 : vector<2x512xf32>
    %cst_5 = arith.constant 0.000000e+00 : f32
    %cst_6 = arith.constant 6.000000e+00 : f32
    %6 = vector.broadcast %cst_5 : f32 to vector<2x512xf32>
    %7 = arith.maximumf %6, %5 : vector<2x512xf32>
    %8 = vector.broadcast %cst_6 : f32 to vector<2x512xf32>
    %9 = arith.minimumf %8, %7 : vector<2x512xf32>
    %cst_7 = arith.constant 5.000000e-01 : f32
    %10 = vector.broadcast %cst_7 : f32 to vector<2x512xf32>
    %11 = arith.mulf %9, %10 : vector<2x512xf32>
    %c0_8 = arith.constant 0 : index
    %c0_9 = arith.constant 0 : index
    %12 = vector.load %arg4[%c0_8, %c0_9] : memref<2x512xf32, #tpu.memory_space<vmem>>, vector<2x512xf32>
    tpu.vector_store %arg4[%c0_8, %c0_9], %11 {strides = array<i32>} : memref<2x512xf32, #tpu.memory_space<vmem>>, vector<2x512xf32>,
    return
  }
  func.func @transform_0(%arg0: i32) -> (i32, i32) {
    %c0_i32 = arith.constant 0 : i32
    %c0_i32_0 = arith.constant 0 : i32
    %c0_i32_1 = arith.constant 0 : i32
    return %c0_i32, %c0_i32_0 : i32, i32
  }
  func.func @transform_1(%arg0: i32) -> (i32, i32) {
    %c0_i32 = arith.constant 0 : i32
    %c0_i32_0 = arith.constant 0 : i32
    return %c0_i32, %arg0 : i32, i32
  }
  func.func @transform_2(%arg0: i32) -> (i32, i32) {
    %c0_i32 = arith.constant 0 : i32
    %c0_i32_0 = arith.constant 0 : i32
    return %c0_i32, %arg0 : i32, i32
  }
  func.func @transform_3(%arg0: i32) -> (i32, i32) {
    %c0_i32 = arith.constant 0 : i32
    %c0_i32_0 = arith.constant 0 : i32
    return %c0_i32, %arg0 : i32, i32
  }
}

</mosaic_0001>

<bundles_post_ra>
// kernel: model_forward.1
= control target key start
LH: loop header
LB: loop body
LE: loop exit
PB: predicated region body
PF: predicated region fallthrough
CT: control target
= control target key end

     0   :  { %s3570_s12 = smov 0   ;;  %s3572_s13 = smov 0   ;;  %s5907_s0 = inlined_call_operand.vmem [shape: f32[2,1440], index: 0, kind: input, shape index: {}]   ;;  %s5908_s1 = inlined_call_operand.vmem [shape: f32[1440,1024], index: 1, kind: input, shape index: {}]   ;;  %s5909_s2 = inlined_call_operand.vmem [shape: f32[1,1024], index: 2, kind: input, shape index: {}]   ;;  %s5910_s3 = inlined_call_operand.vmem [shape: f32[2,1024], index: 3, kind: output, shape index: {}]  }
   0x1   :  { %s3574_s14 = smov 0  }
   0x2 LB: > { %s3474_s15 = sadd.s32 4294967295, %s3548_s14   ;;  %s3587_s16 = sadd.s32 1, %s3548_s14   ;;  %s3548_s14 = sphi %s3574_s14, %s5913_s14   ;;  %s3544_s13 = sphi %s3572_s13, %s5912_s13   ;;  %s3540_s12 = sphi %s3570_s12, %s5911_s12  }
   0x3   : > { %s38_s17 = ssub.s32 %s3548_s14, %s3587_s16  ;;  %s41_s18 = sadd.s32 1, %s3544_s13 }
   0x4   : > { %p39_p0 = scmp.eq.s32.totalorder %s38_s17, 0  ;;  %p48_p1 = scmp.ne.s32.totalorder %s3544_s13, %s3540_s12 }
   0x5   : > { %p49_p2 = scmp.eq.s32.totalorder %s3548_s14, 0  ;;  %p3477_p4 = scmp.ge.s32.totalorder %s3548_s14, 2 }
   0x6   : > { %s3596_s19 = scalar_select %p39_p0, %s3544_s13, %s41_s18  }
   0x7   : > { %p50_p3 = por %p49_p2, %p48_p1  ;;  %129 = sbr.rel (%p3477_p4) target bundleno = 736 (0x2e0), region = 20 }
   0xc   : > { %132 = sbr.rel (!%p50_p3) target bundleno = 736 (0x2e0), region = 24  ;;  %s134_s20 = sand.u32 (%p50_p3), 1, %s3544_s13  }
   0xd   : > { %s3490_s21 = sshll.u32 (%p50_p3), %s3548_s14, 5  ;;  %s3491_s22 = smul.u32 (%p50_p3), 5760, %s134_s20 }
   0xe   : > { %s3604_s25 = scalar_lea.vmem (%p50_p3), %s5908_s1, %s3490_s21 }
   0xf   : > { %v152_v0 = vld [vmem:[%s3604_s25] sm:$0xff] (%p50_p3)  ;;  %v154_v1 = vld [vmem:[%s3604_s25 + $0x8] sm:$0xff] (%p50_p3)  ;;  %v156_v2 = vld [vmem:[%s3604_s25 + $0x10] sm:$0xff] (%p50_p3)  ;;  %s3609_s26 = scalar_lea.vmem (%p50_p3), [#allocation2], %s3491_s22 }
  0x10   : > { %153 = vst [vmem:[%s3609_s26] sm:$0xff] (%p50_p3), %v152_v0  ;;  %v158_v3 = vld [vmem:[%s3604_s25 + $0x18] sm:$0xff] (%p50_p3)  ;;  %v160_v4 = vld [vmem:[%s3604_s25 + $0x40] sm:$0xff] (%p50_p3)  ;;  %v162_v5 = vld [vmem:[%s3604_s25 + $0x48] sm:$0xff] (%p50_p3) }
  0x11   : > { %155 = vst [vmem:[%s3609_s26 + $0x8] sm:$0xff] %v154_v1  ;;  %v164_v6 = vld [vmem:[%s3604_s25 + $0x50] sm:$0xff]  ;;  %v166_v7 = vld [vmem:[%s3604_s25 + $0x58] sm:$0xff]  ;;  %v168_v8 = vld [vmem:[%s3604_s25 + $0x80] sm:$0xff] }
  0x12   : > { %157 = vst [vmem:[%s3609_s26 + $0x10] sm:$0xff] %v156_v2  ;;  %v170_v9 = vld [vmem:[%s3604_s25 + $0x88] sm:$0xff]  ;;  %v172_v10 = vld [vmem:[%s3604_s25 + $0x90] sm:$0xff]  ;;  %v174_v11 = vld [vmem:[%s3604_s25 + $0x98] sm:$0xff] }
  0x13   : > { %159 = vst [vmem:[%s3609_s26 + $0x18] sm:$0xff] %v158_v3  ;;  %v176_v12 = vld [vmem:[%s3604_s25 + $0xc0] sm:$0xff]  ;;  %v178_v13 = vld [vmem:[%s3604_s25 + $0xc8] sm:$0xff]  ;;  %v180_v14 = vld [vmem:[%s3604_s25 + $0xd0] sm:$0xff] }
  0x14   : > { %161 = vst [vmem:[%s3609_s26 + $0x20] sm:$0xff] %v160_v4  ;;  %v182_v15 = vld [vmem:[%s3604_s25 + $0xd8] sm:$0xff]  ;;  %v184_v16 = vld [vmem:[%s3604_s25 + $0x100] sm:$0xff]  ;;  %v186_v17 = vld [vmem:[%s3604_s25 + $0x108] sm:$0xff] }
  0x15   : > { %163 = vst [vmem:[%s3609_s26 + $0x28] sm:$0xff] %v162_v5  ;;  %v188_v18 = vld [vmem:[%s3604_s25 + $0x110] sm:$0xff]  ;;  %v190_v19 = vld [vmem:[%s3604_s25 + $0x118] sm:$0xff]  ;;  %v192_v20 = vld [vmem:[%s3604_s25 + $0x140] sm:$0xff] }
  0x16   : > { %165 = vst [vmem:[%s3609_s26 + $0x30] sm:$0xff] %v164_v6  ;;  %v194_v21 = vld [vmem:[%s3604_s25 + $0x148] sm:$0xff]  ;;  %v196_v22 = vld [vmem:[%s3604_s25 + $0x150] sm:$0xff]  ;;  %v198_v23 = vld [vmem:[%s3604_s25 + $0x158] sm:$0xff] }
  0x17   : > { %167 = vst [vmem:[%s3609_s26 + $0x38] sm:$0xff] %v166_v7  ;;  %v200_v24 = vld [vmem:[%s3604_s25 + $0x180] sm:$0xff]  ;;  %v202_v25 = vld [vmem:[%s3604_s25 + $0x188] sm:$0xff]  ;;  %v204_v26 = vld [vmem:[%s3604_s25 + $0x190] sm:$0xff] }
  0x18   : > { %169 = vst [vmem:[%s3609_s26 + $0x40] sm:$0xff] %v168_v8  ;;  %v206_v27 = vld [vmem:[%s3604_s25 + $0x198] sm:$0xff]  ;;  %v208_v28 = vld [vmem:[%s3604_s25 + $0x1c0] sm:$0xff]  ;;  %v210_v29 = vld [vmem:[%s3604_s25 + $0x1c8] sm:$0xff] }
  0x19   : > { %171 = vst [vmem:[%s3609_s26 + $0x48] sm:$0xff] %v170_v9  ;;  %v212_v30 = vld [vmem:[%s3604_s25 + $0x1d0] sm:$0xff]  ;;  %v214_v31 = vld [vmem:[%s3604_s25 + $0x1d8] sm:$0xff]  ;;  %v216_v32 = vld [vmem:[%s3604_s25 + $0x200] sm:$0xff] }
  0x1a   : > { %173 = vst [vmem:[%s3609_s26 + $0x50] sm:$0xff] %v172_v10  ;;  %v218_v33 = vld [vmem:[%s3604_s25 + $0x208] sm:$0xff]  ;;  %v220_v34 = vld [vmem:[%s3604_s25 + $0x210] sm:$0xff]  ;;  %v222_v35 = vld [vmem:[%s3604_s25 + $0x218] sm:$0xff] }
  0x1b   : > { %175 = vst [vmem:[%s3609_s26 + $0x58] sm:$0xff] %v174_v11  ;;  %v224_v36 = vld [vmem:[%s3604_s25 + $0x240] sm:$0xff]  ;;  %v226_v37 = vld [vmem:[%s3604_s25 + $0x248] sm:$0xff]  ;;  %v228_v38 = vld [vmem:[%s3604_s25 + $0x250] sm:$0xff] }
  0x1c   : > { %177 = vst [vmem:[%s3609_s26 + $0x60] sm:$0xff] %v176_v12  ;;  %v230_v39 = vld [vmem:[%s3604_s25 + $0x258] sm:$0xff]  ;;  %v232_v40 = vld [vmem:[%s3604_s25 + $0x280] sm:$0xff]  ;;  %v234_v41 = vld [vmem:[%s3604_s25 + $0x288] sm:$0xff] }
  0x1d   : > { %179 = vst [vmem:[%s3609_s26 + $0x68] sm:$0xff] %v178_v13  ;;  %v236_v42 = vld [vmem:[%s3604_s25 + $0x290] sm:$0xff]  ;;  %v238_v43 = vld [vmem:[%s3604_s25 + $0x298] sm:$0xff]  ;;  %v240_v44 = vld [vmem:[%s3604_s25 + $0x2c0] sm:$0xff] }
  0x1e   : > { %181 = vst [vmem:[%s3609_s26 + $0x70] sm:$0xff] %v180_v14  ;;  %v242_v45 = vld [vmem:[%s3604_s25 + $0x2c8] sm:$0xff]  ;;  %v244_v46 = vld [vmem:[%s3604_s25 + $0x2d0] sm:$0xff]  ;;  %v246_v47 = vld [vmem:[%s3604_s25 + $0x2d8] sm:$0xff] }
  0x1f   : > { %183 = vst [vmem:[%s3609_s26 + $0x78] sm:$0xff] %v182_v15  ;;  %v248_v48 = vld [vmem:[%s3604_s25 + $0x300] sm:$0xff]  ;;  %v250_v49 = vld [vmem:[%s3604_s25 + $0x308] sm:$0xff]  ;;  %v252_v50 = vld [vmem:[%s3604_s25 + $0x310] sm:$0xff] }
  0x20   : > { %185 = vst [vmem:[%s3609_s26 + $0x80] sm:$0xff] %v184_v16  ;;  %v254_v51 = vld [vmem:[%s3604_s25 + $0x318] sm:$0xff]  ;;  %v256_v52 = vld [vmem:[%s3604_s25 + $0x340] sm:$0xff]  ;;  %v258_v53 = vld [vmem:[%s3604_s25 + $0x348] sm:$0xff] }
  0x21   : > { %187 = vst [vmem:[%s3609_s26 + $0x88] sm:$0xff] %v186_v17  ;;  %v260_v54 = vld [vmem:[%s3604_s25 + $0x350] sm:$0xff]  ;;  %v262_v55 = vld [vmem:[%s3604_s25 + $0x358] sm:$0xff]  ;;  %v264_v56 = vld [vmem:[%s3604_s25 + $0x380] sm:$0xff] }
  0x22   : > { %189 = vst [vmem:[%s3609_s26 + $0x90] sm:$0xff] %v188_v18  ;;  %v266_v57 = vld [vmem:[%s3604_s25 + $0x388] sm:$0xff]  ;;  %v268_v58 = vld [vmem:[%s3604_s25 + $0x390] sm:$0xff]  ;;  %v270_v59 = vld [vmem:[%s3604_s25 + $0x398] sm:$0xff] }
  0x23   : > { %191 = vst [vmem:[%s3609_s26 + $0x98] sm:$0xff] %v190_v19  ;;  %v272_v60 = vld [vmem:[%s3604_s25 + $0x3c0] sm:$0xff]  ;;  %v274_v61 = vld [vmem:[%s3604_s25 + $0x3c8] sm:$0xff]  ;;  %v276_v62 = vld [vmem:[%s3604_s25 + $0x3d0] sm:$0xff] }
  0x24   : > { %193 = vst [vmem:[%s3609_s26 + $0xa0] sm:$0xff] %v192_v20  ;;  %v278_v63 = vld [vmem:[%s3604_s25 + $0x3d8] sm:$0xff]  ;;  %v280_v0 = vld [vmem:[%s3604_s25 + $0x400] sm:$0xff]  ;;  %v282_v1 = vld [vmem:[%s3604_s25 + $0x408] sm:$0xff] }
  0x25   : > { %195 = vst [vmem:[%s3609_s26 + $0xa8] sm:$0xff] %v194_v21  ;;  %v284_v2 = vld [vmem:[%s3604_s25 + $0x410] sm:$0xff]  ;;  %v286_v3 = vld [vmem:[%s3604_s25 + $0x418] sm:$0xff]  ;;  %v288_v4 = vld [vmem:[%s3604_s25 + $0x440] sm:$0xff] }
  0x26   : > { %197 = vst [vmem:[%s3609_s26 + $0xb0] sm:$0xff] %v196_v22  ;;  %v290_v5 = vld [vmem:[%s3604_s25 + $0x448] sm:$0xff]  ;;  %v292_v6 = vld [vmem:[%s3604_s25 + $0x450] sm:$0xff]  ;;  %v294_v7 = vld [vmem:[%s3604_s25 + $0x458] sm:$0xff] }
  0x27   : > { %199 = vst [vmem:[%s3609_s26 + $0xb8] sm:$0xff] %v198_v23  ;;  %v296_v8 = vld [vmem:[%s3604_s25 + $0x480] sm:$0xff]  ;;  %v298_v9 = vld [vmem:[%s3604_s25 + $0x488] sm:$0xff]  ;;  %v300_v10 = vld [vmem:[%s3604_s25 + $0x490] sm:$0xff] }
  0x28   : > { %201 = vst [vmem:[%s3609_s26 + $0xc0] sm:$0xff] %v200_v24  ;;  %v302_v11 = vld [vmem:[%s3604_s25 + $0x498] sm:$0xff]  ;;  %v304_v12 = vld [vmem:[%s3604_s25 + $0x4c0] sm:$0xff]  ;;  %v306_v13 = vld [vmem:[%s3604_s25 + $0x4c8] sm:$0xff] }
  0x29   : > { %203 = vst [vmem:[%s3609_s26 + $0xc8] sm:$0xff] %v202_v25  ;;  %v308_v14 = vld [vmem:[%s3604_s25 + $0x4d0] sm:$0xff]  ;;  %v310_v15 = vld [vmem:[%s3604_s25 + $0x4d8] sm:$0xff]  ;;  %v312_v16 = vld [vmem:[%s3604_s25 + $0x500] sm:$0xff] }
  0x2a   : > { %205 = vst [vmem:[%s3609_s26 + $0xd0] sm:$0xff] %v204_v26  ;;  %v314_v17 = vld [vmem:[%s3604_s25 + $0x508] sm:$0xff]  ;;  %v316_v18 = vld [vmem:[%s3604_s25 + $0x510] sm:$0xff]  ;;  %v318_v19 = vld [vmem:[%s3604_s25 + $0x518] sm:$0xff] }
  0x2b   : > { %207 = vst [vmem:[%s3609_s26 + $0xd8] sm:$0xff] %v206_v27  ;;  %v320_v20 = vld [vmem:[%s3604_s25 + $0x540] sm:$0xff]  ;;  %v322_v21 = vld [vmem:[%s3604_s25 + $0x548] sm:$0xff]  ;;  %v324_v22 = vld [vmem:[%s3604_s25 + $0x550] sm:$0xff] }
  0x2c   : > { %209 = vst [vmem:[%s3609_s26 + $0xe0] sm:$0xff] %v208_v28  ;;  %v326_v23 = vld [vmem:[%s3604_s25 + $0x558] sm:$0xff]  ;;  %v328_v24 = vld [vmem:[%s3604_s25 + $0x580] sm:$0xff]  ;;  %v330_v25 = vld [vmem:[%s3604_s25 + $0x588] sm:$0xff] }
  0x2d   : > { %211 = vst [vmem:[%s3609_s26 + $0xe8] sm:$0xff] %v210_v29  ;;  %v332_v26 = vld [vmem:[%s3604_s25 + $0x590] sm:$0xff]  ;;  %v334_v27 = vld [vmem:[%s3604_s25 + $0x598] sm:$0xff]  ;;  %v336_v28 = vld [vmem:[%s3604_s25 + $0x5c0] sm:$0xff] }
  0x2e   : > { %213 = vst [vmem:[%s3609_s26 + $0xf0] sm:$0xff] %v212_v30  ;;  %v338_v29 = vld [vmem:[%s3604_s25 + $0x5c8] sm:$0xff]  ;;  %v340_v30 = vld [vmem:[%s3604_s25 + $0x5d0] sm:$0xff] }
  0x2f   : > { %215 = vst [vmem:[%s3609_s26 + $0xf8] sm:$0xff] %v214_v31  ;;  %v342_v31 = vld [vmem:[%s3604_s25 + $0x5d8] sm:$0xff] }
  0x30   : > { %217 = vst [vmem:[%s3609_s26 + $0x100] sm:$0xff] %v216_v32  ;;  %v344_v32 = vld [vmem:[%s3604_s25 + $0x600] sm:$0xff] }
  0x31   : > { %219 = vst [vmem:[%s3609_s26 + $0x108] sm:$0xff] %v218_v33  ;;  %v346_v33 = vld [vmem:[%s3604_s25 + $0x608] sm:$0xff] }
  0x32   : > { %221 = vst [vmem:[%s3609_s26 + $0x110] sm:$0xff] %v220_v34  ;;  %v348_v34 = vld [vmem:[%s3604_s25 + $0x610] sm:$0xff] }
  0x33   : > { %223 = vst [vmem:[%s3609_s26 + $0x118] sm:$0xff] %v222_v35  ;;  %v350_v35 = vld [vmem:[%s3604_s25 + $0x618] sm:$0xff] }
  0x34   : > { %225 = vst [vmem:[%s3609_s26 + $0x120] sm:$0xff] %v224_v36  ;;  %v352_v36 = vld [vmem:[%s3604_s25 + $0x640] sm:$0xff] }
  0x35   : > { %227 = vst [vmem:[%s3609_s26 + $0x128] sm:$0xff] %v226_v37  ;;  %v354_v37 = vld [vmem:[%s3604_s25 + $0x648] sm:$0xff] }
  0x36   : > { %229 = vst [vmem:[%s3609_s26 + $0x130] sm:$0xff] %v228_v38  ;;  %v356_v38 = vld [vmem:[%s3604_s25 + $0x650] sm:$0xff] }
  0x37   : > { %231 = vst [vmem:[%s3609_s26 + $0x138] sm:$0xff] %v230_v39  ;;  %v358_v39 = vld [vmem:[%s3604_s25 + $0x658] sm:$0xff] }
  0x38   : > { %233 = vst [vmem:[%s3609_s26 + $0x140] sm:$0xff] %v232_v40  ;;  %v360_v40 = vld [vmem:[%s3604_s25 + $0x680] sm:$0xff] }
  0x39   : > { %235 = vst [vmem:[%s3609_s26 + $0x148] sm:$0xff] %v234_v41  ;;  %v362_v41 = vld [vmem:[%s3604_s25 + $0x688] sm:$0xff] }
  0x3a   : > { %237 = vst [vmem:[%s3609_s26 + $0x150] sm:$0xff] %v236_v42  ;;  %v364_v42 = vld [vmem:[%s3604_s25 + $0x690] sm:$0xff] }
  0x3b   : > { %239 = vst [vmem:[%s3609_s26 + $0x158] sm:$0xff] %v238_v43  ;;  %v366_v43 = vld [vmem:[%s3604_s25 + $0x698] sm:$0xff] }
  0x3c   : > { %241 = vst [vmem:[%s3609_s26 + $0x160] sm:$0xff] %v240_v44  ;;  %v368_v44 = vld [vmem:[%s3604_s25 + $0x6c0] sm:$0xff] }
  0x3d   : > { %243 = vst [vmem:[%s3609_s26 + $0x168] sm:$0xff] %v242_v45  ;;  %v370_v45 = vld [vmem:[%s3604_s25 + $0x6c8] sm:$0xff] }
  0x3e   : > { %245 = vst [vmem:[%s3609_s26 + $0x170] sm:$0xff] %v244_v46  ;;  %v372_v46 = vld [vmem:[%s3604_s25 + $0x6d0] sm:$0xff] }
  0x3f   : > { %247 = vst [vmem:[%s3609_s26 + $0x178] sm:$0xff] %v246_v47  ;;  %v374_v47 = vld [vmem:[%s3604_s25 + $0x6d8] sm:$0xff] }
  0x40   : > { %249 = vst [vmem:[%s3609_s26 + $0x180] sm:$0xff] %v248_v48  ;;  %v376_v48 = vld [vmem:[%s3604_s25 + $0x700] sm:$0xff] }
  0x41   : > { %251 = vst [vmem:[%s3609_s26 + $0x188] sm:$0xff] %v250_v49  ;;  %v378_v49 = vld [vmem:[%s3604_s25 + $0x708] sm:$0xff] }
  0x42   : > { %253 = vst [vmem:[%s3609_s26 + $0x190] sm:$0xff] %v252_v50  ;;  %v380_v50 = vld [vmem:[%s3604_s25 + $0x710] sm:$0xff] }
  0x43   : > { %255 = vst [vmem:[%s3609_s26 + $0x198] sm:$0xff] %v254_v51  ;;  %v382_v51 = vld [vmem:[%s3604_s25 + $0x718] sm:$0xff] }
  0x44   : > { %257 = vst [vmem:[%s3609_s26 + $0x1a0] sm:$0xff] %v256_v52  ;;  %v384_v52 = vld [vmem:[%s3604_s25 + $0x740] sm:$0xff] }
  0x45   : > { %259 = vst [vmem:[%s3609_s26 + $0x1a8] sm:$0xff] %v258_v53  ;;  %v386_v53 = vld [vmem:[%s3604_s25 + $0x748] sm:$0xff] }
  0x46   : > { %261 = vst [vmem:[%s3609_s26 + $0x1b0] sm:$0xff] %v260_v54  ;;  %v388_v54 = vld [vmem:[%s3604_s25 + $0x750] sm:$0xff] }
  0x47   : > { %263 = vst [vmem:[%s3609_s26 + $0x1b8] sm:$0xff] %v262_v55  ;;  %v390_v55 = vld [vmem:[%s3604_s25 + $0x758] sm:$0xff] }
  0x48   : > { %265 = vst [vmem:[%s3609_s26 + $0x1c0] sm:$0xff] %v264_v56  ;;  %v392_v56 = vld [vmem:[%s3604_s25 + $0x780] sm:$0xff] }
  0x49   : > { %267 = vst [vmem:[%s3609_s26 + $0x1c8] sm:$0xff] %v266_v57  ;;  %v394_v57 = vld [vmem:[%s3604_s25 + $0x788] sm:$0xff] }
  0x4a   : > { %269 = vst [vmem:[%s3609_s26 + $0x1d0] sm:$0xff] %v268_v58  ;;  %v396_v58 = vld [vmem:[%s3604_s25 + $0x790] sm:$0xff] }
  0x4b   : > { %271 = vst [vmem:[%s3609_s26 + $0x1d8] sm:$0xff] %v270_v59  ;;  %v398_v59 = vld [vmem:[%s3604_s25 + $0x798] sm:$0xff] }
  0x4c   : > { %273 = vst [vmem:[%s3609_s26 + $0x1e0] sm:$0xff] %v272_v60  ;;  %v400_v60 = vld [vmem:[%s3604_s25 + $0x7c0] sm:$0xff] }
  0x4d   : > { %275 = vst [vmem:[%s3609_s26 + $0x1e8] sm:$0xff] %v274_v61  ;;  %v402_v61 = vld [vmem:[%s3604_s25 + $0x7c8] sm:$0xff] }
  0x4e   : > { %277 = vst [vmem:[%s3609_s26 + $0x1f0] sm:$0xff] %v276_v62  ;;  %v404_v62 = vld [vmem:[%s3604_s25 + $0x7d0] sm:$0xff] }
  0x4f   : > { %279 = vst [vmem:[%s3609_s26 + $0x1f8] sm:$0xff] %v278_v63  ;;  %v406_v63 = vld [vmem:[%s3604_s25 + $0x7d8] sm:$0xff] }
  0x50   : > { %281 = vst [vmem:[%s3609_s26 + $0x200] sm:$0xff] %v280_v0  ;;  %v408_v0 = vld [vmem:[%s3604_s25 + $0x800] sm:$0xff] }
  0x51   : > { %283 = vst [vmem:[%s3609_s26 + $0x208] sm:$0xff] %v282_v1  ;;  %v410_v1 = vld [vmem:[%s3604_s25 + $0x808] sm:$0xff] }
  0x52   : > { %285 = vst [vmem:[%s3609_s26 + $0x210] sm:$0xff] %v284_v2  ;;  %v412_v2 = vld [vmem:[%s3604_s25 + $0x810] sm:$0xff] }
  0x53   : > { %287 = vst [vmem:[%s3609_s26 + $0x218] sm:$0xff] %v286_v3  ;;  %v414_v3 = vld [vmem:[%s3604_s25 + $0x818] sm:$0xff] }
  0x54   : > { %289 = vst [vmem:[%s3609_s26 + $0x220] sm:$0xff] %v288_v4  ;;  %v416_v4 = vld [vmem:[%s3604_s25 + $0x840] sm:$0xff] }
  0x55   : > { %291 = vst [vmem:[%s3609_s26 + $0x228] sm:$0xff] %v290_v5  ;;  %v418_v5 = vld [vmem:[%s3604_s25 + $0x848] sm:$0xff] }
  0x56   : > { %293 = vst [vmem:[%s3609_s26 + $0x230] sm:$0xff] %v292_v6  ;;  %v420_v6 = vld [vmem:[%s3604_s25 + $0x850] sm:$0xff] }
  0x57   : > { %295 = vst [vmem:[%s3609_s26 + $0x238] sm:$0xff] %v294_v7  ;;  %v422_v7 = vld [vmem:[%s3604_s25 + $0x858] sm:$0xff] }
  0x58   : > { %297 = vst [vmem:[%s3609_s26 + $0x240] sm:$0xff] %v296_v8  ;;  %v424_v8 = vld [vmem:[%s3604_s25 + $0x880] sm:$0xff] }
  0x59   : > { %299 = vst [vmem:[%s3609_s26 + $0x248] sm:$0xff] %v298_v9  ;;  %v426_v9 = vld [vmem:[%s3604_s25 + $0x888] sm:$0xff] }
  0x5a   : > { %301 = vst [vmem:[%s3609_s26 + $0x250] sm:$0xff] %v300_v10  ;;  %v428_v10 = vld [vmem:[%s3604_s25 + $0x890] sm:$0xff] }
  0x5b   : > { %303 = vst [vmem:[%s3609_s26 + $0x258] sm:$0xff] %v302_v11  ;;  %v430_v11 = vld [vmem:[%s3604_s25 + $0x898] sm:$0xff] }
  0x5c   : > { %305 = vst [vmem:[%s3609_s26 + $0x260] sm:$0xff] %v304_v12  ;;  %v432_v12 = vld [vmem:[%s3604_s25 + $0x8c0] sm:$0xff] }
  0x5d   : > { %307 = vst [vmem:[%s3609_s26 + $0x268] sm:$0xff] %v306_v13  ;;  %v434_v13 = vld [vmem:[%s3604_s25 + $0x8c8] sm:$0xff] }
  0x5e   : > { %309 = vst [vmem:[%s3609_s26 + $0x270] sm:$0xff] %v308_v14  ;;  %v436_v14 = vld [vmem:[%s3604_s25 + $0x8d0] sm:$0xff] }
  0x5f   : > { %311 = vst [vmem:[%s3609_s26 + $0x278] sm:$0xff] %v310_v15  ;;  %v438_v15 = vld [vmem:[%s3604_s25 + $0x8d8] sm:$0xff] }
  0x60   : > { %313 = vst [vmem:[%s3609_s26 + $0x280] sm:$0xff] %v312_v16  ;;  %v440_v16 = vld [vmem:[%s3604_s25 + $0x900] sm:$0xff] }
  0x61   : > { %315 = vst [vmem:[%s3609_s26 + $0x288] sm:$0xff] %v314_v17  ;;  %v442_v17 = vld [vmem:[%s3604_s25 + $0x908] sm:$0xff] }
  0x62   : > { %317 = vst [vmem:[%s3609_s26 + $0x290] sm:$0xff] %v316_v18  ;;  %v444_v18 = vld [vmem:[%s3604_s25 + $0x910] sm:$0xff] }
  0x63   : > { %319 = vst [vmem:[%s3609_s26 + $0x298] sm:$0xff] %v318_v19  ;;  %v446_v19 = vld [vmem:[%s3604_s25 + $0x918] sm:$0xff] }
  0x64   : > { %321 = vst [vmem:[%s3609_s26 + $0x2a0] sm:$0xff] %v320_v20  ;;  %v448_v20 = vld [vmem:[%s3604_s25 + $0x940] sm:$0xff] }
  0x65   : > { %323 = vst [vmem:[%s3609_s26 + $0x2a8] sm:$0xff] %v322_v21  ;;  %v450_v21 = vld [vmem:[%s3604_s25 + $0x948] sm:$0xff] }
  0x66   : > { %325 = vst [vmem:[%s3609_s26 + $0x2b0] sm:$0xff] %v324_v22  ;;  %v452_v22 = vld [vmem:[%s3604_s25 + $0x950] sm:$0xff] }
  0x67   : > { %327 = vst [vmem:[%s3609_s26 + $0x2b8] sm:$0xff] %v326_v23  ;;  %v454_v23 = vld [vmem:[%s3604_s25 + $0x958] sm:$0xff] }
  0x68   : > { %329 = vst [vmem:[%s3609_s26 + $0x2c0] sm:$0xff] %v328_v24  ;;  %v456_v24 = vld [vmem:[%s3604_s25 + $0x980] sm:$0xff] }
  0x69   : > { %331 = vst [vmem:[%s3609_s26 + $0x2c8] sm:$0xff] %v330_v25  ;;  %v458_v25 = vld [vmem:[%s3604_s25 + $0x988] sm:$0xff] }
  0x6a   : > { %333 = vst [vmem:[%s3609_s26 + $0x2d0] sm:$0xff] %v332_v26  ;;  %v460_v26 = vld [vmem:[%s3604_s25 + $0x990] sm:$0xff] }
  0x6b   : > { %335 = vst [vmem:[%s3609_s26 + $0x2d8] sm:$0xff] %v334_v27  ;;  %v462_v27 = vld [vmem:[%s3604_s25 + $0x998] sm:$0xff] }
  0x6c   : > { %337 = vst [vmem:[%s3609_s26 + $0x2e0] sm:$0xff] %v336_v28  ;;  %v464_v28 = vld [vmem:[%s3604_s25 + $0x9c0] sm:$0xff] }
  0x6d   : > { %339 = vst [vmem:[%s3609_s26 + $0x2e8] sm:$0xff] %v338_v29  ;;  %v466_v29 = vld [vmem:[%s3604_s25 + $0x9c8] sm:$0xff] }
  0x6e   : > { %341 = vst [vmem:[%s3609_s26 + $0x2f0] sm:$0xff] %v340_v30  ;;  %v468_v30 = vld [vmem:[%s3604_s25 + $0x9d0] sm:$0xff] }
  0x6f   : > { %343 = vst [vmem:[%s3609_s26 + $0x2f8] sm:$0xff] %v342_v31  ;;  %v470_v31 = vld [vmem:[%s3604_s25 + $0x9d8] sm:$0xff] }
  0x70   : > { %345 = vst [vmem:[%s3609_s26 + $0x300] sm:$0xff] %v344_v32  ;;  %v472_v32 = vld [vmem:[%s3604_s25 + $0xa00] sm:$0xff] }
  0x71   : > { %347 = vst [vmem:[%s3609_s26 + $0x308] sm:$0xff] %v346_v33  ;;  %v474_v33 = vld [vmem:[%s3604_s25 + $0xa08] sm:$0xff] }
  0x72   : > { %349 = vst [vmem:[%s3609_s26 + $0x310] sm:$0xff] %v348_v34  ;;  %v476_v34 = vld [vmem:[%s3604_s25 + $0xa10] sm:$0xff] }
  0x73   : > { %351 = vst [vmem:[%s3609_s26 + $0x318] sm:$0xff] %v350_v35  ;;  %v478_v35 = vld [vmem:[%s3604_s25 + $0xa18] sm:$0xff] }
  0x74   : > { %353 = vst [vmem:[%s3609_s26 + $0x320] sm:$0xff] %v352_v36  ;;  %v480_v36 = vld [vmem:[%s3604_s25 + $0xa40] sm:$0xff] }
  0x75   : > { %355 = vst [vmem:[%s3609_s26 + $0x328] sm:$0xff] %v354_v37  ;;  %v482_v37 = vld [vmem:[%s3604_s25 + $0xa48] sm:$0xff] }
  0x76   : > { %357 = vst [vmem:[%s3609_s26 + $0x330] sm:$0xff] %v356_v38  ;;  %v484_v38 = vld [vmem:[%s3604_s25 + $0xa50] sm:$0xff] }
  0x77   : > { %359 = vst [vmem:[%s3609_s26 + $0x338] sm:$0xff] %v358_v39  ;;  %v486_v39 = vld [vmem:[%s3604_s25 + $0xa58] sm:$0xff] }
  0x78   : > { %361 = vst [vmem:[%s3609_s26 + $0x340] sm:$0xff] %v360_v40  ;;  %v488_v40 = vld [vmem:[%s3604_s25 + $0xa80] sm:$0xff] }
  0x79   : > { %363 = vst [vmem:[%s3609_s26 + $0x348] sm:$0xff] %v362_v41  ;;  %v490_v41 = vld [vmem:[%s3604_s25 + $0xa88] sm:$0xff] }
  0x7a   : > { %365 = vst [vmem:[%s3609_s26 + $0x350] sm:$0xff] %v364_v42  ;;  %v492_v42 = vld [vmem:[%s3604_s25 + $0xa90] sm:$0xff] }
  0x7b   : > { %367 = vst [vmem:[%s3609_s26 + $0x358] sm:$0xff] %v366_v43  ;;  %v494_v43 = vld [vmem:[%s3604_s25 + $0xa98] sm:$0xff] }
  0x7c   : > { %369 = vst [vmem:[%s3609_s26 + $0x360] sm:$0xff] %v368_v44  ;;  %v496_v44 = vld [vmem:[%s3604_s25 + $0xac0] sm:$0xff] }
  0x7d   : > { %371 = vst [vmem:[%s3609_s26 + $0x368] sm:$0xff] %v370_v45  ;;  %v498_v45 = vld [vmem:[%s3604_s25 + $0xac8] sm:$0xff] }
  0x7e   : > { %373 = vst [vmem:[%s3609_s26 + $0x370] sm:$0xff] %v372_v46  ;;  %v500_v46 = vld [vmem:[%s3604_s25 + $0xad0] sm:$0xff] }
  0x7f   : > { %375 = vst [vmem:[%s3609_s26 + $0x378] sm:$0xff] %v374_v47  ;;  %v502_v47 = vld [vmem:[%s3604_s25 + $0xad8] sm:$0xff] }
  0x80   : > { %377 = vst [vmem:[%s3609_s26 + $0x380] sm:$0xff] %v376_v48  ;;  %v504_v48 = vld [vmem:[%s3604_s25 + $0xb00] sm:$0xff] }
  0x81   : > { %379 = vst [vmem:[%s3609_s26 + $0x388] sm:$0xff] %v378_v49  ;;  %v506_v49 = vld [vmem:[%s3604_s25 + $0xb08] sm:$0xff] }
  0x82   : > { %381 = vst [vmem:[%s3609_s26 + $0x390] sm:$0xff] %v380_v50  ;;  %v508_v50 = vld [vmem:[%s3604_s25 + $0xb10] sm:$0xff] }
  0x83   : > { %383 = vst [vmem:[%s3609_s26 + $0x398] sm:$0xff] %v382_v51  ;;  %v510_v51 = vld [vmem:[%s3604_s25 + $0xb18] sm:$0xff] }
  0x84   : > { %385 = vst [vmem:[%s3609_s26 + $0x3a0] sm:$0xff] %v384_v52  ;;  %v512_v52 = vld [vmem:[%s3604_s25 + $0xb40] sm:$0xff] }
  0x85   : > { %387 = vst [vmem:[%s3609_s26 + $0x3a8] sm:$0xff] %v386_v53  ;;  %v514_v53 = vld [vmem:[%s3604_s25 + $0xb48] sm:$0xff] }
  0x86   : > { %389 = vst [vmem:[%s3609_s26 + $0x3b0] sm:$0xff] %v388_v54  ;;  %v516_v54 = vld [vmem:[%s3604_s25 + $0xb50] sm:$0xff] }
  0x87   : > { %391 = vst [vmem:[%s3609_s26 + $0x3b8] sm:$0xff] %v390_v55  ;;  %v518_v55 = vld [vmem:[%s3604_s25 + $0xb58] sm:$0xff] }
  0x88   : > { %393 = vst [vmem:[%s3609_s26 + $0x3c0] sm:$0xff] %v392_v56  ;;  %v520_v56 = vld [vmem:[%s3604_s25 + $0xb80] sm:$0xff] }
  0x89   : > { %395 = vst [vmem:[%s3609_s26 + $0x3c8] sm:$0xff] %v394_v57  ;;  %v522_v57 = vld [vmem:[%s3604_s25 + $0xb88] sm:$0xff] }
  0x8a   : > { %397 = vst [vmem:[%s3609_s26 + $0x3d0] sm:$0xff] %v396_v58  ;;  %v524_v58 = vld [vmem:[%s3604_s25 + $0xb90] sm:$0xff] }
  0x8b   : > { %399 = vst [vmem:[%s3609_s26 + $0x3d8] sm:$0xff] %v398_v59  ;;  %v526_v59 = vld [vmem:[%s3604_s25 + $0xb98] sm:$0xff] }
  0x8c   : > { %401 = vst [vmem:[%s3609_s26 + $0x3e0] sm:$0xff] %v400_v60  ;;  %v528_v60 = vld [vmem:[%s3604_s25 + $0xbc0] sm:$0xff] }
  0x8d   : > { %403 = vst [vmem:[%s3609_s26 + $0x3e8] sm:$0xff] %v402_v61  ;;  %v530_v61 = vld [vmem:[%s3604_s25 + $0xbc8] sm:$0xff] }
  0x8e   : > { %405 = vst [vmem:[%s3609_s26 + $0x3f0] sm:$0xff] %v404_v62  ;;  %v532_v62 = vld [vmem:[%s3604_s25 + $0xbd0] sm:$0xff] }
  0x8f   : > { %407 = vst [vmem:[%s3609_s26 + $0x3f8] sm:$0xff] %v406_v63  ;;  %v534_v63 = vld [vmem:[%s3604_s25 + $0xbd8] sm:$0xff] }
  0x90   : > { %409 = vst [vmem:[%s3609_s26 + $0x400] sm:$0xff] %v408_v0  ;;  %v536_v0 = vld [vmem:[%s3604_s25 + $0xc00] sm:$0xff] }
  0x91   : > { %411 = vst [vmem:[%s3609_s26 + $0x408] sm:$0xff] %v410_v1  ;;  %v538_v1 = vld [vmem:[%s3604_s25 + $0xc08] sm:$0xff] }
  0x92   : > { %413 = vst [vmem:[%s3609_s26 + $0x410] sm:$0xff] %v412_v2  ;;  %v540_v2 = vld [vmem:[%s3604_s25 + $0xc10] sm:$0xff] }
  0x93   : > { %415 = vst [vmem:[%s3609_s26 + $0x418] sm:$0xff] %v414_v3  ;;  %v542_v3 = vld [vmem:[%s3604_s25 + $0xc18] sm:$0xff] }
  0x94   : > { %417 = vst [vmem:[%s3609_s26 + $0x420] sm:$0xff] %v416_v4  ;;  %v544_v4 = vld [vmem:[%s3604_s25 + $0xc40] sm:$0xff] }
  0x95   : > { %419 = vst [vmem:[%s3609_s26 + $0x428] sm:$0xff] %v418_v5  ;;  %v546_v5 = vld [vmem:[%s3604_s25 + $0xc48] sm:$0xff] }
  0x96   : > { %421 = vst [vmem:[%s3609_s26 + $0x430] sm:$0xff] %v420_v6  ;;  %v548_v6 = vld [vmem:[%s3604_s25 + $0xc50] sm:$0xff] }
  0x97   : > { %423 = vst [vmem:[%s3609_s26 + $0x438] sm:$0xff] %v422_v7  ;;  %v550_v7 = vld [vmem:[%s3604_s25 + $0xc58] sm:$0xff] }
  0x98   : > { %425 = vst [vmem:[%s3609_s26 + $0x440] sm:$0xff] %v424_v8  ;;  %v552_v8 = vld [vmem:[%s3604_s25 + $0xc80] sm:$0xff] }
  0x99   : > { %427 = vst [vmem:[%s3609_s26 + $0x448] sm:$0xff] %v426_v9  ;;  %v554_v9 = vld [vmem:[%s3604_s25 + $0xc88] sm:$0xff] }
  0x9a   : > { %429 = vst [vmem:[%s3609_s26 + $0x450] sm:$0xff] %v428_v10  ;;  %v556_v10 = vld [vmem:[%s3604_s25 + $0xc90] sm:$0xff] }
  0x9b   : > { %431 = vst [vmem:[%s3609_s26 + $0x458] sm:$0xff] %v430_v11  ;;  %v558_v11 = vld [vmem:[%s3604_s25 + $0xc98] sm:$0xff] }
  0x9c   : > { %433 = vst [vmem:[%s3609_s26 + $0x460] sm:$0xff] %v432_v12  ;;  %v560_v12 = vld [vmem:[%s3604_s25 + $0xcc0] sm:$0xff] }
  0x9d   : > { %435 = vst [vmem:[%s3609_s26 + $0x468] sm:$0xff] %v434_v13  ;;  %v562_v13 = vld [vmem:[%s3604_s25 + $0xcc8] sm:$0xff] }
  0x9e   : > { %437 = vst [vmem:[%s3609_s26 + $0x470] sm:$0xff] %v436_v14  ;;  %v564_v14 = vld [vmem:[%s3604_s25 + $0xcd0] sm:$0xff] }
  0x9f   : > { %439 = vst [vmem:[%s3609_s26 + $0x478] sm:$0xff] %v438_v15  ;;  %v566_v15 = vld [vmem:[%s3604_s25 + $0xcd8] sm:$0xff] }
  0xa0   : > { %441 = vst [vmem:[%s3609_s26 + $0x480] sm:$0xff] %v440_v16  ;;  %v568_v16 = vld [vmem:[%s3604_s25 + $0xd00] sm:$0xff] }
  0xa1   : > { %443 = vst [vmem:[%s3609_s26 + $0x488] sm:$0xff] %v442_v17  ;;  %v570_v17 = vld [vmem:[%s3604_s25 + $0xd08] sm:$0xff] }
  0xa2   : > { %445 = vst [vmem:[%s3609_s26 + $0x490] sm:$0xff] %v444_v18  ;;  %v572_v18 = vld [vmem:[%s3604_s25 + $0xd10] sm:$0xff] }
  0xa3   : > { %447 = vst [vmem:[%s3609_s26 + $0x498] sm:$0xff] %v446_v19  ;;  %v574_v19 = vld [vmem:[%s3604_s25 + $0xd18] sm:$0xff] }
  0xa4   : > { %449 = vst [vmem:[%s3609_s26 + $0x4a0] sm:$0xff] %v448_v20  ;;  %v576_v20 = vld [vmem:[%s3604_s25 + $0xd40] sm:$0xff] }
  0xa5   : > { %451 = vst [vmem:[%s3609_s26 + $0x4a8] sm:$0xff] %v450_v21  ;;  %v578_v21 = vld [vmem:[%s3604_s25 + $0xd48] sm:$0xff] }
  0xa6   : > { %453 = vst [vmem:[%s3609_s26 + $0x4b0] sm:$0xff] %v452_v22  ;;  %v580_v22 = vld [vmem:[%s3604_s25 + $0xd50] sm:$0xff] }
  0xa7   : > { %455 = vst [vmem:[%s3609_s26 + $0x4b8] sm:$0xff] %v454_v23  ;;  %v582_v23 = vld [vmem:[%s3604_s25 + $0xd58] sm:$0xff] }
  0xa8   : > { %457 = vst [vmem:[%s3609_s26 + $0x4c0] sm:$0xff] %v456_v24  ;;  %v584_v24 = vld [vmem:[%s3604_s25 + $0xd80] sm:$0xff] }
  0xa9   : > { %459 = vst [vmem:[%s3609_s26 + $0x4c8] sm:$0xff] %v458_v25  ;;  %v586_v25 = vld [vmem:[%s3604_s25 + $0xd88] sm:$0xff] }
  0xaa   : > { %461 = vst [vmem:[%s3609_s26 + $0x4d0] sm:$0xff] %v460_v26  ;;  %v588_v26 = vld [vmem:[%s3604_s25 + $0xd90] sm:$0xff] }
  0xab   : > { %463 = vst [vmem:[%s3609_s26 + $0x4d8] sm:$0xff] %v462_v27  ;;  %v590_v27 = vld [vmem:[%s3604_s25 + $0xd98] sm:$0xff] }
  0xac   : > { %465 = vst [vmem:[%s3609_s26 + $0x4e0] sm:$0xff] %v464_v28  ;;  %v592_v28 = vld [vmem:[%s3604_s25 + $0xdc0] sm:$0xff] }
  0xad   : > { %467 = vst [vmem:[%s3609_s26 + $0x4e8] sm:$0xff] %v466_v29  ;;  %v594_v29 = vld [vmem:[%s3604_s25 + $0xdc8] sm:$0xff] }
  0xae   : > { %469 = vst [vmem:[%s3609_s26 + $0x4f0] sm:$0xff] %v468_v30  ;;  %v596_v30 = vld [vmem:[%s3604_s25 + $0xdd0] sm:$0xff] }
  0xaf   : > { %471 = vst [vmem:[%s3609_s26 + $0x4f8] sm:$0xff] %v470_v31  ;;  %v598_v31 = vld [vmem:[%s3604_s25 + $0xdd8] sm:$0xff] }
  0xb0   : > { %473 = vst [vmem:[%s3609_s26 + $0x500] sm:$0xff] %v472_v32  ;;  %v600_v32 = vld [vmem:[%s3604_s25 + $0xe00] sm:$0xff] }
  0xb1   : > { %475 = vst [vmem:[%s3609_s26 + $0x508] sm:$0xff] %v474_v33  ;;  %v602_v33 = vld [vmem:[%s3604_s25 + $0xe08] sm:$0xff] }
  0xb2   : > { %477 = vst [vmem:[%s3609_s26 + $0x510] sm:$0xff] %v476_v34  ;;  %v604_v34 = vld [vmem:[%s3604_s25 + $0xe10] sm:$0xff] }
  0xb3   : > { %479 = vst [vmem:[%s3609_s26 + $0x518] sm:$0xff] %v478_v35  ;;  %v606_v35 = vld [vmem:[%s3604_s25 + $0xe18] sm:$0xff] }
  0xb4   : > { %481 = vst [vmem:[%s3609_s26 + $0x520] sm:$0xff] %v480_v36  ;;  %v608_v36 = vld [vmem:[%s3604_s25 + $0xe40] sm:$0xff] }
  0xb5   : > { %483 = vst [vmem:[%s3609_s26 + $0x528] sm:$0xff] %v482_v37  ;;  %v610_v37 = vld [vmem:[%s3604_s25 + $0xe48] sm:$0xff] }
  0xb6   : > { %485 = vst [vmem:[%s3609_s26 + $0x530] sm:$0xff] %v484_v38  ;;  %v612_v38 = vld [vmem:[%s3604_s25 + $0xe50] sm:$0xff] }
  0xb7   : > { %487 = vst [vmem:[%s3609_s26 + $0x538] sm:$0xff] %v486_v39  ;;  %v614_v39 = vld [vmem:[%s3604_s25 + $0xe58] sm:$0xff] }
  0xb8   : > { %489 = vst [vmem:[%s3609_s26 + $0x540] sm:$0xff] %v488_v40  ;;  %v616_v40 = vld [vmem:[%s3604_s25 + $0xe80] sm:$0xff] }
  0xb9   : > { %491 = vst [vmem:[%s3609_s26 + $0x548] sm:$0xff] %v490_v41  ;;  %v618_v41 = vld [vmem:[%s3604_s25 + $0xe88] sm:$0xff] }
  0xba   : > { %493 = vst [vmem:[%s3609_s26 + $0x550] sm:$0xff] %v492_v42  ;;  %v620_v42 = vld [vmem:[%s3604_s25 + $0xe90] sm:$0xff] }
  0xbb   : > { %495 = vst [vmem:[%s3609_s26 + $0x558] sm:$0xff] %v494_v43  ;;  %v622_v43 = vld [vmem:[%s3604_s25 + $0xe98] sm:$0xff] }
  0xbc   : > { %497 = vst [vmem:[%s3609_s26 + $0x560] sm:$0xff] %v496_v44  ;;  %v624_v44 = vld [vmem:[%s3604_s25 + $0xec0] sm:$0xff] }
  0xbd   : > { %499 = vst [vmem:[%s3609_s26 + $0x568] sm:$0xff] %v498_v45  ;;  %v626_v45 = vld [vmem:[%s3604_s25 + $0xec8] sm:$0xff] }
  0xbe   : > { %501 = vst [vmem:[%s3609_s26 + $0x570] sm:$0xff] %v500_v46  ;;  %v628_v46 = vld [vmem:[%s3604_s25 + $0xed0] sm:$0xff] }
  0xbf   : > { %503 = vst [vmem:[%s3609_s26 + $0x578] sm:$0xff] %v502_v47  ;;  %v630_v47 = vld [vmem:[%s3604_s25 + $0xed8] sm:$0xff] }
  0xc0   : > { %505 = vst [vmem:[%s3609_s26 + $0x580] sm:$0xff] %v504_v48  ;;  %v632_v48 = vld [vmem:[%s3604_s25 + $0xf00] sm:$0xff] }
  0xc1   : > { %507 = vst [vmem:[%s3609_s26 + $0x588] sm:$0xff] %v506_v49  ;;  %v634_v49 = vld [vmem:[%s3604_s25 + $0xf08] sm:$0xff] }
  0xc2   : > { %509 = vst [vmem:[%s3609_s26 + $0x590] sm:$0xff] %v508_v50  ;;  %v636_v50 = vld [vmem:[%s3604_s25 + $0xf10] sm:$0xff] }
  0xc3   : > { %511 = vst [vmem:[%s3609_s26 + $0x598] sm:$0xff] %v510_v51  ;;  %v638_v51 = vld [vmem:[%s3604_s25 + $0xf18] sm:$0xff] }
  0xc4   : > { %513 = vst [vmem:[%s3609_s26 + $0x5a0] sm:$0xff] %v512_v52  ;;  %v640_v52 = vld [vmem:[%s3604_s25 + $0xf40] sm:$0xff] }
  0xc5   : > { %515 = vst [vmem:[%s3609_s26 + $0x5a8] sm:$0xff] %v514_v53  ;;  %v642_v53 = vld [vmem:[%s3604_s25 + $0xf48] sm:$0xff] }
  0xc6   : > { %517 = vst [vmem:[%s3609_s26 + $0x5b0] sm:$0xff] %v516_v54  ;;  %v644_v54 = vld [vmem:[%s3604_s25 + $0xf50] sm:$0xff] }
  0xc7   : > { %519 = vst [vmem:[%s3609_s26 + $0x5b8] sm:$0xff] %v518_v55  ;;  %v646_v55 = vld [vmem:[%s3604_s25 + $0xf58] sm:$0xff] }
  0xc8   : > { %521 = vst [vmem:[%s3609_s26 + $0x5c0] sm:$0xff] %v520_v56  ;;  %v648_v56 = vld [vmem:[%s3604_s25 + $0xf80] sm:$0xff] }
  0xc9   : > { %523 = vst [vmem:[%s3609_s26 + $0x5c8] sm:$0xff] %v522_v57  ;;  %v650_v57 = vld [vmem:[%s3604_s25 + $0xf88] sm:$0xff] }
  0xca   : > { %525 = vst [vmem:[%s3609_s26 + $0x5d0] sm:$0xff] %v524_v58  ;;  %v652_v58 = vld [vmem:[%s3604_s25 + $0xf90] sm:$0xff] }
  0xcb   : > { %527 = vst [vmem:[%s3609_s26 + $0x5d8] sm:$0xff] %v526_v59  ;;  %v654_v59 = vld [vmem:[%s3604_s25 + $0xf98] sm:$0xff] }
  0xcc   : > { %529 = vst [vmem:[%s3609_s26 + $0x5e0] sm:$0xff] %v528_v60  ;;  %v656_v60 = vld [vmem:[%s3604_s25 + $0xfc0] sm:$0xff] }
  0xcd   : > { %531 = vst [vmem:[%s3609_s26 + $0x5e8] sm:$0xff] %v530_v61  ;;  %v658_v61 = vld [vmem:[%s3604_s25 + $0xfc8] sm:$0xff] }
  0xce   : > { %533 = vst [vmem:[%s3609_s26 + $0x5f0] sm:$0xff] %v532_v62  ;;  %v660_v62 = vld [vmem:[%s3604_s25 + $0xfd0] sm:$0xff] }
  0xcf   : > { %535 = vst [vmem:[%s3609_s26 + $0x5f8] sm:$0xff] %v534_v63  ;;  %v662_v63 = vld [vmem:[%s3604_s25 + $0xfd8] sm:$0xff] }
  0xd0   : > { %537 = vst [vmem:[%s3609_s26 + $0x600] sm:$0xff] %v536_v0  ;;  %v664_v0 = vld [vmem:[%s3604_s25 + $0x1000] sm:$0xff] }
  0xd1   : > { %539 = vst [vmem:[%s3609_s26 + $0x608] sm:$0xff] %v538_v1  ;;  %v666_v1 = vld [vmem:[%s3604_s25 + $0x1008] sm:$0xff] }
  0xd2   : > { %541 = vst [vmem:[%s3609_s26 + $0x610] sm:$0xff] %v540_v2  ;;  %v668_v2 = vld [vmem:[%s3604_s25 + $0x1010] sm:$0xff] }
  0xd3   : > { %543 = vst [vmem:[%s3609_s26 + $0x618] sm:$0xff] %v542_v3  ;;  %v670_v3 = vld [vmem:[%s3604_s25 + $0x1018] sm:$0xff] }
  0xd4   : > { %545 = vst [vmem:[%s3609_s26 + $0x620] sm:$0xff] %v544_v4  ;;  %v672_v4 = vld [vmem:[%s3604_s25 + $0x1040] sm:$0xff] }
  0xd5   : > { %547 = vst [vmem:[%s3609_s26 + $0x628] sm:$0xff] %v546_v5  ;;  %v674_v5 = vld [vmem:[%s3604_s25 + $0x1048] sm:$0xff] }
  0xd6   : > { %549 = vst [vmem:[%s3609_s26 + $0x630] sm:$0xff] %v548_v6  ;;  %v676_v6 = vld [vmem:[%s3604_s25 + $0x1050] sm:$0xff] }
  0xd7   : > { %551 = vst [vmem:[%s3609_s26 + $0x638] sm:$0xff] %v550_v7  ;;  %v678_v7 = vld [vmem:[%s3604_s25 + $0x1058] sm:$0xff] }
  0xd8   : > { %553 = vst [vmem:[%s3609_s26 + $0x640] sm:$0xff] %v552_v8  ;;  %v680_v8 = vld [vmem:[%s3604_s25 + $0x1080] sm:$0xff] }
  0xd9   : > { %555 = vst [vmem:[%s3609_s26 + $0x648] sm:$0xff] %v554_v9  ;;  %v682_v9 = vld [vmem:[%s3604_s25 + $0x1088] sm:$0xff] }
  0xda   : > { %557 = vst [vmem:[%s3609_s26 + $0x650] sm:$0xff] %v556_v10  ;;  %v684_v10 = vld [vmem:[%s3604_s25 + $0x1090] sm:$0xff] }
  0xdb   : > { %559 = vst [vmem:[%s3609_s26 + $0x658] sm:$0xff] %v558_v11  ;;  %v686_v11 = vld [vmem:[%s3604_s25 + $0x1098] sm:$0xff] }
  0xdc   : > { %561 = vst [vmem:[%s3609_s26 + $0x660] sm:$0xff] %v560_v12  ;;  %v688_v12 = vld [vmem:[%s3604_s25 + $0x10c0] sm:$0xff] }
  0xdd   : > { %563 = vst [vmem:[%s3609_s26 + $0x668] sm:$0xff] %v562_v13  ;;  %v690_v13 = vld [vmem:[%s3604_s25 + $0x10c8] sm:$0xff] }
  0xde   : > { %565 = vst [vmem:[%s3609_s26 + $0x670] sm:$0xff] %v564_v14  ;;  %v692_v14 = vld [vmem:[%s3604_s25 + $0x10d0] sm:$0xff] }
  0xdf   : > { %567 = vst [vmem:[%s3609_s26 + $0x678] sm:$0xff] %v566_v15  ;;  %v694_v15 = vld [vmem:[%s3604_s25 + $0x10d8] sm:$0xff] }
  0xe0   : > { %569 = vst [vmem:[%s3609_s26 + $0x680] sm:$0xff] %v568_v16  ;;  %v696_v16 = vld [vmem:[%s3604_s25 + $0x1100] sm:$0xff] }
  0xe1   : > { %571 = vst [vmem:[%s3609_s26 + $0x688] sm:$0xff] %v570_v17  ;;  %v698_v17 = vld [vmem:[%s3604_s25 + $0x1108] sm:$0xff] }
  0xe2   : > { %573 = vst [vmem:[%s3609_s26 + $0x690] sm:$0xff] %v572_v18  ;;  %v700_v18 = vld [vmem:[%s3604_s25 + $0x1110] sm:$0xff] }
  0xe3   : > { %575 = vst [vmem:[%s3609_s26 + $0x698] sm:$0xff] %v574_v19  ;;  %v702_v19 = vld [vmem:[%s3604_s25 + $0x1118] sm:$0xff] }
  0xe4   : > { %577 = vst [vmem:[%s3609_s26 + $0x6a0] sm:$0xff] %v576_v20  ;;  %v704_v20 = vld [vmem:[%s3604_s25 + $0x1140] sm:$0xff] }
  0xe5   : > { %579 = vst [vmem:[%s3609_s26 + $0x6a8] sm:$0xff] %v578_v21  ;;  %v706_v21 = vld [vmem:[%s3604_s25 + $0x1148] sm:$0xff] }
  0xe6   : > { %581 = vst [vmem:[%s3609_s26 + $0x6b0] sm:$0xff] %v580_v22  ;;  %v708_v22 = vld [vmem:[%s3604_s25 + $0x1150] sm:$0xff] }
  0xe7   : > { %583 = vst [vmem:[%s3609_s26 + $0x6b8] sm:$0xff] %v582_v23  ;;  %v710_v23 = vld [vmem:[%s3604_s25 + $0x1158] sm:$0xff] }
  0xe8   : > { %585 = vst [vmem:[%s3609_s26 + $0x6c0] sm:$0xff] %v584_v24  ;;  %v712_v24 = vld [vmem:[%s3604_s25 + $0x1180] sm:$0xff] }
  0xe9   : > { %587 = vst [vmem:[%s3609_s26 + $0x6c8] sm:$0xff] %v586_v25  ;;  %v714_v25 = vld [vmem:[%s3604_s25 + $0x1188] sm:$0xff] }
  0xea   : > { %589 = vst [vmem:[%s3609_s26 + $0x6d0] sm:$0xff] %v588_v26  ;;  %v716_v26 = vld [vmem:[%s3604_s25 + $0x1190] sm:$0xff] }
  0xeb   : > { %591 = vst [vmem:[%s3609_s26 + $0x6d8] sm:$0xff] %v590_v27  ;;  %v718_v27 = vld [vmem:[%s3604_s25 + $0x1198] sm:$0xff] }
  0xec   : > { %593 = vst [vmem:[%s3609_s26 + $0x6e0] sm:$0xff] %v592_v28  ;;  %v720_v28 = vld [vmem:[%s3604_s25 + $0x11c0] sm:$0xff] }
  0xed   : > { %595 = vst [vmem:[%s3609_s26 + $0x6e8] sm:$0xff] %v594_v29  ;;  %v722_v29 = vld [vmem:[%s3604_s25 + $0x11c8] sm:$0xff] }
  0xee   : > { %597 = vst [vmem:[%s3609_s26 + $0x6f0] sm:$0xff] %v596_v30  ;;  %v724_v30 = vld [vmem:[%s3604_s25 + $0x11d0] sm:$0xff] }
  0xef   : > { %599 = vst [vmem:[%s3609_s26 + $0x6f8] sm:$0xff] %v598_v31  ;;  %v726_v31 = vld [vmem:[%s3604_s25 + $0x11d8] sm:$0xff] }
  0xf0   : > { %601 = vst [vmem:[%s3609_s26 + $0x700] sm:$0xff] %v600_v32  ;;  %v728_v32 = vld [vmem:[%s3604_s25 + $0x1200] sm:$0xff] }
  0xf1   : > { %603 = vst [vmem:[%s3609_s26 + $0x708] sm:$0xff] %v602_v33  ;;  %v730_v33 = vld [vmem:[%s3604_s25 + $0x1208] sm:$0xff] }
  0xf2   : > { %605 = vst [vmem:[%s3609_s26 + $0x710] sm:$0xff] %v604_v34  ;;  %v732_v34 = vld [vmem:[%s3604_s25 + $0x1210] sm:$0xff] }
  0xf3   : > { %607 = vst [vmem:[%s3609_s26 + $0x718] sm:$0xff] %v606_v35  ;;  %v734_v35 = vld [vmem:[%s3604_s25 + $0x1218] sm:$0xff] }
  0xf4   : > { %609 = vst [vmem:[%s3609_s26 + $0x720] sm:$0xff] %v608_v36  ;;  %v736_v36 = vld [vmem:[%s3604_s25 + $0x1240] sm:$0xff] }
  0xf5   : > { %611 = vst [vmem:[%s3609_s26 + $0x728] sm:$0xff] %v610_v37  ;;  %v738_v37 = vld [vmem:[%s3604_s25 + $0x1248] sm:$0xff] }
  0xf6   : > { %613 = vst [vmem:[%s3609_s26 + $0x730] sm:$0xff] %v612_v38  ;;  %v740_v38 = vld [vmem:[%s3604_s25 + $0x1250] sm:$0xff] }
  0xf7   : > { %615 = vst [vmem:[%s3609_s26 + $0x738] sm:$0xff] %v614_v39  ;;  %v742_v39 = vld [vmem:[%s3604_s25 + $0x1258] sm:$0xff] }
  0xf8   : > { %617 = vst [vmem:[%s3609_s26 + $0x740] sm:$0xff] %v616_v40  ;;  %v744_v40 = vld [vmem:[%s3604_s25 + $0x1280] sm:$0xff] }
  0xf9   : > { %619 = vst [vmem:[%s3609_s26 + $0x748] sm:$0xff] %v618_v41  ;;  %v746_v41 = vld [vmem:[%s3604_s25 + $0x1288] sm:$0xff] }
  0xfa   : > { %621 = vst [vmem:[%s3609_s26 + $0x750] sm:$0xff] %v620_v42  ;;  %v748_v42 = vld [vmem:[%s3604_s25 + $0x1290] sm:$0xff] }
  0xfb   : > { %623 = vst [vmem:[%s3609_s26 + $0x758] sm:$0xff] %v622_v43  ;;  %v750_v43 = vld [vmem:[%s3604_s25 + $0x1298] sm:$0xff] }
  0xfc   : > { %625 = vst [vmem:[%s3609_s26 + $0x760] sm:$0xff] %v624_v44  ;;  %v752_v44 = vld [vmem:[%s3604_s25 + $0x12c0] sm:$0xff] }
  0xfd   : > { %627 = vst [vmem:[%s3609_s26 + $0x768] sm:$0xff] %v626_v45  ;;  %v754_v45 = vld [vmem:[%s3604_s25 + $0x12c8] sm:$0xff] }
  0xfe   : > { %629 = vst [vmem:[%s3609_s26 + $0x770] sm:$0xff] %v628_v46  ;;  %v756_v46 = vld [vmem:[%s3604_s25 + $0x12d0] sm:$0xff] }
  0xff   : > { %631 = vst [vmem:[%s3609_s26 + $0x778] sm:$0xff] %v630_v47  ;;  %v758_v47 = vld [vmem:[%s3604_s25 + $0x12d8] sm:$0xff] }
 0x100   : > { %633 = vst [vmem:[%s3609_s26 + $0x780] sm:$0xff] %v632_v48  ;;  %v760_v48 = vld [vmem:[%s3604_s25 + $0x1300] sm:$0xff] }
 0x101   : > { %635 = vst [vmem:[%s3609_s26 + $0x788] sm:$0xff] %v634_v49  ;;  %v762_v49 = vld [vmem:[%s3604_s25 + $0x1308] sm:$0xff] }
 0x102   : > { %637 = vst [vmem:[%s3609_s26 + $0x790] sm:$0xff] %v636_v50  ;;  %v764_v50 = vld [vmem:[%s3604_s25 + $0x1310] sm:$0xff] }
 0x103   : > { %639 = vst [vmem:[%s3609_s26 + $0x798] sm:$0xff] %v638_v51  ;;  %v766_v51 = vld [vmem:[%s3604_s25 + $0x1318] sm:$0xff] }
 0x104   : > { %641 = vst [vmem:[%s3609_s26 + $0x7a0] sm:$0xff] %v640_v52  ;;  %v768_v52 = vld [vmem:[%s3604_s25 + $0x1340] sm:$0xff] }
 0x105   : > { %643 = vst [vmem:[%s3609_s26 + $0x7a8] sm:$0xff] %v642_v53  ;;  %v770_v53 = vld [vmem:[%s3604_s25 + $0x1348] sm:$0xff] }
 0x106   : > { %645 = vst [vmem:[%s3609_s26 + $0x7b0] sm:$0xff] %v644_v54  ;;  %v772_v54 = vld [vmem:[%s3604_s25 + $0x1350] sm:$0xff] }
 0x107   : > { %647 = vst [vmem:[%s3609_s26 + $0x7b8] sm:$0xff] %v646_v55  ;;  %v774_v55 = vld [vmem:[%s3604_s25 + $0x1358] sm:$0xff] }
 0x108   : > { %649 = vst [vmem:[%s3609_s26 + $0x7c0] sm:$0xff] %v648_v56  ;;  %v776_v56 = vld [vmem:[%s3604_s25 + $0x1380] sm:$0xff] }
 0x109   : > { %651 = vst [vmem:[%s3609_s26 + $0x7c8] sm:$0xff] %v650_v57  ;;  %v778_v57 = vld [vmem:[%s3604_s25 + $0x1388] sm:$0xff] }
 0x10a   : > { %653 = vst [vmem:[%s3609_s26 + $0x7d0] sm:$0xff] %v652_v58  ;;  %v780_v58 = vld [vmem:[%s3604_s25 + $0x1390] sm:$0xff] }
 0x10b   : > { %655 = vst [vmem:[%s3609_s26 + $0x7d8] sm:$0xff] %v654_v59  ;;  %v782_v59 = vld [vmem:[%s3604_s25 + $0x1398] sm:$0xff] }
 0x10c   : > { %657 = vst [vmem:[%s3609_s26 + $0x7e0] sm:$0xff] %v656_v60  ;;  %v784_v60 = vld [vmem:[%s3604_s25 + $0x13c0] sm:$0xff] }
 0x10d   : > { %659 = vst [vmem:[%s3609_s26 + $0x7e8] sm:$0xff] %v658_v61  ;;  %v786_v61 = vld [vmem:[%s3604_s25 + $0x13c8] sm:$0xff] }
 0x10e   : > { %661 = vst [vmem:[%s3609_s26 + $0x7f0] sm:$0xff] %v660_v62  ;;  %v788_v62 = vld [vmem:[%s3604_s25 + $0x13d0] sm:$0xff] }
 0x10f   : > { %663 = vst [vmem:[%s3609_s26 + $0x7f8] sm:$0xff] %v662_v63  ;;  %v790_v63 = vld [vmem:[%s3604_s25 + $0x13d8] sm:$0xff] }
 0x110   : > { %665 = vst [vmem:[%s3609_s26 + $0x800] sm:$0xff] %v664_v0  ;;  %v792_v0 = vld [vmem:[%s3604_s25 + $0x1400] sm:$0xff] }
 0x111   : > { %667 = vst [vmem:[%s3609_s26 + $0x808] sm:$0xff] %v666_v1  ;;  %v794_v1 = vld [vmem:[%s3604_s25 + $0x1408] sm:$0xff] }
 0x112   : > { %669 = vst [vmem:[%s3609_s26 + $0x810] sm:$0xff] %v668_v2  ;;  %v796_v2 = vld [vmem:[%s3604_s25 + $0x1410] sm:$0xff] }
 0x113   : > { %671 = vst [vmem:[%s3609_s26 + $0x818] sm:$0xff] %v670_v3  ;;  %v798_v3 = vld [vmem:[%s3604_s25 + $0x1418] sm:$0xff] }
 0x114   : > { %673 = vst [vmem:[%s3609_s26 + $0x820] sm:$0xff] %v672_v4  ;;  %v800_v4 = vld [vmem:[%s3604_s25 + $0x1440] sm:$0xff] }
 0x115   : > { %675 = vst [vmem:[%s3609_s26 + $0x828] sm:$0xff] %v674_v5  ;;  %v802_v5 = vld [vmem:[%s3604_s25 + $0x1448] sm:$0xff] }
 0x116   : > { %677 = vst [vmem:[%s3609_s26 + $0x830] sm:$0xff] %v676_v6  ;;  %v804_v6 = vld [vmem:[%s3604_s25 + $0x1450] sm:$0xff] }
 0x117   : > { %679 = vst [vmem:[%s3609_s26 + $0x838] sm:$0xff] %v678_v7  ;;  %v806_v7 = vld [vmem:[%s3604_s25 + $0x1458] sm:$0xff] }
 0x118   : > { %681 = vst [vmem:[%s3609_s26 + $0x840] sm:$0xff] %v680_v8  ;;  %v808_v8 = vld [vmem:[%s3604_s25 + $0x1480] sm:$0xff] }
 0x119   : > { %683 = vst [vmem:[%s3609_s26 + $0x848] sm:$0xff] %v682_v9  ;;  %v810_v9 = vld [vmem:[%s3604_s25 + $0x1488] sm:$0xff] }
 0x11a   : > { %685 = vst [vmem:[%s3609_s26 + $0x850] sm:$0xff] %v684_v10  ;;  %v812_v10 = vld [vmem:[%s3604_s25 + $0x1490] sm:$0xff] }
 0x11b   : > { %687 = vst [vmem:[%s3609_s26 + $0x858] sm:$0xff] %v686_v11  ;;  %v814_v11 = vld [vmem:[%s3604_s25 + $0x1498] sm:$0xff] }
 0x11c   : > { %689 = vst [vmem:[%s3609_s26 + $0x860] sm:$0xff] %v688_v12  ;;  %v816_v12 = vld [vmem:[%s3604_s25 + $0x14c0] sm:$0xff] }
 0x11d   : > { %691 = vst [vmem:[%s3609_s26 + $0x868] sm:$0xff] %v690_v13  ;;  %v818_v13 = vld [vmem:[%s3604_s25 + $0x14c8] sm:$0xff] }
 0x11e   : > { %693 = vst [vmem:[%s3609_s26 + $0x870] sm:$0xff] %v692_v14  ;;  %v820_v14 = vld [vmem:[%s3604_s25 + $0x14d0] sm:$0xff] }
 0x11f   : > { %695 = vst [vmem:[%s3609_s26 + $0x878] sm:$0xff] %v694_v15  ;;  %v822_v15 = vld [vmem:[%s3604_s25 + $0x14d8] sm:$0xff] }
 0x120   : > { %697 = vst [vmem:[%s3609_s26 + $0x880] sm:$0xff] %v696_v16  ;;  %v824_v16 = vld [vmem:[%s3604_s25 + $0x1500] sm:$0xff] }
 0x121   : > { %699 = vst [vmem:[%s3609_s26 + $0x888] sm:$0xff] %v698_v17  ;;  %v826_v17 = vld [vmem:[%s3604_s25 + $0x1508] sm:$0xff] }
 0x122   : > { %701 = vst [vmem:[%s3609_s26 + $0x890] sm:$0xff] %v700_v18  ;;  %v828_v18 = vld [vmem:[%s3604_s25 + $0x1510] sm:$0xff] }
 0x123   : > { %703 = vst [vmem:[%s3609_s26 + $0x898] sm:$0xff] %v702_v19  ;;  %v830_v19 = vld [vmem:[%s3604_s25 + $0x1518] sm:$0xff] }
 0x124   : > { %705 = vst [vmem:[%s3609_s26 + $0x8a0] sm:$0xff] %v704_v20  ;;  %v832_v20 = vld [vmem:[%s3604_s25 + $0x1540] sm:$0xff] }
 0x125   : > { %707 = vst [vmem:[%s3609_s26 + $0x8a8] sm:$0xff] %v706_v21  ;;  %v834_v21 = vld [vmem:[%s3604_s25 + $0x1548] sm:$0xff] }
 0x126   : > { %709 = vst [vmem:[%s3609_s26 + $0x8b0] sm:$0xff] %v708_v22  ;;  %v836_v22 = vld [vmem:[%s3604_s25 + $0x1550] sm:$0xff] }
 0x127   : > { %711 = vst [vmem:[%s3609_s26 + $0x8b8] sm:$0xff] %v710_v23  ;;  %v838_v23 = vld [vmem:[%s3604_s25 + $0x1558] sm:$0xff] }
 0x128   : > { %713 = vst [vmem:[%s3609_s26 + $0x8c0] sm:$0xff] %v712_v24  ;;  %v840_v24 = vld [vmem:[%s3604_s25 + $0x1580] sm:$0xff] }
 0x129   : > { %715 = vst [vmem:[%s3609_s26 + $0x8c8] sm:$0xff] %v714_v25  ;;  %v842_v25 = vld [vmem:[%s3604_s25 + $0x1588] sm:$0xff] }
 0x12a   : > { %717 = vst [vmem:[%s3609_s26 + $0x8d0] sm:$0xff] %v716_v26  ;;  %v844_v26 = vld [vmem:[%s3604_s25 + $0x1590] sm:$0xff] }
 0x12b   : > { %719 = vst [vmem:[%s3609_s26 + $0x8d8] sm:$0xff] %v718_v27  ;;  %v846_v27 = vld [vmem:[%s3604_s25 + $0x1598] sm:$0xff] }
 0x12c   : > { %721 = vst [vmem:[%s3609_s26 + $0x8e0] sm:$0xff] %v720_v28  ;;  %v848_v28 = vld [vmem:[%s3604_s25 + $0x15c0] sm:$0xff] }
 0x12d   : > { %723 = vst [vmem:[%s3609_s26 + $0x8e8] sm:$0xff] %v722_v29  ;;  %v850_v29 = vld [vmem:[%s3604_s25 + $0x15c8] sm:$0xff] }
 0x12e   : > { %725 = vst [vmem:[%s3609_s26 + $0x8f0] sm:$0xff] %v724_v30  ;;  %v852_v30 = vld [vmem:[%s3604_s25 + $0x15d0] sm:$0xff] }
 0x12f   : > { %727 = vst [vmem:[%s3609_s26 + $0x8f8] sm:$0xff] %v726_v31  ;;  %v854_v31 = vld [vmem:[%s3604_s25 + $0x15d8] sm:$0xff] }
 0x130   : > { %729 = vst [vmem:[%s3609_s26 + $0x900] sm:$0xff] %v728_v32  ;;  %v856_v32 = vld [vmem:[%s3604_s25 + $0x1600] sm:$0xff] }
 0x131   : > { %731 = vst [vmem:[%s3609_s26 + $0x908] sm:$0xff] %v730_v33  ;;  %v858_v33 = vld [vmem:[%s3604_s25 + $0x1608] sm:$0xff] }
 0x132   : > { %733 = vst [vmem:[%s3609_s26 + $0x910] sm:$0xff] %v732_v34  ;;  %v860_v34 = vld [vmem:[%s3604_s25 + $0x1610] sm:$0xff] }
 0x133   : > { %735 = vst [vmem:[%s3609_s26 + $0x918] sm:$0xff] %v734_v35  ;;  %v862_v35 = vld [vmem:[%s3604_s25 + $0x1618] sm:$0xff] }
 0x134   : > { %737 = vst [vmem:[%s3609_s26 + $0x920] sm:$0xff] %v736_v36  ;;  %v864_v36 = vld [vmem:[%s3604_s25 + $0x1640] sm:$0xff] }
 0x135   : > { %739 = vst [vmem:[%s3609_s26 + $0x928] sm:$0xff] %v738_v37  ;;  %v866_v37 = vld [vmem:[%s3604_s25 + $0x1648] sm:$0xff] }
 0x136   : > { %741 = vst [vmem:[%s3609_s26 + $0x930] sm:$0xff] %v740_v38  ;;  %v868_v38 = vld [vmem:[%s3604_s25 + $0x1650] sm:$0xff] }
 0x137   : > { %743 = vst [vmem:[%s3609_s26 + $0x938] sm:$0xff] %v742_v39  ;;  %v870_v39 = vld [vmem:[%s3604_s25 + $0x1658] sm:$0xff] }
 0x138   : > { %745 = vst [vmem:[%s3609_s26 + $0x940] sm:$0xff] %v744_v40  ;;  %v872_v40 = vld [vmem:[%s3604_s25 + $0x1680] sm:$0xff] }
 0x139   : > { %747 = vst [vmem:[%s3609_s26 + $0x948] sm:$0xff] %v746_v41  ;;  %v874_v41 = vld [vmem:[%s3604_s25 + $0x1688] sm:$0xff] }
 0x13a   : > { %749 = vst [vmem:[%s3609_s26 + $0x950] sm:$0xff] %v748_v42  ;;  %v876_v42 = vld [vmem:[%s3604_s25 + $0x1690] sm:$0xff] }
 0x13b   : > { %751 = vst [vmem:[%s3609_s26 + $0x958] sm:$0xff] %v750_v43  ;;  %v878_v43 = vld [vmem:[%s3604_s25 + $0x1698] sm:$0xff] }
 0x13c   : > { %753 = vst [vmem:[%s3609_s26 + $0x960] sm:$0xff] %v752_v44  ;;  %v880_v44 = vld [vmem:[%s3604_s25 + $0x16c0] sm:$0xff] }
 0x13d   : > { %755 = vst [vmem:[%s3609_s26 + $0x968] sm:$0xff] %v754_v45  ;;  %v882_v45 = vld [vmem:[%s3604_s25 + $0x16c8] sm:$0xff] }
 0x13e   : > { %757 = vst [vmem:[%s3609_s26 + $0x970] sm:$0xff] %v756_v46  ;;  %v884_v46 = vld [vmem:[%s3604_s25 + $0x16d0] sm:$0xff] }
 0x13f   : > { %759 = vst [vmem:[%s3609_s26 + $0x978] sm:$0xff] %v758_v47  ;;  %v886_v47 = vld [vmem:[%s3604_s25 + $0x16d8] sm:$0xff] }
 0x140   : > { %761 = vst [vmem:[%s3609_s26 + $0x980] sm:$0xff] %v760_v48  ;;  %v888_v48 = vld [vmem:[%s3604_s25 + $0x1700] sm:$0xff] }
 0x141   : > { %763 = vst [vmem:[%s3609_s26 + $0x988] sm:$0xff] %v762_v49  ;;  %v890_v49 = vld [vmem:[%s3604_s25 + $0x1708] sm:$0xff] }
 0x142   : > { %765 = vst [vmem:[%s3609_s26 + $0x990] sm:$0xff] %v764_v50  ;;  %v892_v50 = vld [vmem:[%s3604_s25 + $0x1710] sm:$0xff] }
 0x143   : > { %767 = vst [vmem:[%s3609_s26 + $0x998] sm:$0xff] %v766_v51  ;;  %v894_v51 = vld [vmem:[%s3604_s25 + $0x1718] sm:$0xff] }
 0x144   : > { %769 = vst [vmem:[%s3609_s26 + $0x9a0] sm:$0xff] %v768_v52  ;;  %v896_v52 = vld [vmem:[%s3604_s25 + $0x1740] sm:$0xff] }
 0x145   : > { %771 = vst [vmem:[%s3609_s26 + $0x9a8] sm:$0xff] %v770_v53  ;;  %v898_v53 = vld [vmem:[%s3604_s25 + $0x1748] sm:$0xff] }
 0x146   : > { %773 = vst [vmem:[%s3609_s26 + $0x9b0] sm:$0xff] %v772_v54  ;;  %v900_v54 = vld [vmem:[%s3604_s25 + $0x1750] sm:$0xff] }
 0x147   : > { %775 = vst [vmem:[%s3609_s26 + $0x9b8] sm:$0xff] %v774_v55  ;;  %v902_v55 = vld [vmem:[%s3604_s25 + $0x1758] sm:$0xff] }
 0x148   : > { %777 = vst [vmem:[%s3609_s26 + $0x9c0] sm:$0xff] %v776_v56  ;;  %v904_v56 = vld [vmem:[%s3604_s25 + $0x1780] sm:$0xff] }
 0x149   : > { %779 = vst [vmem:[%s3609_s26 + $0x9c8] sm:$0xff] %v778_v57  ;;  %v906_v57 = vld [vmem:[%s3604_s25 + $0x1788] sm:$0xff] }
 0x14a   : > { %781 = vst [vmem:[%s3609_s26 + $0x9d0] sm:$0xff] %v780_v58  ;;  %v908_v58 = vld [vmem:[%s3604_s25 + $0x1790] sm:$0xff] }
 0x14b   : > { %783 = vst [vmem:[%s3609_s26 + $0x9d8] sm:$0xff] %v782_v59  ;;  %v910_v59 = vld [vmem:[%s3604_s25 + $0x1798] sm:$0xff] }
 0x14c   : > { %785 = vst [vmem:[%s3609_s26 + $0x9e0] sm:$0xff] %v784_v60  ;;  %v912_v60 = vld [vmem:[%s3604_s25 + $0x17c0] sm:$0xff] }
 0x14d   : > { %787 = vst [vmem:[%s3609_s26 + $0x9e8] sm:$0xff] %v786_v61  ;;  %v914_v61 = vld [vmem:[%s3604_s25 + $0x17c8] sm:$0xff] }
 0x14e   : > { %789 = vst [vmem:[%s3609_s26 + $0x9f0] sm:$0xff] %v788_v62  ;;  %v916_v62 = vld [vmem:[%s3604_s25 + $0x17d0] sm:$0xff] }
 0x14f   : > { %791 = vst [vmem:[%s3609_s26 + $0x9f8] sm:$0xff] %v790_v63  ;;  %v918_v63 = vld [vmem:[%s3604_s25 + $0x17d8] sm:$0xff] }
 0x150   : > { %793 = vst [vmem:[%s3609_s26 + $0xa00] sm:$0xff] %v792_v0  ;;  %v920_v0 = vld [vmem:[%s3604_s25 + $0x1800] sm:$0xff] }
 0x151   : > { %795 = vst [vmem:[%s3609_s26 + $0xa08] sm:$0xff] %v794_v1  ;;  %v922_v1 = vld [vmem:[%s3604_s25 + $0x1808] sm:$0xff] }
 0x152   : > { %797 = vst [vmem:[%s3609_s26 + $0xa10] sm:$0xff] %v796_v2  ;;  %v924_v2 = vld [vmem:[%s3604_s25 + $0x1810] sm:$0xff] }
 0x153   : > { %799 = vst [vmem:[%s3609_s26 + $0xa18] sm:$0xff] %v798_v3  ;;  %v926_v3 = vld [vmem:[%s3604_s25 + $0x1818] sm:$0xff] }
 0x154   : > { %801 = vst [vmem:[%s3609_s26 + $0xa20] sm:$0xff] %v800_v4  ;;  %v928_v4 = vld [vmem:[%s3604_s25 + $0x1840] sm:$0xff] }
 0x155   : > { %803 = vst [vmem:[%s3609_s26 + $0xa28] sm:$0xff] %v802_v5  ;;  %v930_v5 = vld [vmem:[%s3604_s25 + $0x1848] sm:$0xff] }
 0x156   : > { %805 = vst [vmem:[%s3609_s26 + $0xa30] sm:$0xff] %v804_v6  ;;  %v932_v6 = vld [vmem:[%s3604_s25 + $0x1850] sm:$0xff] }
 0x157   : > { %807 = vst [vmem:[%s3609_s26 + $0xa38] sm:$0xff] %v806_v7  ;;  %v934_v7 = vld [vmem:[%s3604_s25 + $0x1858] sm:$0xff] }
 0x158   : > { %809 = vst [vmem:[%s3609_s26 + $0xa40] sm:$0xff] %v808_v8  ;;  %v936_v8 = vld [vmem:[%s3604_s25 + $0x1880] sm:$0xff] }
 0x159   : > { %811 = vst [vmem:[%s3609_s26 + $0xa48] sm:$0xff] %v810_v9  ;;  %v938_v9 = vld [vmem:[%s3604_s25 + $0x1888] sm:$0xff] }
 0x15a   : > { %813 = vst [vmem:[%s3609_s26 + $0xa50] sm:$0xff] %v812_v10  ;;  %v940_v10 = vld [vmem:[%s3604_s25 + $0x1890] sm:$0xff] }
 0x15b   : > { %815 = vst [vmem:[%s3609_s26 + $0xa58] sm:$0xff] %v814_v11  ;;  %v942_v11 = vld [vmem:[%s3604_s25 + $0x1898] sm:$0xff] }
 0x15c   : > { %817 = vst [vmem:[%s3609_s26 + $0xa60] sm:$0xff] %v816_v12  ;;  %v944_v12 = vld [vmem:[%s3604_s25 + $0x18c0] sm:$0xff] }
 0x15d   : > { %819 = vst [vmem:[%s3609_s26 + $0xa68] sm:$0xff] %v818_v13  ;;  %v946_v13 = vld [vmem:[%s3604_s25 + $0x18c8] sm:$0xff] }
 0x15e   : > { %821 = vst [vmem:[%s3609_s26 + $0xa70] sm:$0xff] %v820_v14  ;;  %v948_v14 = vld [vmem:[%s3604_s25 + $0x18d0] sm:$0xff] }
 0x15f   : > { %823 = vst [vmem:[%s3609_s26 + $0xa78] sm:$0xff] %v822_v15  ;;  %v950_v15 = vld [vmem:[%s3604_s25 + $0x18d8] sm:$0xff] }
 0x160   : > { %825 = vst [vmem:[%s3609_s26 + $0xa80] sm:$0xff] %v824_v16  ;;  %v952_v16 = vld [vmem:[%s3604_s25 + $0x1900] sm:$0xff] }
 0x161   : > { %827 = vst [vmem:[%s3609_s26 + $0xa88] sm:$0xff] %v826_v17  ;;  %v954_v17 = vld [vmem:[%s3604_s25 + $0x1908] sm:$0xff] }
 0x162   : > { %829 = vst [vmem:[%s3609_s26 + $0xa90] sm:$0xff] %v828_v18  ;;  %v956_v18 = vld [vmem:[%s3604_s25 + $0x1910] sm:$0xff] }
 0x163   : > { %831 = vst [vmem:[%s3609_s26 + $0xa98] sm:$0xff] %v830_v19  ;;  %v958_v19 = vld [vmem:[%s3604_s25 + $0x1918] sm:$0xff] }
 0x164   : > { %833 = vst [vmem:[%s3609_s26 + $0xaa0] sm:$0xff] %v832_v20  ;;  %v960_v20 = vld [vmem:[%s3604_s25 + $0x1940] sm:$0xff] }
 0x165   : > { %835 = vst [vmem:[%s3609_s26 + $0xaa8] sm:$0xff] %v834_v21  ;;  %v962_v21 = vld [vmem:[%s3604_s25 + $0x1948] sm:$0xff] }
 0x166   : > { %837 = vst [vmem:[%s3609_s26 + $0xab0] sm:$0xff] %v836_v22  ;;  %v964_v22 = vld [vmem:[%s3604_s25 + $0x1950] sm:$0xff] }
 0x167   : > { %839 = vst [vmem:[%s3609_s26 + $0xab8] sm:$0xff] %v838_v23  ;;  %v966_v23 = vld [vmem:[%s3604_s25 + $0x1958] sm:$0xff] }
 0x168   : > { %841 = vst [vmem:[%s3609_s26 + $0xac0] sm:$0xff] %v840_v24  ;;  %v968_v24 = vld [vmem:[%s3604_s25 + $0x1980] sm:$0xff] }
 0x169   : > { %843 = vst [vmem:[%s3609_s26 + $0xac8] sm:$0xff] %v842_v25  ;;  %v970_v25 = vld [vmem:[%s3604_s25 + $0x1988] sm:$0xff] }
 0x16a   : > { %845 = vst [vmem:[%s3609_s26 + $0xad0] sm:$0xff] %v844_v26  ;;  %v972_v26 = vld [vmem:[%s3604_s25 + $0x1990] sm:$0xff] }
 0x16b   : > { %847 = vst [vmem:[%s3609_s26 + $0xad8] sm:$0xff] %v846_v27  ;;  %v974_v27 = vld [vmem:[%s3604_s25 + $0x1998] sm:$0xff] }
 0x16c   : > { %849 = vst [vmem:[%s3609_s26 + $0xae0] sm:$0xff] %v848_v28  ;;  %v976_v28 = vld [vmem:[%s3604_s25 + $0x19c0] sm:$0xff] }
 0x16d   : > { %851 = vst [vmem:[%s3609_s26 + $0xae8] sm:$0xff] %v850_v29  ;;  %v978_v29 = vld [vmem:[%s3604_s25 + $0x19c8] sm:$0xff] }
 0x16e   : > { %853 = vst [vmem:[%s3609_s26 + $0xaf0] sm:$0xff] %v852_v30  ;;  %v980_v30 = vld [vmem:[%s3604_s25 + $0x19d0] sm:$0xff] }
 0x16f   : > { %855 = vst [vmem:[%s3609_s26 + $0xaf8] sm:$0xff] %v854_v31  ;;  %v982_v31 = vld [vmem:[%s3604_s25 + $0x19d8] sm:$0xff] }
 0x170   : > { %857 = vst [vmem:[%s3609_s26 + $0xb00] sm:$0xff] %v856_v32  ;;  %v984_v32 = vld [vmem:[%s3604_s25 + $0x1a00] sm:$0xff] }
 0x171   : > { %859 = vst [vmem:[%s3609_s26 + $0xb08] sm:$0xff] %v858_v33  ;;  %v986_v33 = vld [vmem:[%s3604_s25 + $0x1a08] sm:$0xff] }
 0x172   : > { %861 = vst [vmem:[%s3609_s26 + $0xb10] sm:$0xff] %v860_v34  ;;  %v988_v34 = vld [vmem:[%s3604_s25 + $0x1a10] sm:$0xff] }
 0x173   : > { %863 = vst [vmem:[%s3609_s26 + $0xb18] sm:$0xff] %v862_v35  ;;  %v990_v35 = vld [vmem:[%s3604_s25 + $0x1a18] sm:$0xff] }
 0x174   : > { %865 = vst [vmem:[%s3609_s26 + $0xb20] sm:$0xff] %v864_v36  ;;  %v992_v36 = vld [vmem:[%s3604_s25 + $0x1a40] sm:$0xff] }
 0x175   : > { %867 = vst [vmem:[%s3609_s26 + $0xb28] sm:$0xff] %v866_v37  ;;  %v994_v37 = vld [vmem:[%s3604_s25 + $0x1a48] sm:$0xff] }
 0x176   : > { %869 = vst [vmem:[%s3609_s26 + $0xb30] sm:$0xff] %v868_v38  ;;  %v996_v38 = vld [vmem:[%s3604_s25 + $0x1a50] sm:$0xff] }
 0x177   : > { %871 = vst [vmem:[%s3609_s26 + $0xb38] sm:$0xff] %v870_v39  ;;  %v998_v39 = vld [vmem:[%s3604_s25 + $0x1a58] sm:$0xff] }
 0x178   : > { %873 = vst [vmem:[%s3609_s26 + $0xb40] sm:$0xff] %v872_v40  ;;  %v1000_v40 = vld [vmem:[%s3604_s25 + $0x1a80] sm:$0xff] }
 0x179   : > { %875 = vst [vmem:[%s3609_s26 + $0xb48] sm:$0xff] %v874_v41  ;;  %v1002_v41 = vld [vmem:[%s3604_s25 + $0x1a88] sm:$0xff] }
 0x17a   : > { %877 = vst [vmem:[%s3609_s26 + $0xb50] sm:$0xff] %v876_v42  ;;  %v1004_v42 = vld [vmem:[%s3604_s25 + $0x1a90] sm:$0xff] }
 0x17b   : > { %879 = vst [vmem:[%s3609_s26 + $0xb58] sm:$0xff] %v878_v43  ;;  %v1006_v43 = vld [vmem:[%s3604_s25 + $0x1a98] sm:$0xff] }
 0x17c   : > { %881 = vst [vmem:[%s3609_s26 + $0xb60] sm:$0xff] %v880_v44  ;;  %v1008_v44 = vld [vmem:[%s3604_s25 + $0x1ac0] sm:$0xff] }
 0x17d   : > { %883 = vst [vmem:[%s3609_s26 + $0xb68] sm:$0xff] %v882_v45  ;;  %v1010_v45 = vld [vmem:[%s3604_s25 + $0x1ac8] sm:$0xff] }
 0x17e   : > { %885 = vst [vmem:[%s3609_s26 + $0xb70] sm:$0xff] %v884_v46  ;;  %v1012_v46 = vld [vmem:[%s3604_s25 + $0x1ad0] sm:$0xff] }
 0x17f   : > { %887 = vst [vmem:[%s3609_s26 + $0xb78] sm:$0xff] %v886_v47  ;;  %v1014_v47 = vld [vmem:[%s3604_s25 + $0x1ad8] sm:$0xff] }
 0x180   : > { %889 = vst [vmem:[%s3609_s26 + $0xb80] sm:$0xff] %v888_v48  ;;  %v1016_v48 = vld [vmem:[%s3604_s25 + $0x1b00] sm:$0xff] }
 0x181   : > { %891 = vst [vmem:[%s3609_s26 + $0xb88] sm:$0xff] %v890_v49  ;;  %v1018_v49 = vld [vmem:[%s3604_s25 + $0x1b08] sm:$0xff] }
 0x182   : > { %893 = vst [vmem:[%s3609_s26 + $0xb90] sm:$0xff] %v892_v50  ;;  %v1020_v50 = vld [vmem:[%s3604_s25 + $0x1b10] sm:$0xff] }
 0x183   : > { %895 = vst [vmem:[%s3609_s26 + $0xb98] sm:$0xff] %v894_v51  ;;  %v1022_v51 = vld [vmem:[%s3604_s25 + $0x1b18] sm:$0xff] }
 0x184   : > { %897 = vst [vmem:[%s3609_s26 + $0xba0] sm:$0xff] %v896_v52  ;;  %v1024_v52 = vld [vmem:[%s3604_s25 + $0x1b40] sm:$0xff] }
 0x185   : > { %899 = vst [vmem:[%s3609_s26 + $0xba8] sm:$0xff] %v898_v53  ;;  %v1026_v53 = vld [vmem:[%s3604_s25 + $0x1b48] sm:$0xff] }
 0x186   : > { %901 = vst [vmem:[%s3609_s26 + $0xbb0] sm:$0xff] %v900_v54  ;;  %v1028_v54 = vld [vmem:[%s3604_s25 + $0x1b50] sm:$0xff] }
 0x187   : > { %903 = vst [vmem:[%s3609_s26 + $0xbb8] sm:$0xff] %v902_v55  ;;  %v1030_v55 = vld [vmem:[%s3604_s25 + $0x1b58] sm:$0xff] }
 0x188   : > { %905 = vst [vmem:[%s3609_s26 + $0xbc0] sm:$0xff] %v904_v56  ;;  %v1032_v56 = vld [vmem:[%s3604_s25 + $0x1b80] sm:$0xff] }
 0x189   : > { %907 = vst [vmem:[%s3609_s26 + $0xbc8] sm:$0xff] %v906_v57  ;;  %v1034_v57 = vld [vmem:[%s3604_s25 + $0x1b88] sm:$0xff] }
 0x18a   : > { %909 = vst [vmem:[%s3609_s26 + $0xbd0] sm:$0xff] %v908_v58  ;;  %v1036_v58 = vld [vmem:[%s3604_s25 + $0x1b90] sm:$0xff] }
 0x18b   : > { %911 = vst [vmem:[%s3609_s26 + $0xbd8] sm:$0xff] %v910_v59  ;;  %v1038_v59 = vld [vmem:[%s3604_s25 + $0x1b98] sm:$0xff] }
 0x18c   : > { %913 = vst [vmem:[%s3609_s26 + $0xbe0] sm:$0xff] %v912_v60  ;;  %v1040_v60 = vld [vmem:[%s3604_s25 + $0x1bc0] sm:$0xff] }
 0x18d   : > { %915 = vst [vmem:[%s3609_s26 + $0xbe8] sm:$0xff] %v914_v61  ;;  %v1042_v61 = vld [vmem:[%s3604_s25 + $0x1bc8] sm:$0xff] }
 0x18e   : > { %917 = vst [vmem:[%s3609_s26 + $0xbf0] sm:$0xff] %v916_v62  ;;  %v1044_v62 = vld [vmem:[%s3604_s25 + $0x1bd0] sm:$0xff] }
 0x18f   : > { %919 = vst [vmem:[%s3609_s26 + $0xbf8] sm:$0xff] %v918_v63  ;;  %v1046_v63 = vld [vmem:[%s3604_s25 + $0x1bd8] sm:$0xff] }
 0x190   : > { %921 = vst [vmem:[%s3609_s26 + $0xc00] sm:$0xff] %v920_v0  ;;  %v1048_v0 = vld [vmem:[%s3604_s25 + $0x1c00] sm:$0xff] }
 0x191   : > { %923 = vst [vmem:[%s3609_s26 + $0xc08] sm:$0xff] %v922_v1  ;;  %v1050_v1 = vld [vmem:[%s3604_s25 + $0x1c08] sm:$0xff] }
 0x192   : > { %925 = vst [vmem:[%s3609_s26 + $0xc10] sm:$0xff] %v924_v2  ;;  %v1052_v2 = vld [vmem:[%s3604_s25 + $0x1c10] sm:$0xff] }
 0x193   : > { %927 = vst [vmem:[%s3609_s26 + $0xc18] sm:$0xff] %v926_v3  ;;  %v1054_v3 = vld [vmem:[%s3604_s25 + $0x1c18] sm:$0xff] }
 0x194   : > { %929 = vst [vmem:[%s3609_s26 + $0xc20] sm:$0xff] %v928_v4  ;;  %v1056_v4 = vld [vmem:[%s3604_s25 + $0x1c40] sm:$0xff] }
 0x195   : > { %931 = vst [vmem:[%s3609_s26 + $0xc28] sm:$0xff] %v930_v5  ;;  %v1058_v5 = vld [vmem:[%s3604_s25 + $0x1c48] sm:$0xff] }
 0x196   : > { %933 = vst [vmem:[%s3609_s26 + $0xc30] sm:$0xff] %v932_v6  ;;  %v1060_v6 = vld [vmem:[%s3604_s25 + $0x1c50] sm:$0xff] }
 0x197   : > { %935 = vst [vmem:[%s3609_s26 + $0xc38] sm:$0xff] %v934_v7  ;;  %v1062_v7 = vld [vmem:[%s3604_s25 + $0x1c58] sm:$0xff] }
 0x198   : > { %937 = vst [vmem:[%s3609_s26 + $0xc40] sm:$0xff] %v936_v8  ;;  %v1064_v8 = vld [vmem:[%s3604_s25 + $0x1c80] sm:$0xff] }
 0x199   : > { %939 = vst [vmem:[%s3609_s26 + $0xc48] sm:$0xff] %v938_v9  ;;  %v1066_v9 = vld [vmem:[%s3604_s25 + $0x1c88] sm:$0xff] }
 0x19a   : > { %941 = vst [vmem:[%s3609_s26 + $0xc50] sm:$0xff] %v940_v10  ;;  %v1068_v10 = vld [vmem:[%s3604_s25 + $0x1c90] sm:$0xff] }
 0x19b   : > { %943 = vst [vmem:[%s3609_s26 + $0xc58] sm:$0xff] %v942_v11  ;;  %v1070_v11 = vld [vmem:[%s3604_s25 + $0x1c98] sm:$0xff] }
 0x19c   : > { %945 = vst [vmem:[%s3609_s26 + $0xc60] sm:$0xff] %v944_v12  ;;  %v1072_v12 = vld [vmem:[%s3604_s25 + $0x1cc0] sm:$0xff] }
 0x19d   : > { %947 = vst [vmem:[%s3609_s26 + $0xc68] sm:$0xff] %v946_v13  ;;  %v1074_v13 = vld [vmem:[%s3604_s25 + $0x1cc8] sm:$0xff] }
 0x19e   : > { %949 = vst [vmem:[%s3609_s26 + $0xc70] sm:$0xff] %v948_v14  ;;  %v1076_v14 = vld [vmem:[%s3604_s25 + $0x1cd0] sm:$0xff] }
 0x19f   : > { %951 = vst [vmem:[%s3609_s26 + $0xc78] sm:$0xff] %v950_v15  ;;  %v1078_v15 = vld [vmem:[%s3604_s25 + $0x1cd8] sm:$0xff] }
 0x1a0   : > { %953 = vst [vmem:[%s3609_s26 + $0xc80] sm:$0xff] %v952_v16  ;;  %v1080_v16 = vld [vmem:[%s3604_s25 + $0x1d00] sm:$0xff] }
 0x1a1   : > { %955 = vst [vmem:[%s3609_s26 + $0xc88] sm:$0xff] %v954_v17  ;;  %v1082_v17 = vld [vmem:[%s3604_s25 + $0x1d08] sm:$0xff] }
 0x1a2   : > { %957 = vst [vmem:[%s3609_s26 + $0xc90] sm:$0xff] %v956_v18  ;;  %v1084_v18 = vld [vmem:[%s3604_s25 + $0x1d10] sm:$0xff] }
 0x1a3   : > { %959 = vst [vmem:[%s3609_s26 + $0xc98] sm:$0xff] %v958_v19  ;;  %v1086_v19 = vld [vmem:[%s3604_s25 + $0x1d18] sm:$0xff] }
 0x1a4   : > { %961 = vst [vmem:[%s3609_s26 + $0xca0] sm:$0xff] %v960_v20  ;;  %v1088_v20 = vld [vmem:[%s3604_s25 + $0x1d40] sm:$0xff] }
 0x1a5   : > { %963 = vst [vmem:[%s3609_s26 + $0xca8] sm:$0xff] %v962_v21  ;;  %v1090_v21 = vld [vmem:[%s3604_s25 + $0x1d48] sm:$0xff] }
 0x1a6   : > { %965 = vst [vmem:[%s3609_s26 + $0xcb0] sm:$0xff] %v964_v22  ;;  %v1092_v22 = vld [vmem:[%s3604_s25 + $0x1d50] sm:$0xff] }
 0x1a7   : > { %967 = vst [vmem:[%s3609_s26 + $0xcb8] sm:$0xff] %v966_v23  ;;  %v1094_v23 = vld [vmem:[%s3604_s25 + $0x1d58] sm:$0xff] }
 0x1a8   : > { %969 = vst [vmem:[%s3609_s26 + $0xcc0] sm:$0xff] %v968_v24  ;;  %v1096_v24 = vld [vmem:[%s3604_s25 + $0x1d80] sm:$0xff] }
 0x1a9   : > { %971 = vst [vmem:[%s3609_s26 + $0xcc8] sm:$0xff] %v970_v25  ;;  %v1098_v25 = vld [vmem:[%s3604_s25 + $0x1d88] sm:$0xff] }
 0x1aa   : > { %973 = vst [vmem:[%s3609_s26 + $0xcd0] sm:$0xff] %v972_v26  ;;  %v1100_v26 = vld [vmem:[%s3604_s25 + $0x1d90] sm:$0xff] }
 0x1ab   : > { %975 = vst [vmem:[%s3609_s26 + $0xcd8] sm:$0xff] %v974_v27  ;;  %v1102_v27 = vld [vmem:[%s3604_s25 + $0x1d98] sm:$0xff] }
 0x1ac   : > { %977 = vst [vmem:[%s3609_s26 + $0xce0] sm:$0xff] %v976_v28  ;;  %v1104_v28 = vld [vmem:[%s3604_s25 + $0x1dc0] sm:$0xff] }
 0x1ad   : > { %979 = vst [vmem:[%s3609_s26 + $0xce8] sm:$0xff] %v978_v29  ;;  %v1106_v29 = vld [vmem:[%s3604_s25 + $0x1dc8] sm:$0xff] }
 0x1ae   : > { %981 = vst [vmem:[%s3609_s26 + $0xcf0] sm:$0xff] %v980_v30  ;;  %v1108_v30 = vld [vmem:[%s3604_s25 + $0x1dd0] sm:$0xff] }
 0x1af   : > { %983 = vst [vmem:[%s3609_s26 + $0xcf8] sm:$0xff] %v982_v31  ;;  %v1110_v31 = vld [vmem:[%s3604_s25 + $0x1dd8] sm:$0xff] }
 0x1b0   : > { %985 = vst [vmem:[%s3609_s26 + $0xd00] sm:$0xff] %v984_v32  ;;  %v1112_v32 = vld [vmem:[%s3604_s25 + $0x1e00] sm:$0xff] }
 0x1b1   : > { %987 = vst [vmem:[%s3609_s26 + $0xd08] sm:$0xff] %v986_v33  ;;  %v1114_v33 = vld [vmem:[%s3604_s25 + $0x1e08] sm:$0xff] }
 0x1b2   : > { %989 = vst [vmem:[%s3609_s26 + $0xd10] sm:$0xff] %v988_v34  ;;  %v1116_v34 = vld [vmem:[%s3604_s25 + $0x1e10] sm:$0xff] }
 0x1b3   : > { %991 = vst [vmem:[%s3609_s26 + $0xd18] sm:$0xff] %v990_v35  ;;  %v1118_v35 = vld [vmem:[%s3604_s25 + $0x1e18] sm:$0xff] }
 0x1b4   : > { %993 = vst [vmem:[%s3609_s26 + $0xd20] sm:$0xff] %v992_v36  ;;  %v1120_v36 = vld [vmem:[%s3604_s25 + $0x1e40] sm:$0xff] }
 0x1b5   : > { %995 = vst [vmem:[%s3609_s26 + $0xd28] sm:$0xff] %v994_v37  ;;  %v1122_v37 = vld [vmem:[%s3604_s25 + $0x1e48] sm:$0xff] }
 0x1b6   : > { %997 = vst [vmem:[%s3609_s26 + $0xd30] sm:$0xff] %v996_v38  ;;  %v1124_v38 = vld [vmem:[%s3604_s25 + $0x1e50] sm:$0xff] }
 0x1b7   : > { %999 = vst [vmem:[%s3609_s26 + $0xd38] sm:$0xff] %v998_v39  ;;  %v1126_v39 = vld [vmem:[%s3604_s25 + $0x1e58] sm:$0xff] }
 0x1b8   : > { %1001 = vst [vmem:[%s3609_s26 + $0xd40] sm:$0xff] %v1000_v40  ;;  %v1128_v40 = vld [vmem:[%s3604_s25 + $0x1e80] sm:$0xff] }
 0x1b9   : > { %1003 = vst [vmem:[%s3609_s26 + $0xd48] sm:$0xff] %v1002_v41  ;;  %v1130_v41 = vld [vmem:[%s3604_s25 + $0x1e88] sm:$0xff] }
 0x1ba   : > { %1005 = vst [vmem:[%s3609_s26 + $0xd50] sm:$0xff] %v1004_v42  ;;  %v1132_v42 = vld [vmem:[%s3604_s25 + $0x1e90] sm:$0xff] }
 0x1bb   : > { %1007 = vst [vmem:[%s3609_s26 + $0xd58] sm:$0xff] %v1006_v43  ;;  %v1134_v43 = vld [vmem:[%s3604_s25 + $0x1e98] sm:$0xff] }
 0x1bc   : > { %1009 = vst [vmem:[%s3609_s26 + $0xd60] sm:$0xff] %v1008_v44  ;;  %v1136_v44 = vld [vmem:[%s3604_s25 + $0x1ec0] sm:$0xff] }
 0x1bd   : > { %1011 = vst [vmem:[%s3609_s26 + $0xd68] sm:$0xff] %v1010_v45  ;;  %v1138_v45 = vld [vmem:[%s3604_s25 + $0x1ec8] sm:$0xff] }
 0x1be   : > { %1013 = vst [vmem:[%s3609_s26 + $0xd70] sm:$0xff] %v1012_v46  ;;  %v1140_v46 = vld [vmem:[%s3604_s25 + $0x1ed0] sm:$0xff] }
 0x1bf   : > { %1015 = vst [vmem:[%s3609_s26 + $0xd78] sm:$0xff] %v1014_v47  ;;  %v1142_v47 = vld [vmem:[%s3604_s25 + $0x1ed8] sm:$0xff] }
 0x1c0   : > { %1017 = vst [vmem:[%s3609_s26 + $0xd80] sm:$0xff] %v1016_v48  ;;  %v1144_v48 = vld [vmem:[%s3604_s25 + $0x1f00] sm:$0xff] }
 0x1c1   : > { %1019 = vst [vmem:[%s3609_s26 + $0xd88] sm:$0xff] %v1018_v49  ;;  %v1146_v49 = vld [vmem:[%s3604_s25 + $0x1f08] sm:$0xff] }
 0x1c2   : > { %1021 = vst [vmem:[%s3609_s26 + $0xd90] sm:$0xff] %v1020_v50  ;;  %v1148_v50 = vld [vmem:[%s3604_s25 + $0x1f10] sm:$0xff] }
 0x1c3   : > { %1023 = vst [vmem:[%s3609_s26 + $0xd98] sm:$0xff] %v1022_v51  ;;  %v1150_v51 = vld [vmem:[%s3604_s25 + $0x1f18] sm:$0xff] }
 0x1c4   : > { %1025 = vst [vmem:[%s3609_s26 + $0xda0] sm:$0xff] %v1024_v52  ;;  %v1152_v52 = vld [vmem:[%s3604_s25 + $0x1f40] sm:$0xff] }
 0x1c5   : > { %1027 = vst [vmem:[%s3609_s26 + $0xda8] sm:$0xff] %v1026_v53  ;;  %v1154_v53 = vld [vmem:[%s3604_s25 + $0x1f48] sm:$0xff] }
 0x1c6   : > { %1029 = vst [vmem:[%s3609_s26 + $0xdb0] sm:$0xff] %v1028_v54  ;;  %v1156_v54 = vld [vmem:[%s3604_s25 + $0x1f50] sm:$0xff] }
 0x1c7   : > { %1031 = vst [vmem:[%s3609_s26 + $0xdb8] sm:$0xff] %v1030_v55  ;;  %v1158_v55 = vld [vmem:[%s3604_s25 + $0x1f58] sm:$0xff] }
 0x1c8   : > { %1033 = vst [vmem:[%s3609_s26 + $0xdc0] sm:$0xff] %v1032_v56  ;;  %v1160_v56 = vld [vmem:[%s3604_s25 + $0x1f80] sm:$0xff] }
 0x1c9   : > { %1035 = vst [vmem:[%s3609_s26 + $0xdc8] sm:$0xff] %v1034_v57  ;;  %v1162_v57 = vld [vmem:[%s3604_s25 + $0x1f88] sm:$0xff] }
 0x1ca   : > { %1037 = vst [vmem:[%s3609_s26 + $0xdd0] sm:$0xff] %v1036_v58  ;;  %v1164_v58 = vld [vmem:[%s3604_s25 + $0x1f90] sm:$0xff] }
 0x1cb   : > { %1039 = vst [vmem:[%s3609_s26 + $0xdd8] sm:$0xff] %v1038_v59  ;;  %v1166_v59 = vld [vmem:[%s3604_s25 + $0x1f98] sm:$0xff] }
 0x1cc   : > { %1041 = vst [vmem:[%s3609_s26 + $0xde0] sm:$0xff] %v1040_v60  ;;  %v1168_v60 = vld [vmem:[%s3604_s25 + $0x1fc0] sm:$0xff] }
 0x1cd   : > { %1043 = vst [vmem:[%s3609_s26 + $0xde8] sm:$0xff] %v1042_v61  ;;  %v1170_v61 = vld [vmem:[%s3604_s25 + $0x1fc8] sm:$0xff] }
 0x1ce   : > { %1045 = vst [vmem:[%s3609_s26 + $0xdf0] sm:$0xff] %v1044_v62  ;;  %v1172_v62 = vld [vmem:[%s3604_s25 + $0x1fd0] sm:$0xff] }
 0x1cf   : > { %1047 = vst [vmem:[%s3609_s26 + $0xdf8] sm:$0xff] %v1046_v63  ;;  %v1174_v63 = vld [vmem:[%s3604_s25 + $0x1fd8] sm:$0xff] }
 0x1d0   : > { %1049 = vst [vmem:[%s3609_s26 + $0xe00] sm:$0xff] %v1048_v0  ;;  %v1176_v0 = vld [vmem:[%s3604_s25 + $0x2000] sm:$0xff] }
 0x1d1   : > { %1051 = vst [vmem:[%s3609_s26 + $0xe08] sm:$0xff] %v1050_v1  ;;  %v1178_v1 = vld [vmem:[%s3604_s25 + $0x2008] sm:$0xff] }
 0x1d2   : > { %1053 = vst [vmem:[%s3609_s26 + $0xe10] sm:$0xff] %v1052_v2  ;;  %v1180_v2 = vld [vmem:[%s3604_s25 + $0x2010] sm:$0xff] }
 0x1d3   : > { %1055 = vst [vmem:[%s3609_s26 + $0xe18] sm:$0xff] %v1054_v3  ;;  %v1182_v3 = vld [vmem:[%s3604_s25 + $0x2018] sm:$0xff] }
 0x1d4   : > { %1057 = vst [vmem:[%s3609_s26 + $0xe20] sm:$0xff] %v1056_v4  ;;  %v1184_v4 = vld [vmem:[%s3604_s25 + $0x2040] sm:$0xff] }
 0x1d5   : > { %1059 = vst [vmem:[%s3609_s26 + $0xe28] sm:$0xff] %v1058_v5  ;;  %v1186_v5 = vld [vmem:[%s3604_s25 + $0x2048] sm:$0xff] }
 0x1d6   : > { %1061 = vst [vmem:[%s3609_s26 + $0xe30] sm:$0xff] %v1060_v6  ;;  %v1188_v6 = vld [vmem:[%s3604_s25 + $0x2050] sm:$0xff] }
 0x1d7   : > { %1063 = vst [vmem:[%s3609_s26 + $0xe38] sm:$0xff] %v1062_v7  ;;  %v1190_v7 = vld [vmem:[%s3604_s25 + $0x2058] sm:$0xff] }
 0x1d8   : > { %1065 = vst [vmem:[%s3609_s26 + $0xe40] sm:$0xff] %v1064_v8  ;;  %v1192_v8 = vld [vmem:[%s3604_s25 + $0x2080] sm:$0xff] }
 0x1d9   : > { %1067 = vst [vmem:[%s3609_s26 + $0xe48] sm:$0xff] %v1066_v9  ;;  %v1194_v9 = vld [vmem:[%s3604_s25 + $0x2088] sm:$0xff] }
 0x1da   : > { %1069 = vst [vmem:[%s3609_s26 + $0xe50] sm:$0xff] %v1068_v10  ;;  %v1196_v10 = vld [vmem:[%s3604_s25 + $0x2090] sm:$0xff] }
 0x1db   : > { %1071 = vst [vmem:[%s3609_s26 + $0xe58] sm:$0xff] %v1070_v11  ;;  %v1198_v11 = vld [vmem:[%s3604_s25 + $0x2098] sm:$0xff] }
 0x1dc   : > { %1073 = vst [vmem:[%s3609_s26 + $0xe60] sm:$0xff] %v1072_v12  ;;  %v1200_v12 = vld [vmem:[%s3604_s25 + $0x20c0] sm:$0xff] }
 0x1dd   : > { %1075 = vst [vmem:[%s3609_s26 + $0xe68] sm:$0xff] %v1074_v13  ;;  %v1202_v13 = vld [vmem:[%s3604_s25 + $0x20c8] sm:$0xff] }
 0x1de   : > { %1077 = vst [vmem:[%s3609_s26 + $0xe70] sm:$0xff] %v1076_v14  ;;  %v1204_v14 = vld [vmem:[%s3604_s25 + $0x20d0] sm:$0xff] }
 0x1df   : > { %1079 = vst [vmem:[%s3609_s26 + $0xe78] sm:$0xff] %v1078_v15  ;;  %v1206_v15 = vld [vmem:[%s3604_s25 + $0x20d8] sm:$0xff] }
 0x1e0   : > { %1081 = vst [vmem:[%s3609_s26 + $0xe80] sm:$0xff] %v1080_v16  ;;  %v1208_v16 = vld [vmem:[%s3604_s25 + $0x2100] sm:$0xff] }
 0x1e1   : > { %1083 = vst [vmem:[%s3609_s26 + $0xe88] sm:$0xff] %v1082_v17  ;;  %v1210_v17 = vld [vmem:[%s3604_s25 + $0x2108] sm:$0xff] }
 0x1e2   : > { %1085 = vst [vmem:[%s3609_s26 + $0xe90] sm:$0xff] %v1084_v18  ;;  %v1212_v18 = vld [vmem:[%s3604_s25 + $0x2110] sm:$0xff] }
 0x1e3   : > { %1087 = vst [vmem:[%s3609_s26 + $0xe98] sm:$0xff] %v1086_v19  ;;  %v1214_v19 = vld [vmem:[%s3604_s25 + $0x2118] sm:$0xff] }
 0x1e4   : > { %1089 = vst [vmem:[%s3609_s26 + $0xea0] sm:$0xff] %v1088_v20  ;;  %v1216_v20 = vld [vmem:[%s3604_s25 + $0x2140] sm:$0xff] }
 0x1e5   : > { %1091 = vst [vmem:[%s3609_s26 + $0xea8] sm:$0xff] %v1090_v21  ;;  %v1218_v21 = vld [vmem:[%s3604_s25 + $0x2148] sm:$0xff] }
 0x1e6   : > { %1093 = vst [vmem:[%s3609_s26 + $0xeb0] sm:$0xff] %v1092_v22  ;;  %v1220_v22 = vld [vmem:[%s3604_s25 + $0x2150] sm:$0xff] }
 0x1e7   : > { %1095 = vst [vmem:[%s3609_s26 + $0xeb8] sm:$0xff] %v1094_v23  ;;  %v1222_v23 = vld [vmem:[%s3604_s25 + $0x2158] sm:$0xff] }
 0x1e8   : > { %1097 = vst [vmem:[%s3609_s26 + $0xec0] sm:$0xff] %v1096_v24  ;;  %v1224_v24 = vld [vmem:[%s3604_s25 + $0x2180] sm:$0xff] }
 0x1e9   : > { %1099 = vst [vmem:[%s3609_s26 + $0xec8] sm:$0xff] %v1098_v25  ;;  %v1226_v25 = vld [vmem:[%s3604_s25 + $0x2188] sm:$0xff] }
 0x1ea   : > { %1101 = vst [vmem:[%s3609_s26 + $0xed0] sm:$0xff] %v1100_v26  ;;  %v1228_v26 = vld [vmem:[%s3604_s25 + $0x2190] sm:$0xff] }
 0x1eb   : > { %1103 = vst [vmem:[%s3609_s26 + $0xed8] sm:$0xff] %v1102_v27  ;;  %v1230_v27 = vld [vmem:[%s3604_s25 + $0x2198] sm:$0xff] }
 0x1ec   : > { %1105 = vst [vmem:[%s3609_s26 + $0xee0] sm:$0xff] %v1104_v28  ;;  %v1232_v28 = vld [vmem:[%s3604_s25 + $0x21c0] sm:$0xff] }
 0x1ed   : > { %1107 = vst [vmem:[%s3609_s26 + $0xee8] sm:$0xff] %v1106_v29  ;;  %v1234_v29 = vld [vmem:[%s3604_s25 + $0x21c8] sm:$0xff] }
 0x1ee   : > { %1109 = vst [vmem:[%s3609_s26 + $0xef0] sm:$0xff] %v1108_v30  ;;  %v1236_v30 = vld [vmem:[%s3604_s25 + $0x21d0] sm:$0xff] }
 0x1ef   : > { %1111 = vst [vmem:[%s3609_s26 + $0xef8] sm:$0xff] %v1110_v31  ;;  %v1238_v31 = vld [vmem:[%s3604_s25 + $0x21d8] sm:$0xff] }
 0x1f0   : > { %1113 = vst [vmem:[%s3609_s26 + $0xf00] sm:$0xff] %v1112_v32  ;;  %v1240_v32 = vld [vmem:[%s3604_s25 + $0x2200] sm:$0xff] }
 0x1f1   : > { %1115 = vst [vmem:[%s3609_s26 + $0xf08] sm:$0xff] %v1114_v33  ;;  %v1242_v33 = vld [vmem:[%s3604_s25 + $0x2208] sm:$0xff] }
 0x1f2   : > { %1117 = vst [vmem:[%s3609_s26 + $0xf10] sm:$0xff] %v1116_v34  ;;  %v1244_v34 = vld [vmem:[%s3604_s25 + $0x2210] sm:$0xff] }
 0x1f3   : > { %1119 = vst [vmem:[%s3609_s26 + $0xf18] sm:$0xff] %v1118_v35  ;;  %v1246_v35 = vld [vmem:[%s3604_s25 + $0x2218] sm:$0xff] }
 0x1f4   : > { %1121 = vst [vmem:[%s3609_s26 + $0xf20] sm:$0xff] %v1120_v36  ;;  %v1248_v36 = vld [vmem:[%s3604_s25 + $0x2240] sm:$0xff] }
 0x1f5   : > { %1123 = vst [vmem:[%s3609_s26 + $0xf28] sm:$0xff] %v1122_v37  ;;  %v1250_v37 = vld [vmem:[%s3604_s25 + $0x2248] sm:$0xff] }
 0x1f6   : > { %1125 = vst [vmem:[%s3609_s26 + $0xf30] sm:$0xff] %v1124_v38  ;;  %v1252_v38 = vld [vmem:[%s3604_s25 + $0x2250] sm:$0xff] }
 0x1f7   : > { %1127 = vst [vmem:[%s3609_s26 + $0xf38] sm:$0xff] %v1126_v39  ;;  %v1254_v39 = vld [vmem:[%s3604_s25 + $0x2258] sm:$0xff] }
 0x1f8   : > { %1129 = vst [vmem:[%s3609_s26 + $0xf40] sm:$0xff] %v1128_v40  ;;  %v1256_v40 = vld [vmem:[%s3604_s25 + $0x2280] sm:$0xff] }
 0x1f9   : > { %1131 = vst [vmem:[%s3609_s26 + $0xf48] sm:$0xff] %v1130_v41  ;;  %v1258_v41 = vld [vmem:[%s3604_s25 + $0x2288] sm:$0xff] }
 0x1fa   : > { %1133 = vst [vmem:[%s3609_s26 + $0xf50] sm:$0xff] %v1132_v42  ;;  %v1260_v42 = vld [vmem:[%s3604_s25 + $0x2290] sm:$0xff] }
 0x1fb   : > { %1135 = vst [vmem:[%s3609_s26 + $0xf58] sm:$0xff] %v1134_v43  ;;  %v1262_v43 = vld [vmem:[%s3604_s25 + $0x2298] sm:$0xff] }
 0x1fc   : > { %1137 = vst [vmem:[%s3609_s26 + $0xf60] sm:$0xff] %v1136_v44  ;;  %v1264_v44 = vld [vmem:[%s3604_s25 + $0x22c0] sm:$0xff] }
 0x1fd   : > { %1139 = vst [vmem:[%s3609_s26 + $0xf68] sm:$0xff] %v1138_v45  ;;  %v1266_v45 = vld [vmem:[%s3604_s25 + $0x22c8] sm:$0xff] }
 0x1fe   : > { %1141 = vst [vmem:[%s3609_s26 + $0xf70] sm:$0xff] %v1140_v46  ;;  %v1268_v46 = vld [vmem:[%s3604_s25 + $0x22d0] sm:$0xff] }
 0x1ff   : > { %1143 = vst [vmem:[%s3609_s26 + $0xf78] sm:$0xff] %v1142_v47  ;;  %v1270_v47 = vld [vmem:[%s3604_s25 + $0x22d8] sm:$0xff] }
 0x200   : > { %1145 = vst [vmem:[%s3609_s26 + $0xf80] sm:$0xff] %v1144_v48  ;;  %v1272_v48 = vld [vmem:[%s3604_s25 + $0x2300] sm:$0xff] }
 0x201   : > { %1147 = vst [vmem:[%s3609_s26 + $0xf88] sm:$0xff] %v1146_v49  ;;  %v1274_v49 = vld [vmem:[%s3604_s25 + $0x2308] sm:$0xff] }
 0x202   : > { %1149 = vst [vmem:[%s3609_s26 + $0xf90] sm:$0xff] %v1148_v50  ;;  %v1276_v50 = vld [vmem:[%s3604_s25 + $0x2310] sm:$0xff] }
 0x203   : > { %1151 = vst [vmem:[%s3609_s26 + $0xf98] sm:$0xff] %v1150_v51  ;;  %v1278_v51 = vld [vmem:[%s3604_s25 + $0x2318] sm:$0xff] }
 0x204   : > { %1153 = vst [vmem:[%s3609_s26 + $0xfa0] sm:$0xff] %v1152_v52  ;;  %v1280_v52 = vld [vmem:[%s3604_s25 + $0x2340] sm:$0xff] }
 0x205   : > { %1155 = vst [vmem:[%s3609_s26 + $0xfa8] sm:$0xff] %v1154_v53  ;;  %v1282_v53 = vld [vmem:[%s3604_s25 + $0x2348] sm:$0xff] }
 0x206   : > { %1157 = vst [vmem:[%s3609_s26 + $0xfb0] sm:$0xff] %v1156_v54  ;;  %v1284_v54 = vld [vmem:[%s3604_s25 + $0x2350] sm:$0xff] }
 0x207   : > { %1159 = vst [vmem:[%s3609_s26 + $0xfb8] sm:$0xff] %v1158_v55  ;;  %v1286_v55 = vld [vmem:[%s3604_s25 + $0x2358] sm:$0xff] }
 0x208   : > { %1161 = vst [vmem:[%s3609_s26 + $0xfc0] sm:$0xff] %v1160_v56  ;;  %v1288_v56 = vld [vmem:[%s3604_s25 + $0x2380] sm:$0xff] }
 0x209   : > { %1163 = vst [vmem:[%s3609_s26 + $0xfc8] sm:$0xff] %v1162_v57  ;;  %v1290_v57 = vld [vmem:[%s3604_s25 + $0x2388] sm:$0xff] }
 0x20a   : > { %1165 = vst [vmem:[%s3609_s26 + $0xfd0] sm:$0xff] %v1164_v58  ;;  %v1292_v58 = vld [vmem:[%s3604_s25 + $0x2390] sm:$0xff] }
 0x20b   : > { %1167 = vst [vmem:[%s3609_s26 + $0xfd8] sm:$0xff] %v1166_v59  ;;  %v1294_v59 = vld [vmem:[%s3604_s25 + $0x2398] sm:$0xff] }
 0x20c   : > { %1169 = vst [vmem:[%s3609_s26 + $0xfe0] sm:$0xff] %v1168_v60  ;;  %v1296_v60 = vld [vmem:[%s3604_s25 + $0x23c0] sm:$0xff] }
 0x20d   : > { %1171 = vst [vmem:[%s3609_s26 + $0xfe8] sm:$0xff] %v1170_v61  ;;  %v1298_v61 = vld [vmem:[%s3604_s25 + $0x23c8] sm:$0xff] }
 0x20e   : > { %1173 = vst [vmem:[%s3609_s26 + $0xff0] sm:$0xff] %v1172_v62  ;;  %v1300_v62 = vld [vmem:[%s3604_s25 + $0x23d0] sm:$0xff] }
 0x20f   : > { %1175 = vst [vmem:[%s3609_s26 + $0xff8] sm:$0xff] %v1174_v63  ;;  %v1302_v63 = vld [vmem:[%s3604_s25 + $0x23d8] sm:$0xff] }
 0x210   : > { %1177 = vst [vmem:[%s3609_s26 + $0x1000] sm:$0xff] %v1176_v0  ;;  %v1304_v0 = vld [vmem:[%s3604_s25 + $0x2400] sm:$0xff] }
 0x211   : > { %1179 = vst [vmem:[%s3609_s26 + $0x1008] sm:$0xff] %v1178_v1  ;;  %v1306_v1 = vld [vmem:[%s3604_s25 + $0x2408] sm:$0xff] }
 0x212   : > { %1181 = vst [vmem:[%s3609_s26 + $0x1010] sm:$0xff] %v1180_v2  ;;  %v1308_v2 = vld [vmem:[%s3604_s25 + $0x2410] sm:$0xff] }
 0x213   : > { %1183 = vst [vmem:[%s3609_s26 + $0x1018] sm:$0xff] %v1182_v3  ;;  %v1310_v3 = vld [vmem:[%s3604_s25 + $0x2418] sm:$0xff] }
 0x214   : > { %1185 = vst [vmem:[%s3609_s26 + $0x1020] sm:$0xff] %v1184_v4  ;;  %v1312_v4 = vld [vmem:[%s3604_s25 + $0x2440] sm:$0xff] }
 0x215   : > { %1187 = vst [vmem:[%s3609_s26 + $0x1028] sm:$0xff] %v1186_v5  ;;  %v1314_v5 = vld [vmem:[%s3604_s25 + $0x2448] sm:$0xff] }
 0x216   : > { %1189 = vst [vmem:[%s3609_s26 + $0x1030] sm:$0xff] %v1188_v6  ;;  %v1316_v6 = vld [vmem:[%s3604_s25 + $0x2450] sm:$0xff] }
 0x217   : > { %1191 = vst [vmem:[%s3609_s26 + $0x1038] sm:$0xff] %v1190_v7  ;;  %v1318_v7 = vld [vmem:[%s3604_s25 + $0x2458] sm:$0xff] }
 0x218   : > { %1193 = vst [vmem:[%s3609_s26 + $0x1040] sm:$0xff] %v1192_v8  ;;  %v1320_v8 = vld [vmem:[%s3604_s25 + $0x2480] sm:$0xff] }
 0x219   : > { %1195 = vst [vmem:[%s3609_s26 + $0x1048] sm:$0xff] %v1194_v9  ;;  %v1322_v9 = vld [vmem:[%s3604_s25 + $0x2488] sm:$0xff] }
 0x21a   : > { %1197 = vst [vmem:[%s3609_s26 + $0x1050] sm:$0xff] %v1196_v10  ;;  %v1324_v10 = vld [vmem:[%s3604_s25 + $0x2490] sm:$0xff] }
 0x21b   : > { %1199 = vst [vmem:[%s3609_s26 + $0x1058] sm:$0xff] %v1198_v11  ;;  %v1326_v11 = vld [vmem:[%s3604_s25 + $0x2498] sm:$0xff] }
 0x21c   : > { %1201 = vst [vmem:[%s3609_s26 + $0x1060] sm:$0xff] %v1200_v12  ;;  %v1328_v12 = vld [vmem:[%s3604_s25 + $0x24c0] sm:$0xff] }
 0x21d   : > { %1203 = vst [vmem:[%s3609_s26 + $0x1068] sm:$0xff] %v1202_v13  ;;  %v1330_v13 = vld [vmem:[%s3604_s25 + $0x24c8] sm:$0xff] }
 0x21e   : > { %1205 = vst [vmem:[%s3609_s26 + $0x1070] sm:$0xff] %v1204_v14  ;;  %v1332_v14 = vld [vmem:[%s3604_s25 + $0x24d0] sm:$0xff] }
 0x21f   : > { %1207 = vst [vmem:[%s3609_s26 + $0x1078] sm:$0xff] %v1206_v15  ;;  %v1334_v15 = vld [vmem:[%s3604_s25 + $0x24d8] sm:$0xff] }
 0x220   : > { %1209 = vst [vmem:[%s3609_s26 + $0x1080] sm:$0xff] %v1208_v16  ;;  %v1336_v16 = vld [vmem:[%s3604_s25 + $0x2500] sm:$0xff] }
 0x221   : > { %1211 = vst [vmem:[%s3609_s26 + $0x1088] sm:$0xff] %v1210_v17  ;;  %v1338_v17 = vld [vmem:[%s3604_s25 + $0x2508] sm:$0xff] }
 0x222   : > { %1213 = vst [vmem:[%s3609_s26 + $0x1090] sm:$0xff] %v1212_v18  ;;  %v1340_v18 = vld [vmem:[%s3604_s25 + $0x2510] sm:$0xff] }
 0x223   : > { %1215 = vst [vmem:[%s3609_s26 + $0x1098] sm:$0xff] %v1214_v19  ;;  %v1342_v19 = vld [vmem:[%s3604_s25 + $0x2518] sm:$0xff] }
 0x224   : > { %1217 = vst [vmem:[%s3609_s26 + $0x10a0] sm:$0xff] %v1216_v20  ;;  %v1344_v20 = vld [vmem:[%s3604_s25 + $0x2540] sm:$0xff] }
 0x225   : > { %1219 = vst [vmem:[%s3609_s26 + $0x10a8] sm:$0xff] %v1218_v21  ;;  %v1346_v21 = vld [vmem:[%s3604_s25 + $0x2548] sm:$0xff] }
 0x226   : > { %1221 = vst [vmem:[%s3609_s26 + $0x10b0] sm:$0xff] %v1220_v22  ;;  %v1348_v22 = vld [vmem:[%s3604_s25 + $0x2550] sm:$0xff] }
 0x227   : > { %1223 = vst [vmem:[%s3609_s26 + $0x10b8] sm:$0xff] %v1222_v23  ;;  %v1350_v23 = vld [vmem:[%s3604_s25 + $0x2558] sm:$0xff] }
 0x228   : > { %1225 = vst [vmem:[%s3609_s26 + $0x10c0] sm:$0xff] %v1224_v24  ;;  %v1352_v24 = vld [vmem:[%s3604_s25 + $0x2580] sm:$0xff] }
 0x229   : > { %1227 = vst [vmem:[%s3609_s26 + $0x10c8] sm:$0xff] %v1226_v25  ;;  %v1354_v25 = vld [vmem:[%s3604_s25 + $0x2588] sm:$0xff] }
 0x22a   : > { %1229 = vst [vmem:[%s3609_s26 + $0x10d0] sm:$0xff] %v1228_v26  ;;  %v1356_v26 = vld [vmem:[%s3604_s25 + $0x2590] sm:$0xff] }
 0x22b   : > { %1231 = vst [vmem:[%s3609_s26 + $0x10d8] sm:$0xff] %v1230_v27  ;;  %v1358_v27 = vld [vmem:[%s3604_s25 + $0x2598] sm:$0xff] }
 0x22c   : > { %1233 = vst [vmem:[%s3609_s26 + $0x10e0] sm:$0xff] %v1232_v28  ;;  %v1360_v28 = vld [vmem:[%s3604_s25 + $0x25c0] sm:$0xff] }
 0x22d   : > { %1235 = vst [vmem:[%s3609_s26 + $0x10e8] sm:$0xff] %v1234_v29  ;;  %v1362_v29 = vld [vmem:[%s3604_s25 + $0x25c8] sm:$0xff] }
 0x22e   : > { %1237 = vst [vmem:[%s3609_s26 + $0x10f0] sm:$0xff] %v1236_v30  ;;  %v1364_v30 = vld [vmem:[%s3604_s25 + $0x25d0] sm:$0xff] }
 0x22f   : > { %1239 = vst [vmem:[%s3609_s26 + $0x10f8] sm:$0xff] %v1238_v31  ;;  %v1366_v31 = vld [vmem:[%s3604_s25 + $0x25d8] sm:$0xff] }
 0x230   : > { %1241 = vst [vmem:[%s3609_s26 + $0x1100] sm:$0xff] %v1240_v32  ;;  %v1368_v32 = vld [vmem:[%s3604_s25 + $0x2600] sm:$0xff] }
 0x231   : > { %1243 = vst [vmem:[%s3609_s26 + $0x1108] sm:$0xff] %v1242_v33  ;;  %v1370_v33 = vld [vmem:[%s3604_s25 + $0x2608] sm:$0xff] }
 0x232   : > { %1245 = vst [vmem:[%s3609_s26 + $0x1110] sm:$0xff] %v1244_v34  ;;  %v1372_v34 = vld [vmem:[%s3604_s25 + $0x2610] sm:$0xff] }
 0x233   : > { %1247 = vst [vmem:[%s3609_s26 + $0x1118] sm:$0xff] %v1246_v35  ;;  %v1374_v35 = vld [vmem:[%s3604_s25 + $0x2618] sm:$0xff] }
 0x234   : > { %1249 = vst [vmem:[%s3609_s26 + $0x1120] sm:$0xff] %v1248_v36  ;;  %v1376_v36 = vld [vmem:[%s3604_s25 + $0x2640] sm:$0xff] }
 0x235   : > { %1251 = vst [vmem:[%s3609_s26 + $0x1128] sm:$0xff] %v1250_v37  ;;  %v1378_v37 = vld [vmem:[%s3604_s25 + $0x2648] sm:$0xff] }
 0x236   : > { %1253 = vst [vmem:[%s3609_s26 + $0x1130] sm:$0xff] %v1252_v38  ;;  %v1380_v38 = vld [vmem:[%s3604_s25 + $0x2650] sm:$0xff] }
 0x237   : > { %1255 = vst [vmem:[%s3609_s26 + $0x1138] sm:$0xff] %v1254_v39  ;;  %v1382_v39 = vld [vmem:[%s3604_s25 + $0x2658] sm:$0xff] }
 0x238   : > { %1257 = vst [vmem:[%s3609_s26 + $0x1140] sm:$0xff] %v1256_v40  ;;  %v1384_v40 = vld [vmem:[%s3604_s25 + $0x2680] sm:$0xff] }
 0x239   : > { %1259 = vst [vmem:[%s3609_s26 + $0x1148] sm:$0xff] %v1258_v41  ;;  %v1386_v41 = vld [vmem:[%s3604_s25 + $0x2688] sm:$0xff] }
 0x23a   : > { %1261 = vst [vmem:[%s3609_s26 + $0x1150] sm:$0xff] %v1260_v42  ;;  %v1388_v42 = vld [vmem:[%s3604_s25 + $0x2690] sm:$0xff] }
 0x23b   : > { %1263 = vst [vmem:[%s3609_s26 + $0x1158] sm:$0xff] %v1262_v43  ;;  %v1390_v43 = vld [vmem:[%s3604_s25 + $0x2698] sm:$0xff] }
 0x23c   : > { %1265 = vst [vmem:[%s3609_s26 + $0x1160] sm:$0xff] %v1264_v44  ;;  %v1392_v44 = vld [vmem:[%s3604_s25 + $0x26c0] sm:$0xff] }
 0x23d   : > { %1267 = vst [vmem:[%s3609_s26 + $0x1168] sm:$0xff] %v1266_v45  ;;  %v1394_v45 = vld [vmem:[%s3604_s25 + $0x26c8] sm:$0xff] }
 0x23e   : > { %1269 = vst [vmem:[%s3609_s26 + $0x1170] sm:$0xff] %v1268_v46  ;;  %v1396_v46 = vld [vmem:[%s3604_s25 + $0x26d0] sm:$0xff] }
 0x23f   : > { %1271 = vst [vmem:[%s3609_s26 + $0x1178] sm:$0xff] %v1270_v47  ;;  %v1398_v47 = vld [vmem:[%s3604_s25 + $0x26d8] sm:$0xff] }
 0x240   : > { %1273 = vst [vmem:[%s3609_s26 + $0x1180] sm:$0xff] %v1272_v48  ;;  %v1400_v48 = vld [vmem:[%s3604_s25 + $0x2700] sm:$0xff] }
 0x241   : > { %1275 = vst [vmem:[%s3609_s26 + $0x1188] sm:$0xff] %v1274_v49  ;;  %v1402_v49 = vld [vmem:[%s3604_s25 + $0x2708] sm:$0xff] }
 0x242   : > { %1277 = vst [vmem:[%s3609_s26 + $0x1190] sm:$0xff] %v1276_v50  ;;  %v1404_v50 = vld [vmem:[%s3604_s25 + $0x2710] sm:$0xff] }
 0x243   : > { %1279 = vst [vmem:[%s3609_s26 + $0x1198] sm:$0xff] %v1278_v51  ;;  %v1406_v51 = vld [vmem:[%s3604_s25 + $0x2718] sm:$0xff] }
 0x244   : > { %1281 = vst [vmem:[%s3609_s26 + $0x11a0] sm:$0xff] %v1280_v52  ;;  %v1408_v52 = vld [vmem:[%s3604_s25 + $0x2740] sm:$0xff] }
 0x245   : > { %1283 = vst [vmem:[%s3609_s26 + $0x11a8] sm:$0xff] %v1282_v53  ;;  %v1410_v53 = vld [vmem:[%s3604_s25 + $0x2748] sm:$0xff] }
 0x246   : > { %1285 = vst [vmem:[%s3609_s26 + $0x11b0] sm:$0xff] %v1284_v54  ;;  %v1412_v54 = vld [vmem:[%s3604_s25 + $0x2750] sm:$0xff] }
 0x247   : > { %1287 = vst [vmem:[%s3609_s26 + $0x11b8] sm:$0xff] %v1286_v55  ;;  %v1414_v55 = vld [vmem:[%s3604_s25 + $0x2758] sm:$0xff] }
 0x248   : > { %1289 = vst [vmem:[%s3609_s26 + $0x11c0] sm:$0xff] %v1288_v56  ;;  %v1416_v56 = vld [vmem:[%s3604_s25 + $0x2780] sm:$0xff] }
 0x249   : > { %1291 = vst [vmem:[%s3609_s26 + $0x11c8] sm:$0xff] %v1290_v57  ;;  %v1418_v57 = vld [vmem:[%s3604_s25 + $0x2788] sm:$0xff] }
 0x24a   : > { %1293 = vst [vmem:[%s3609_s26 + $0x11d0] sm:$0xff] %v1292_v58  ;;  %v1420_v58 = vld [vmem:[%s3604_s25 + $0x2790] sm:$0xff] }
 0x24b   : > { %1295 = vst [vmem:[%s3609_s26 + $0x11d8] sm:$0xff] %v1294_v59  ;;  %v1422_v59 = vld [vmem:[%s3604_s25 + $0x2798] sm:$0xff] }
 0x24c   : > { %1297 = vst [vmem:[%s3609_s26 + $0x11e0] sm:$0xff] %v1296_v60  ;;  %v1424_v60 = vld [vmem:[%s3604_s25 + $0x27c0] sm:$0xff] }
 0x24d   : > { %1299 = vst [vmem:[%s3609_s26 + $0x11e8] sm:$0xff] %v1298_v61  ;;  %v1426_v61 = vld [vmem:[%s3604_s25 + $0x27c8] sm:$0xff] }
 0x24e   : > { %1301 = vst [vmem:[%s3609_s26 + $0x11f0] sm:$0xff] %v1300_v62  ;;  %v1428_v62 = vld [vmem:[%s3604_s25 + $0x27d0] sm:$0xff] }
 0x24f   : > { %1303 = vst [vmem:[%s3609_s26 + $0x11f8] sm:$0xff] %v1302_v63  ;;  %v1430_v63 = vld [vmem:[%s3604_s25 + $0x27d8] sm:$0xff] }
 0x250   : > { %1305 = vst [vmem:[%s3609_s26 + $0x1200] sm:$0xff] %v1304_v0  ;;  %v1432_v0 = vld [vmem:[%s3604_s25 + $0x2800] sm:$0xff] }
 0x251   : > { %1307 = vst [vmem:[%s3609_s26 + $0x1208] sm:$0xff] %v1306_v1  ;;  %v1434_v1 = vld [vmem:[%s3604_s25 + $0x2808] sm:$0xff] }
 0x252   : > { %1309 = vst [vmem:[%s3609_s26 + $0x1210] sm:$0xff] %v1308_v2  ;;  %v1436_v2 = vld [vmem:[%s3604_s25 + $0x2810] sm:$0xff] }
 0x253   : > { %1311 = vst [vmem:[%s3609_s26 + $0x1218] sm:$0xff] %v1310_v3  ;;  %v1438_v3 = vld [vmem:[%s3604_s25 + $0x2818] sm:$0xff] }
 0x254   : > { %1313 = vst [vmem:[%s3609_s26 + $0x1220] sm:$0xff] %v1312_v4  ;;  %v1440_v4 = vld [vmem:[%s3604_s25 + $0x2840] sm:$0xff] }
 0x255   : > { %1315 = vst [vmem:[%s3609_s26 + $0x1228] sm:$0xff] %v1314_v5  ;;  %v1442_v5 = vld [vmem:[%s3604_s25 + $0x2848] sm:$0xff] }
 0x256   : > { %1317 = vst [vmem:[%s3609_s26 + $0x1230] sm:$0xff] %v1316_v6  ;;  %v1444_v6 = vld [vmem:[%s3604_s25 + $0x2850] sm:$0xff] }
 0x257   : > { %1319 = vst [vmem:[%s3609_s26 + $0x1238] sm:$0xff] %v1318_v7  ;;  %v1446_v7 = vld [vmem:[%s3604_s25 + $0x2858] sm:$0xff] }
 0x258   : > { %1321 = vst [vmem:[%s3609_s26 + $0x1240] sm:$0xff] %v1320_v8  ;;  %v1448_v8 = vld [vmem:[%s3604_s25 + $0x2880] sm:$0xff] }
 0x259   : > { %1323 = vst [vmem:[%s3609_s26 + $0x1248] sm:$0xff] %v1322_v9  ;;  %v1450_v9 = vld [vmem:[%s3604_s25 + $0x2888] sm:$0xff] }
 0x25a   : > { %1325 = vst [vmem:[%s3609_s26 + $0x1250] sm:$0xff] %v1324_v10  ;;  %v1452_v10 = vld [vmem:[%s3604_s25 + $0x2890] sm:$0xff] }
 0x25b   : > { %1327 = vst [vmem:[%s3609_s26 + $0x1258] sm:$0xff] %v1326_v11  ;;  %v1454_v11 = vld [vmem:[%s3604_s25 + $0x2898] sm:$0xff] }
 0x25c   : > { %1329 = vst [vmem:[%s3609_s26 + $0x1260] sm:$0xff] %v1328_v12  ;;  %v1456_v12 = vld [vmem:[%s3604_s25 + $0x28c0] sm:$0xff] }
 0x25d   : > { %1331 = vst [vmem:[%s3609_s26 + $0x1268] sm:$0xff] %v1330_v13  ;;  %v1458_v13 = vld [vmem:[%s3604_s25 + $0x28c8] sm:$0xff] }
 0x25e   : > { %1333 = vst [vmem:[%s3609_s26 + $0x1270] sm:$0xff] %v1332_v14  ;;  %v1460_v14 = vld [vmem:[%s3604_s25 + $0x28d0] sm:$0xff] }
 0x25f   : > { %1335 = vst [vmem:[%s3609_s26 + $0x1278] sm:$0xff] %v1334_v15  ;;  %v1462_v15 = vld [vmem:[%s3604_s25 + $0x28d8] sm:$0xff] }
 0x260   : > { %1337 = vst [vmem:[%s3609_s26 + $0x1280] sm:$0xff] %v1336_v16  ;;  %v1464_v16 = vld [vmem:[%s3604_s25 + $0x2900] sm:$0xff] }
 0x261   : > { %1339 = vst [vmem:[%s3609_s26 + $0x1288] sm:$0xff] %v1338_v17  ;;  %v1466_v17 = vld [vmem:[%s3604_s25 + $0x2908] sm:$0xff] }
 0x262   : > { %1341 = vst [vmem:[%s3609_s26 + $0x1290] sm:$0xff] %v1340_v18  ;;  %v1468_v18 = vld [vmem:[%s3604_s25 + $0x2910] sm:$0xff] }
 0x263   : > { %1343 = vst [vmem:[%s3609_s26 + $0x1298] sm:$0xff] %v1342_v19  ;;  %v1470_v19 = vld [vmem:[%s3604_s25 + $0x2918] sm:$0xff] }
 0x264   : > { %1345 = vst [vmem:[%s3609_s26 + $0x12a0] sm:$0xff] %v1344_v20  ;;  %v1472_v20 = vld [vmem:[%s3604_s25 + $0x2940] sm:$0xff] }
 0x265   : > { %1347 = vst [vmem:[%s3609_s26 + $0x12a8] sm:$0xff] %v1346_v21  ;;  %v1474_v21 = vld [vmem:[%s3604_s25 + $0x2948] sm:$0xff] }
 0x266   : > { %1349 = vst [vmem:[%s3609_s26 + $0x12b0] sm:$0xff] %v1348_v22  ;;  %v1476_v22 = vld [vmem:[%s3604_s25 + $0x2950] sm:$0xff] }
 0x267   : > { %1351 = vst [vmem:[%s3609_s26 + $0x12b8] sm:$0xff] %v1350_v23  ;;  %v1478_v23 = vld [vmem:[%s3604_s25 + $0x2958] sm:$0xff] }
 0x268   : > { %1353 = vst [vmem:[%s3609_s26 + $0x12c0] sm:$0xff] %v1352_v24  ;;  %v1480_v24 = vld [vmem:[%s3604_s25 + $0x2980] sm:$0xff] }
 0x269   : > { %1355 = vst [vmem:[%s3609_s26 + $0x12c8] sm:$0xff] %v1354_v25  ;;  %v1482_v25 = vld [vmem:[%s3604_s25 + $0x2988] sm:$0xff] }
 0x26a   : > { %1357 = vst [vmem:[%s3609_s26 + $0x12d0] sm:$0xff] %v1356_v26  ;;  %v1484_v26 = vld [vmem:[%s3604_s25 + $0x2990] sm:$0xff] }
 0x26b   : > { %1359 = vst [vmem:[%s3609_s26 + $0x12d8] sm:$0xff] %v1358_v27  ;;  %v1486_v27 = vld [vmem:[%s3604_s25 + $0x2998] sm:$0xff] }
 0x26c   : > { %1361 = vst [vmem:[%s3609_s26 + $0x12e0] sm:$0xff] %v1360_v28  ;;  %v1488_v28 = vld [vmem:[%s3604_s25 + $0x29c0] sm:$0xff] }
 0x26d   : > { %1363 = vst [vmem:[%s3609_s26 + $0x12e8] sm:$0xff] %v1362_v29  ;;  %v1490_v29 = vld [vmem:[%s3604_s25 + $0x29c8] sm:$0xff] }
 0x26e   : > { %1365 = vst [vmem:[%s3609_s26 + $0x12f0] sm:$0xff] %v1364_v30  ;;  %v1492_v30 = vld [vmem:[%s3604_s25 + $0x29d0] sm:$0xff] }
 0x26f   : > { %1367 = vst [vmem:[%s3609_s26 + $0x12f8] sm:$0xff] %v1366_v31  ;;  %v1494_v31 = vld [vmem:[%s3604_s25 + $0x29d8] sm:$0xff] }
 0x270   : > { %1369 = vst [vmem:[%s3609_s26 + $0x1300] sm:$0xff] %v1368_v32  ;;  %v1496_v32 = vld [vmem:[%s3604_s25 + $0x2a00] sm:$0xff] }
 0x271   : > { %1371 = vst [vmem:[%s3609_s26 + $0x1308] sm:$0xff] %v1370_v33  ;;  %v1498_v33 = vld [vmem:[%s3604_s25 + $0x2a08] sm:$0xff] }
 0x272   : > { %1373 = vst [vmem:[%s3609_s26 + $0x1310] sm:$0xff] %v1372_v34  ;;  %v1500_v34 = vld [vmem:[%s3604_s25 + $0x2a10] sm:$0xff] }
 0x273   : > { %1375 = vst [vmem:[%s3609_s26 + $0x1318] sm:$0xff] %v1374_v35  ;;  %v1502_v35 = vld [vmem:[%s3604_s25 + $0x2a18] sm:$0xff] }
 0x274   : > { %1377 = vst [vmem:[%s3609_s26 + $0x1320] sm:$0xff] %v1376_v36  ;;  %v1504_v36 = vld [vmem:[%s3604_s25 + $0x2a40] sm:$0xff] }
 0x275   : > { %1379 = vst [vmem:[%s3609_s26 + $0x1328] sm:$0xff] %v1378_v37  ;;  %v1506_v37 = vld [vmem:[%s3604_s25 + $0x2a48] sm:$0xff] }
 0x276   : > { %1381 = vst [vmem:[%s3609_s26 + $0x1330] sm:$0xff] %v1380_v38  ;;  %v1508_v38 = vld [vmem:[%s3604_s25 + $0x2a50] sm:$0xff] }
 0x277   : > { %1383 = vst [vmem:[%s3609_s26 + $0x1338] sm:$0xff] %v1382_v39  ;;  %v1510_v39 = vld [vmem:[%s3604_s25 + $0x2a58] sm:$0xff] }
 0x278   : > { %1385 = vst [vmem:[%s3609_s26 + $0x1340] sm:$0xff] %v1384_v40  ;;  %v1512_v40 = vld [vmem:[%s3604_s25 + $0x2a80] sm:$0xff] }
 0x279   : > { %1387 = vst [vmem:[%s3609_s26 + $0x1348] sm:$0xff] %v1386_v41  ;;  %v1514_v41 = vld [vmem:[%s3604_s25 + $0x2a88] sm:$0xff] }
 0x27a   : > { %1389 = vst [vmem:[%s3609_s26 + $0x1350] sm:$0xff] %v1388_v42  ;;  %v1516_v42 = vld [vmem:[%s3604_s25 + $0x2a90] sm:$0xff] }
 0x27b   : > { %1391 = vst [vmem:[%s3609_s26 + $0x1358] sm:$0xff] %v1390_v43  ;;  %v1518_v43 = vld [vmem:[%s3604_s25 + $0x2a98] sm:$0xff] }
 0x27c   : > { %1393 = vst [vmem:[%s3609_s26 + $0x1360] sm:$0xff] %v1392_v44  ;;  %v1520_v44 = vld [vmem:[%s3604_s25 + $0x2ac0] sm:$0xff] }
 0x27d   : > { %1395 = vst [vmem:[%s3609_s26 + $0x1368] sm:$0xff] %v1394_v45  ;;  %v1522_v45 = vld [vmem:[%s3604_s25 + $0x2ac8] sm:$0xff] }
 0x27e   : > { %1397 = vst [vmem:[%s3609_s26 + $0x1370] sm:$0xff] %v1396_v46  ;;  %v1524_v46 = vld [vmem:[%s3604_s25 + $0x2ad0] sm:$0xff] }
 0x27f   : > { %1399 = vst [vmem:[%s3609_s26 + $0x1378] sm:$0xff] %v1398_v47  ;;  %v1526_v47 = vld [vmem:[%s3604_s25 + $0x2ad8] sm:$0xff] }
 0x280   : > { %1401 = vst [vmem:[%s3609_s26 + $0x1380] sm:$0xff] %v1400_v48  ;;  %v1528_v48 = vld [vmem:[%s3604_s25 + $0x2b00] sm:$0xff] }
 0x281   : > { %1403 = vst [vmem:[%s3609_s26 + $0x1388] sm:$0xff] %v1402_v49  ;;  %v1530_v49 = vld [vmem:[%s3604_s25 + $0x2b08] sm:$0xff] }
 0x282   : > { %1405 = vst [vmem:[%s3609_s26 + $0x1390] sm:$0xff] %v1404_v50  ;;  %v1532_v50 = vld [vmem:[%s3604_s25 + $0x2b10] sm:$0xff] }
 0x283   : > { %1407 = vst [vmem:[%s3609_s26 + $0x1398] sm:$0xff] %v1406_v51  ;;  %v1534_v51 = vld [vmem:[%s3604_s25 + $0x2b18] sm:$0xff] }
 0x284   : > { %1409 = vst [vmem:[%s3609_s26 + $0x13a0] sm:$0xff] %v1408_v52  ;;  %v1536_v52 = vld [vmem:[%s3604_s25 + $0x2b40] sm:$0xff] }
 0x285   : > { %1411 = vst [vmem:[%s3609_s26 + $0x13a8] sm:$0xff] %v1410_v53  ;;  %v1538_v53 = vld [vmem:[%s3604_s25 + $0x2b48] sm:$0xff] }
 0x286   : > { %1413 = vst [vmem:[%s3609_s26 + $0x13b0] sm:$0xff] %v1412_v54  ;;  %v1540_v54 = vld [vmem:[%s3604_s25 + $0x2b50] sm:$0xff] }
 0x287   : > { %1415 = vst [vmem:[%s3609_s26 + $0x13b8] sm:$0xff] %v1414_v55  ;;  %v1542_v55 = vld [vmem:[%s3604_s25 + $0x2b58] sm:$0xff] }
 0x288   : > { %1417 = vst [vmem:[%s3609_s26 + $0x13c0] sm:$0xff] %v1416_v56  ;;  %v1544_v56 = vld [vmem:[%s3604_s25 + $0x2b80] sm:$0xff] }
 0x289   : > { %1419 = vst [vmem:[%s3609_s26 + $0x13c8] sm:$0xff] %v1418_v57  ;;  %v1546_v57 = vld [vmem:[%s3604_s25 + $0x2b88] sm:$0xff] }
 0x28a   : > { %1421 = vst [vmem:[%s3609_s26 + $0x13d0] sm:$0xff] %v1420_v58  ;;  %v1548_v58 = vld [vmem:[%s3604_s25 + $0x2b90] sm:$0xff] }
 0x28b   : > { %1423 = vst [vmem:[%s3609_s26 + $0x13d8] sm:$0xff] %v1422_v59  ;;  %v1550_v59 = vld [vmem:[%s3604_s25 + $0x2b98] sm:$0xff] }
 0x28c   : > { %1425 = vst [vmem:[%s3609_s26 + $0x13e0] sm:$0xff] %v1424_v60  ;;  %v1552_v60 = vld [vmem:[%s3604_s25 + $0x2bc0] sm:$0xff] }
 0x28d   : > { %1427 = vst [vmem:[%s3609_s26 + $0x13e8] sm:$0xff] %v1426_v61  ;;  %v1554_v61 = vld [vmem:[%s3604_s25 + $0x2bc8] sm:$0xff] }
 0x28e   : > { %1429 = vst [vmem:[%s3609_s26 + $0x13f0] sm:$0xff] %v1428_v62  ;;  %v1556_v62 = vld [vmem:[%s3604_s25 + $0x2bd0] sm:$0xff] }
 0x28f   : > { %1431 = vst [vmem:[%s3609_s26 + $0x13f8] sm:$0xff] %v1430_v63  ;;  %v1558_v63 = vld [vmem:[%s3604_s25 + $0x2bd8] sm:$0xff] }
 0x290   : > { %1433 = vst [vmem:[%s3609_s26 + $0x1400] sm:$0xff] %v1432_v0  ;;  %v1560_v0 = vld [vmem:[%s3604_s25 + $0x2c00] sm:$0xff] }
 0x291   : > { %1435 = vst [vmem:[%s3609_s26 + $0x1408] sm:$0xff] %v1434_v1  ;;  %v1562_v1 = vld [vmem:[%s3604_s25 + $0x2c08] sm:$0xff] }
 0x292   : > { %1437 = vst [vmem:[%s3609_s26 + $0x1410] sm:$0xff] %v1436_v2  ;;  %v1564_v2 = vld [vmem:[%s3604_s25 + $0x2c10] sm:$0xff] }
 0x293   : > { %1439 = vst [vmem:[%s3609_s26 + $0x1418] sm:$0xff] %v1438_v3  ;;  %v1566_v3 = vld [vmem:[%s3604_s25 + $0x2c18] sm:$0xff] }
 0x294   : > { %1441 = vst [vmem:[%s3609_s26 + $0x1420] sm:$0xff] %v1440_v4  ;;  %v1568_v4 = vld [vmem:[%s3604_s25 + $0x2c40] sm:$0xff] }
 0x295   : > { %1443 = vst [vmem:[%s3609_s26 + $0x1428] sm:$0xff] %v1442_v5  ;;  %v1570_v5 = vld [vmem:[%s3604_s25 + $0x2c48] sm:$0xff] }
 0x296   : > { %1445 = vst [vmem:[%s3609_s26 + $0x1430] sm:$0xff] %v1444_v6  ;;  %v1572_v6 = vld [vmem:[%s3604_s25 + $0x2c50] sm:$0xff] }
 0x297   : > { %1447 = vst [vmem:[%s3609_s26 + $0x1438] sm:$0xff] %v1446_v7  ;;  %v1574_v7 = vld [vmem:[%s3604_s25 + $0x2c58] sm:$0xff] }
 0x298   : > { %1449 = vst [vmem:[%s3609_s26 + $0x1440] sm:$0xff] %v1448_v8  ;;  %v1576_v8 = vld [vmem:[%s3604_s25 + $0x2c80] sm:$0xff] }
 0x299   : > { %1451 = vst [vmem:[%s3609_s26 + $0x1448] sm:$0xff] %v1450_v9  ;;  %v1578_v9 = vld [vmem:[%s3604_s25 + $0x2c88] sm:$0xff] }
 0x29a   : > { %1453 = vst [vmem:[%s3609_s26 + $0x1450] sm:$0xff] %v1452_v10  ;;  %v1580_v10 = vld [vmem:[%s3604_s25 + $0x2c90] sm:$0xff] }
 0x29b   : > { %1455 = vst [vmem:[%s3609_s26 + $0x1458] sm:$0xff] %v1454_v11  ;;  %v1582_v11 = vld [vmem:[%s3604_s25 + $0x2c98] sm:$0xff] }
 0x29c   : > { %1457 = vst [vmem:[%s3609_s26 + $0x1460] sm:$0xff] %v1456_v12  ;;  %v1584_v12 = vld [vmem:[%s3604_s25 + $0x2cc0] sm:$0xff] }
 0x29d   : > { %1459 = vst [vmem:[%s3609_s26 + $0x1468] sm:$0xff] %v1458_v13  ;;  %v1586_v13 = vld [vmem:[%s3604_s25 + $0x2cc8] sm:$0xff] }
 0x29e   : > { %1461 = vst [vmem:[%s3609_s26 + $0x1470] sm:$0xff] %v1460_v14  ;;  %v1588_v14 = vld [vmem:[%s3604_s25 + $0x2cd0] sm:$0xff] }
 0x29f   : > { %1463 = vst [vmem:[%s3609_s26 + $0x1478] sm:$0xff] %v1462_v15  ;;  %v1590_v15 = vld [vmem:[%s3604_s25 + $0x2cd8] sm:$0xff] }
 0x2a0   : > { %1465 = vst [vmem:[%s3609_s26 + $0x1480] sm:$0xff] %v1464_v16 }
 0x2a1   : > { %1467 = vst [vmem:[%s3609_s26 + $0x1488] sm:$0xff] %v1466_v17 }
 0x2a2   : > { %1469 = vst [vmem:[%s3609_s26 + $0x1490] sm:$0xff] %v1468_v18 }
 0x2a3   : > { %1471 = vst [vmem:[%s3609_s26 + $0x1498] sm:$0xff] %v1470_v19 }
 0x2a4   : > { %1473 = vst [vmem:[%s3609_s26 + $0x14a0] sm:$0xff] %v1472_v20 }
 0x2a5   : > { %1475 = vst [vmem:[%s3609_s26 + $0x14a8] sm:$0xff] %v1474_v21 }
 0x2a6   : > { %1477 = vst [vmem:[%s3609_s26 + $0x14b0] sm:$0xff] %v1476_v22 }
 0x2a7   : > { %1479 = vst [vmem:[%s3609_s26 + $0x14b8] sm:$0xff] %v1478_v23 }
 0x2a8   : > { %1481 = vst [vmem:[%s3609_s26 + $0x14c0] sm:$0xff] %v1480_v24 }
 0x2a9   : > { %1483 = vst [vmem:[%s3609_s26 + $0x14c8] sm:$0xff] %v1482_v25 }
 0x2aa   : > { %1485 = vst [vmem:[%s3609_s26 + $0x14d0] sm:$0xff] %v1484_v26 }
 0x2ab   : > { %1487 = vst [vmem:[%s3609_s26 + $0x14d8] sm:$0xff] %v1486_v27 }
 0x2ac   : > { %1489 = vst [vmem:[%s3609_s26 + $0x14e0] sm:$0xff] %v1488_v28 }
 0x2ad   : > { %1491 = vst [vmem:[%s3609_s26 + $0x14e8] sm:$0xff] %v1490_v29 }
 0x2ae   : > { %1493 = vst [vmem:[%s3609_s26 + $0x14f0] sm:$0xff] %v1492_v30 }
 0x2af   : > { %1495 = vst [vmem:[%s3609_s26 + $0x14f8] sm:$0xff] %v1494_v31 }
 0x2b0   : > { %1497 = vst [vmem:[%s3609_s26 + $0x1500] sm:$0xff] %v1496_v32 }
 0x2b1   : > { %1499 = vst [vmem:[%s3609_s26 + $0x1508] sm:$0xff] %v1498_v33 }
 0x2b2   : > { %1501 = vst [vmem:[%s3609_s26 + $0x1510] sm:$0xff] %v1500_v34 }
 0x2b3   : > { %1503 = vst [vmem:[%s3609_s26 + $0x1518] sm:$0xff] %v1502_v35 }
 0x2b4   : > { %1505 = vst [vmem:[%s3609_s26 + $0x1520] sm:$0xff] %v1504_v36 }
 0x2b5   : > { %1507 = vst [vmem:[%s3609_s26 + $0x1528] sm:$0xff] %v1506_v37 }
 0x2b6   : > { %1509 = vst [vmem:[%s3609_s26 + $0x1530] sm:$0xff] %v1508_v38 }
 0x2b7   : > { %1511 = vst [vmem:[%s3609_s26 + $0x1538] sm:$0xff] %v1510_v39 }
 0x2b8   : > { %1513 = vst [vmem:[%s3609_s26 + $0x1540] sm:$0xff] %v1512_v40 }
 0x2b9   : > { %1515 = vst [vmem:[%s3609_s26 + $0x1548] sm:$0xff] %v1514_v41 }
 0x2ba   : > { %1517 = vst [vmem:[%s3609_s26 + $0x1550] sm:$0xff] %v1516_v42 }
 0x2bb   : > { %1519 = vst [vmem:[%s3609_s26 + $0x1558] sm:$0xff] %v1518_v43 }
 0x2bc   : > { %1521 = vst [vmem:[%s3609_s26 + $0x1560] sm:$0xff] %v1520_v44 }
 0x2bd   : > { %1523 = vst [vmem:[%s3609_s26 + $0x1568] sm:$0xff] %v1522_v45 }
 0x2be   : > { %1525 = vst [vmem:[%s3609_s26 + $0x1570] sm:$0xff] %v1524_v46 }
 0x2bf   : > { %1527 = vst [vmem:[%s3609_s26 + $0x1578] sm:$0xff] %v1526_v47 }
 0x2c0   : > { %1529 = vst [vmem:[%s3609_s26 + $0x1580] sm:$0xff] %v1528_v48 }
 0x2c1   : > { %1531 = vst [vmem:[%s3609_s26 + $0x1588] sm:$0xff] %v1530_v49 }
 0x2c2   : > { %1533 = vst [vmem:[%s3609_s26 + $0x1590] sm:$0xff] %v1532_v50 }
 0x2c3   : > { %1535 = vst [vmem:[%s3609_s26 + $0x1598] sm:$0xff] %v1534_v51 }
 0x2c4   : > { %1537 = vst [vmem:[%s3609_s26 + $0x15a0] sm:$0xff] %v1536_v52 }
 0x2c5   : > { %1539 = vst [vmem:[%s3609_s26 + $0x15a8] sm:$0xff] %v1538_v53 }
 0x2c6   : > { %1541 = vst [vmem:[%s3609_s26 + $0x15b0] sm:$0xff] %v1540_v54 }
 0x2c7   : > { %1543 = vst [vmem:[%s3609_s26 + $0x15b8] sm:$0xff] %v1542_v55 }
 0x2c8   : > { %1545 = vst [vmem:[%s3609_s26 + $0x15c0] sm:$0xff] %v1544_v56 }
 0x2c9   : > { %1547 = vst [vmem:[%s3609_s26 + $0x15c8] sm:$0xff] %v1546_v57 }
 0x2ca   : > { %1549 = vst [vmem:[%s3609_s26 + $0x15d0] sm:$0xff] %v1548_v58 }
 0x2cb   : > { %1551 = vst [vmem:[%s3609_s26 + $0x15d8] sm:$0xff] %v1550_v59 }
 0x2cc   : > { %1553 = vst [vmem:[%s3609_s26 + $0x15e0] sm:$0xff] %v1552_v60 }
 0x2cd   : > { %1555 = vst [vmem:[%s3609_s26 + $0x15e8] sm:$0xff] %v1554_v61 }
 0x2ce   : > { %1557 = vst [vmem:[%s3609_s26 + $0x15f0] sm:$0xff] %v1556_v62 }
 0x2cf   : > { %1559 = vst [vmem:[%s3609_s26 + $0x15f8] sm:$0xff] %v1558_v63 }
 0x2d0   : > { %1561 = vst [vmem:[%s3609_s26 + $0x1600] sm:$0xff] %v1560_v0 }
 0x2d1   : > { %1563 = vst [vmem:[%s3609_s26 + $0x1608] sm:$0xff] %v1562_v1 }
 0x2d2   : > { %1565 = vst [vmem:[%s3609_s26 + $0x1610] sm:$0xff] %v1564_v2 }
 0x2d3   : > { %1567 = vst [vmem:[%s3609_s26 + $0x1618] sm:$0xff] %v1566_v3 }
 0x2d4   : > { %1569 = vst [vmem:[%s3609_s26 + $0x1620] sm:$0xff] %v1568_v4 }
 0x2d5   : > { %1571 = vst [vmem:[%s3609_s26 + $0x1628] sm:$0xff] %v1570_v5 }
 0x2d6   : > { %1573 = vst [vmem:[%s3609_s26 + $0x1630] sm:$0xff] %v1572_v6 }
 0x2d7   : > { %1575 = vst [vmem:[%s3609_s26 + $0x1638] sm:$0xff] %v1574_v7 }
 0x2d8   : > { %1577 = vst [vmem:[%s3609_s26 + $0x1640] sm:$0xff] %v1576_v8 }
 0x2d9   : > { %1579 = vst [vmem:[%s3609_s26 + $0x1648] sm:$0xff] %v1578_v9 }
 0x2da   : > { %1581 = vst [vmem:[%s3609_s26 + $0x1650] sm:$0xff] %v1580_v10 }
 0x2db   : > { %1583 = vst [vmem:[%s3609_s26 + $0x1658] sm:$0xff] %v1582_v11 }
 0x2dc   : > { %1585 = vst [vmem:[%s3609_s26 + $0x1660] sm:$0xff] %v1584_v12 }
 0x2dd   : > { %1587 = vst [vmem:[%s3609_s26 + $0x1668] sm:$0xff] %v1586_v13 }
 0x2de   : > { %1589 = vst [vmem:[%s3609_s26 + $0x1670] sm:$0xff] %v1588_v14 }
 0x2df   : > { %1591 = vst [vmem:[%s3609_s26 + $0x1678] sm:$0xff] %v1590_v15 }
 0x2e0 PF: > { %p3480_p5 = scmp.ge.s32.totalorder %s3548_s14, 1  ;;  %p1604_p6 = scmp.lt.s32.totalorder %s3548_s14, 3 }
 0x2e2   : > { %p1605_p7 = pnand %p3480_p5, %p1604_p6 }
 0x2e3   : > { %s1611_s27 = sand.u32 (!%p1605_p7), 1, %s3540_s12   ;;  %s3481_s9 = sshll.u32 (!%p1605_p7), %s3474_s15, 2 }
 0x2e4   : > { %1608 = sbr.rel (%p1605_p7) target bundleno = 1458 (0x5b2), region = 51  ;;  %p1640_p8 = scmp.lt.s32.totalorder (!%p1605_p7), %s3481_s9, 7 }
 0x2e5   : > { %s3492_s28 = smul.u32 (!%p1605_p7), 5760, %s1611_s27 }
 0x2e7   : > { %s5051_s29 = scalar_lea.vmem (!%p1605_p7), [#allocation2], %s3492_s28 }
 0x2e9   : > { %v1713_v16 = vld [vmem:[%s5051_s29 + $0x1e0] sm:$0xff]  ;;  %vm2413_vm0 = vcmask 261120   ;;  %s5915_s9 = smov (!%p1640_p8, %s3481_s9), 7  ;;  %vm3395_vm1 = vcmask 1041408   ;;  %vm3397_vm2 = vcmask 1045508   ;;  %vm3399_vm3 = vcmask 1043456  }
 0x2ea   : > { %v1777_v17 = vld [vmem:[%s5051_s29 + $0x3e0] sm:$0xff]  ;;  %2416 = vmatpush.msra.mxu0 %v1713_v16  ;;  %s5466_s12 = scalar_lea.vmem %s5909_s2, %s5915_s9  ;;  %s3483_s14 = sshll.u32 %s5915_s9, 1 }
 0x2eb   : > { %v1841_v18 = vld [vmem:[%s5051_s29 + $0x5e0] sm:$0xff]  ;;  %2436 = vmatpush.msra.mxu1 %v1777_v17  ;;  %s1648_s18 = scalar_lea.vmem %s5910_s3, %s3483_s14 }
 0x2ec   : > { %v1905_v19 = vld [vmem:[%s5051_s29 + $0x7e0] sm:$0xff]  ;;  %2456 = vmatpush.msra.mxu2 %v1841_v18 }
 0x2ed   : > { %v1709_v20 = vld [vmem:[%s5051_s29 + $0x1c0] sm:$0xff]  ;;  %2476 = vmatpush.msra.mxu3 %v1905_v19 }
 0x2ee   : > { %v1773_v21 = vld [vmem:[%s5051_s29 + $0x3c0] sm:$0xff]  ;;  %2417 = vmatpush.msra.mxu0 %v1709_v20 }
 0x2ef   : > { %v1837_v22 = vld [vmem:[%s5051_s29 + $0x5c0] sm:$0xff]  ;;  %2437 = vmatpush.msra.mxu1 %v1773_v21 }
 0x2f0   : > { %v1901_v23 = vld [vmem:[%s5051_s29 + $0x7c0] sm:$0xff]  ;;  %2457 = vmatpush.msra.mxu2 %v1837_v22 }
 0x2f1   : > { %v1705_v24 = vld [vmem:[%s5051_s29 + $0x1a0] sm:$0xff]  ;;  %2477 = vmatpush.msra.mxu3 %v1901_v23 }
 0x2f2   : > { %v1769_v25 = vld [vmem:[%s5051_s29 + $0x3a0] sm:$0xff]  ;;  %2418 = vmatpush.msra.mxu0 %v1705_v24 }
 0x2f3   : > { %v1833_v26 = vld [vmem:[%s5051_s29 + $0x5a0] sm:$0xff]  ;;  %2438 = vmatpush.msra.mxu1 %v1769_v25 }
 0x2f4   : > { %v1897_v27 = vld [vmem:[%s5051_s29 + $0x7a0] sm:$0xff]  ;;  %2458 = vmatpush.msra.mxu2 %v1833_v26 }
 0x2f5   : > { %v1701_v28 = vld [vmem:[%s5051_s29 + $0x180] sm:$0xff]  ;;  %2478 = vmatpush.msra.mxu3 %v1897_v27 }
 0x2f6   : > { %v1765_v29 = vld [vmem:[%s5051_s29 + $0x380] sm:$0xff]  ;;  %2419 = vmatpush.msra.mxu0 %v1701_v28 }
 0x2f7   : > { %v1829_v30 = vld [vmem:[%s5051_s29 + $0x580] sm:$0xff]  ;;  %2439 = vmatpush.msra.mxu1 %v1765_v29 }
 0x2f8   : > { %v1893_v31 = vld [vmem:[%s5051_s29 + $0x780] sm:$0xff]  ;;  %2459 = vmatpush.msra.mxu2 %v1829_v30 }
 0x2f9   : > { %v1697_v32 = vld [vmem:[%s5051_s29 + $0x160] sm:$0xff]  ;;  %2479 = vmatpush.msra.mxu3 %v1893_v31 }
 0x2fa   : > { %v1761_v33 = vld [vmem:[%s5051_s29 + $0x360] sm:$0xff]  ;;  %2420 = vmatpush.msra.mxu0 %v1697_v32 }
 0x2fb   : > { %v1825_v34 = vld [vmem:[%s5051_s29 + $0x560] sm:$0xff]  ;;  %2440 = vmatpush.msra.mxu1 %v1761_v33 }
 0x2fc   : > { %v1889_v35 = vld [vmem:[%s5051_s29 + $0x760] sm:$0xff]  ;;  %2460 = vmatpush.msra.mxu2 %v1825_v34 }
 0x2fd   : > { %v1693_v36 = vld [vmem:[%s5051_s29 + $0x140] sm:$0xff]  ;;  %2480 = vmatpush.msra.mxu3 %v1889_v35 }
 0x2fe   : > { %v1757_v37 = vld [vmem:[%s5051_s29 + $0x340] sm:$0xff]  ;;  %2421 = vmatpush.msra.mxu0 %v1693_v36 }
 0x2ff   : > { %v1821_v38 = vld [vmem:[%s5051_s29 + $0x540] sm:$0xff]  ;;  %2441 = vmatpush.msra.mxu1 %v1757_v37 }
 0x300   : > { %v1885_v39 = vld [vmem:[%s5051_s29 + $0x740] sm:$0xff]  ;;  %2461 = vmatpush.msra.mxu2 %v1821_v38 }
 0x301   : > { %v1689_v40 = vld [vmem:[%s5051_s29 + $0x120] sm:$0xff]  ;;  %2481 = vmatpush.msra.mxu3 %v1885_v39 }
 0x302   : > { %v1753_v41 = vld [vmem:[%s5051_s29 + $0x320] sm:$0xff]  ;;  %2422 = vmatpush.msra.mxu0 %v1689_v40  ;;  %v1650_v40 = vld [vmem:[%s5907_s0] sm:$0xff] }
 0x303   : > { %v1817_v42 = vld [vmem:[%s5051_s29 + $0x520] sm:$0xff]  ;;  %2442 = vmatpush.msra.mxu1 %v1753_v41  ;;  %2386 = vst [vmem:[#allocation1] ss:$4 sm:$0xff] %v1650_v40 }
 0x304   : > { %v1881_v43 = vld [vmem:[%s5051_s29 + $0x720] sm:$0xff]  ;;  %2462 = vmatpush.msra.mxu2 %v1817_v42 }
 0x305   : > { %v1685_v44 = vld [vmem:[%s5051_s29 + $0x100] sm:$0xff]  ;;  %2482 = vmatpush.msra.mxu3 %v1881_v43 }
 0x306   : > { %v1749_v45 = vld [vmem:[%s5051_s29 + $0x300] sm:$0xff]  ;;  %2423 = vmatpush.msra.mxu0 %v1685_v44 }
 0x307   : > { %v1813_v46 = vld [vmem:[%s5051_s29 + $0x500] sm:$0xff]  ;;  %2443 = vmatpush.msra.mxu1 %v1749_v45 }
 0x308   : > { %v1877_v47 = vld [vmem:[%s5051_s29 + $0x700] sm:$0xff]  ;;  %2463 = vmatpush.msra.mxu2 %v1813_v46 }
 0x309   : > { %v1681_v48 = vld [vmem:[%s5051_s29 + $0xe0] sm:$0xff]  ;;  %2483 = vmatpush.msra.mxu3 %v1877_v47 }
 0x30a   : > { %v1745_v49 = vld [vmem:[%s5051_s29 + $0x2e0] sm:$0xff]  ;;  %2424 = vmatpush.msra.mxu0 %v1681_v48 }
 0x30b   : > { %v1809_v50 = vld [vmem:[%s5051_s29 + $0x4e0] sm:$0xff]  ;;  %2444 = vmatpush.msra.mxu1 %v1745_v49 }
 0x30c   : > { %v1873_v51 = vld [vmem:[%s5051_s29 + $0x6e0] sm:$0xff]  ;;  %2464 = vmatpush.msra.mxu2 %v1809_v50 }
 0x30d   : > { %v1677_v52 = vld [vmem:[%s5051_s29 + $0xc0] sm:$0xff]  ;;  %2484 = vmatpush.msra.mxu3 %v1873_v51 }
 0x30e   : > { %v1741_v53 = vld [vmem:[%s5051_s29 + $0x2c0] sm:$0xff]  ;;  %2425 = vmatpush.msra.mxu0 %v1677_v52 }
 0x30f   : > { %v1805_v54 = vld [vmem:[%s5051_s29 + $0x4c0] sm:$0xff]  ;;  %2445 = vmatpush.msra.mxu1 %v1741_v53 }
 0x310   : > { %v1869_v55 = vld [vmem:[%s5051_s29 + $0x6c0] sm:$0xff]  ;;  %2465 = vmatpush.msra.mxu2 %v1805_v54 }
 0x311   : > { %v1673_v56 = vld [vmem:[%s5051_s29 + $0xa0] sm:$0xff]  ;;  %2485 = vmatpush.msra.mxu3 %v1869_v55 }
 0x312   : > { %v1737_v57 = vld [vmem:[%s5051_s29 + $0x2a0] sm:$0xff]  ;;  %2426 = vmatpush.msra.mxu0 %v1673_v56 }
 0x313   : > { %v1801_v58 = vld [vmem:[%s5051_s29 + $0x4a0] sm:$0xff]  ;;  %2446 = vmatpush.msra.mxu1 %v1737_v57 }
 0x314   : > { %v1865_v59 = vld [vmem:[%s5051_s29 + $0x6a0] sm:$0xff]  ;;  %2466 = vmatpush.msra.mxu2 %v1801_v58 }
 0x315   : > { %v1669_v60 = vld [vmem:[%s5051_s29 + $0x80] sm:$0xff]  ;;  %2486 = vmatpush.msra.mxu3 %v1865_v59  ;;  %v1652_v59 = vld [vmem:[%s5907_s0 + $0x10] sm:$0xff] }
 0x316   : > { %v1733_v61 = vld [vmem:[%s5051_s29 + $0x280] sm:$0xff]  ;;  %2427 = vmatpush.msra.mxu0 %v1669_v60 }
 0x317   : > { %v1797_v62 = vld [vmem:[%s5051_s29 + $0x480] sm:$0xff]  ;;  %2447 = vmatpush.msra.mxu1 %v1733_v61  ;;  %v5168_v61 = vld.sshfl [vmem:[#allocation1 + $0x10] sm:$0xff pattern:$0x73625140] }
 0x318   : > { %v1861_v63 = vld [vmem:[%s5051_s29 + $0x680] sm:$0xff]  ;;  %2467 = vmatpush.msra.mxu2 %v1797_v62  ;;  %v5170_v62 = vld.sshfl [vmem:[#allocation1 + $0x18] sm:$0xff pattern:$0x73625140] }
 0x319   : > { %v1665_v0 = vld [vmem:[%s5051_s29 + $0x60] sm:$0xff]  ;;  %2487 = vmatpush.msra.mxu3 %v1861_v63  ;;  %v5172_v63 = vld.sshfl [vmem:[#allocation1] sm:$0xff pattern:$0x73625140] }
 0x31a   : > { %v1729_v1 = vld [vmem:[%s5051_s29 + $0x260] sm:$0xff]  ;;  %2428 = vmatpush.msra.mxu0 %v1665_v0 }
 0x31b   : > { %v1793_v2 = vld [vmem:[%s5051_s29 + $0x460] sm:$0xff]  ;;  %2448 = vmatpush.msra.mxu1 %v1729_v1 }
 0x31c   : > { %v1857_v3 = vld [vmem:[%s5051_s29 + $0x660] sm:$0xff]  ;;  %2468 = vmatpush.msra.mxu2 %v1793_v2 }
 0x31d   : > { %v1661_v4 = vld [vmem:[%s5051_s29 + $0x40] sm:$0xff]  ;;  %2488 = vmatpush.msra.mxu3 %v1857_v3 }
 0x31e   : > { %v1725_v5 = vld [vmem:[%s5051_s29 + $0x240] sm:$0xff]  ;;  %2429 = vmatpush.msra.mxu0 %v1661_v4 }
 0x31f   : > { %v1789_v6 = vld [vmem:[%s5051_s29 + $0x440] sm:$0xff]  ;;  %2449 = vmatpush.msra.mxu1 %v1725_v5 }
 0x320   : > { %v1853_v7 = vld [vmem:[%s5051_s29 + $0x640] sm:$0xff]  ;;  %2469 = vmatpush.msra.mxu2 %v1789_v6 }
 0x321   : > { %v1657_v8 = vld [vmem:[%s5051_s29 + $0x20] sm:$0xff]  ;;  %2489 = vmatpush.msra.mxu3 %v1853_v7 }
 0x322   : > { %v1721_v9 = vld [vmem:[%s5051_s29 + $0x220] sm:$0xff]  ;;  %2430 = vmatpush.msra.mxu0 %v1657_v8 }
 0x323   : > { %v1785_v10 = vld [vmem:[%s5051_s29 + $0x420] sm:$0xff]  ;;  %2450 = vmatpush.msra.mxu1 %v1721_v9 }
 0x324   : > { %v1849_v11 = vld [vmem:[%s5051_s29 + $0x620] sm:$0xff]  ;;  %2470 = vmatpush.msra.mxu2 %v1785_v10 }
 0x325   : > { %v1653_v12 = vld [vmem:[%s5051_s29] sm:$0xff]  ;;  %2490 = vmatpush.msra.mxu3 %v1849_v11 }
 0x326   : > { %v1717_v13 = vld [vmem:[%s5051_s29 + $0x200] sm:$0xff]  ;;  %2431 = vmatpush.msra.mxu0 %v1653_v12 }
 0x327   : > { %v1781_v14 = vld [vmem:[%s5051_s29 + $0x400] sm:$0xff]  ;;  %2451 = vmatpush.msra.mxu1 %v1717_v13  ;;  %2432 = vmatmul.f32.vlgmr.msra.gmra.mxu0 %v5172_v63 }
 0x328   : > { %v1845_v15 = vld [vmem:[%s5051_s29 + $0x600] sm:$0xff]  ;;  %2471 = vmatpush.msra.mxu2 %v1781_v14 }
 0x329   : > { %v1969_v16 = vld [vmem:[%s5051_s29 + $0x9e0] sm:$0xff]  ;;  %2491 = vmatpush.msra.mxu3 %v1845_v15  ;;  %2472 = vmatmul.f32.vlgmr.msra.gmra.mxu2 %v5168_v61 }
 0x32a   : > { %v2033_v17 = vld [vmem:[%s5051_s29 + $0xbe0] sm:$0xff]  ;;  %2496 = vmatpush.msrb.mxu0 %v1969_v16  ;;  %2492 = vmatmul.f32.vlgmr.msra.gmra.mxu3 %v5170_v62 }
 0x32b   : > { %v2097_v18 = vld [vmem:[%s5051_s29 + $0xde0] sm:$0xff]  ;;  %2516 = vmatpush.msrb.mxu1 %v2033_v17 }
 0x32c   : > { %v2161_v19 = vld [vmem:[%s5051_s29 + $0xfe0] sm:$0xff]  ;;  %2536 = vmatpush.msrb.mxu2 %v2097_v18 }
 0x32d   : > { %v1965_v20 = vld [vmem:[%s5051_s29 + $0x9c0] sm:$0xff]  ;;  %2556 = vmatpush.msrb.mxu3 %v2161_v19 }
 0x32e   : > { %v2029_v21 = vld [vmem:[%s5051_s29 + $0xbc0] sm:$0xff]  ;;  %2497 = vmatpush.msrb.mxu0 %v1965_v20 }
 0x32f   : > { %v2093_v22 = vld [vmem:[%s5051_s29 + $0xdc0] sm:$0xff]  ;;  %2517 = vmatpush.msrb.mxu1 %v2029_v21 }
 0x330   : > { %v2157_v23 = vld [vmem:[%s5051_s29 + $0xfc0] sm:$0xff]  ;;  %2537 = vmatpush.msrb.mxu2 %v2093_v22 }
 0x331   : > { %v1961_v24 = vld [vmem:[%s5051_s29 + $0x9a0] sm:$0xff]  ;;  %2557 = vmatpush.msrb.mxu3 %v2157_v23 }
 0x332   : > { %v2025_v25 = vld [vmem:[%s5051_s29 + $0xba0] sm:$0xff]  ;;  %2498 = vmatpush.msrb.mxu0 %v1961_v24 }
 0x333   : > { %v2089_v26 = vld [vmem:[%s5051_s29 + $0xda0] sm:$0xff]  ;;  %2518 = vmatpush.msrb.mxu1 %v2025_v25 }
 0x334   : > { %v2153_v27 = vld [vmem:[%s5051_s29 + $0xfa0] sm:$0xff]  ;;  %2538 = vmatpush.msrb.mxu2 %v2089_v26 }
 0x335   : > { %v1957_v28 = vld [vmem:[%s5051_s29 + $0x980] sm:$0xff]  ;;  %2558 = vmatpush.msrb.mxu3 %v2153_v27 }
 0x336   : > { %v2021_v29 = vld [vmem:[%s5051_s29 + $0xb80] sm:$0xff]  ;;  %2499 = vmatpush.msrb.mxu0 %v1957_v28 }
 0x337   : > { %v2085_v30 = vld [vmem:[%s5051_s29 + $0xd80] sm:$0xff]  ;;  %2519 = vmatpush.msrb.mxu1 %v2021_v29 }
 0x338   : > { %v2149_v31 = vld [vmem:[%s5051_s29 + $0xf80] sm:$0xff]  ;;  %2539 = vmatpush.msrb.mxu2 %v2085_v30 }
 0x339   : > { %v1953_v32 = vld [vmem:[%s5051_s29 + $0x960] sm:$0xff]  ;;  %2559 = vmatpush.msrb.mxu3 %v2149_v31 }
 0x33a   : > { %v2017_v33 = vld [vmem:[%s5051_s29 + $0xb60] sm:$0xff]  ;;  %2500 = vmatpush.msrb.mxu0 %v1953_v32 }
 0x33b   : > { %v2081_v34 = vld [vmem:[%s5051_s29 + $0xd60] sm:$0xff]  ;;  %2520 = vmatpush.msrb.mxu1 %v2017_v33 }
 0x33c   : > { %v2145_v35 = vld [vmem:[%s5051_s29 + $0xf60] sm:$0xff]  ;;  %2540 = vmatpush.msrb.mxu2 %v2081_v34 }
 0x33d   : > { %v1949_v36 = vld [vmem:[%s5051_s29 + $0x940] sm:$0xff]  ;;  %2560 = vmatpush.msrb.mxu3 %v2145_v35 }
 0x33e   : > { %v2013_v37 = vld [vmem:[%s5051_s29 + $0xb40] sm:$0xff]  ;;  %2501 = vmatpush.msrb.mxu0 %v1949_v36 }
 0x33f   : > { %v2077_v38 = vld [vmem:[%s5051_s29 + $0xd40] sm:$0xff]  ;;  %2521 = vmatpush.msrb.mxu1 %v2013_v37 }
 0x340   : > { %v2141_v39 = vld [vmem:[%s5051_s29 + $0xf40] sm:$0xff]  ;;  %2541 = vmatpush.msrb.mxu2 %v2077_v38 }
 0x341   : > { %v1945_v41 = vld [vmem:[%s5051_s29 + $0x920] sm:$0xff]  ;;  %2561 = vmatpush.msrb.mxu3 %v2141_v39 }
 0x342   : > { %v2009_v42 = vld [vmem:[%s5051_s29 + $0xb20] sm:$0xff]  ;;  %2502 = vmatpush.msrb.mxu0 %v1945_v41  ;;  %v1714_v41 = vld [vmem:[%s5051_s29 + $0x1e8] sm:$0xff] }
 0x343   : > { %v2073_v43 = vld [vmem:[%s5051_s29 + $0xd20] sm:$0xff]  ;;  %2522 = vmatpush.msrb.mxu1 %v2009_v42 }
 0x344   : > { %v2137_v44 = vld [vmem:[%s5051_s29 + $0xf20] sm:$0xff]  ;;  %2542 = vmatpush.msrb.mxu2 %v2073_v43 }
 0x345   : > { %v1941_v45 = vld [vmem:[%s5051_s29 + $0x900] sm:$0xff]  ;;  %2562 = vmatpush.msrb.mxu3 %v2137_v44 }
 0x346   : > { %v2005_v46 = vld [vmem:[%s5051_s29 + $0xb00] sm:$0xff]  ;;  %2503 = vmatpush.msrb.mxu0 %v1941_v45 }
 0x347   : > { %v2069_v47 = vld [vmem:[%s5051_s29 + $0xd00] sm:$0xff]  ;;  %2523 = vmatpush.msrb.mxu1 %v2005_v46  ;;  %v1710_v46 = vld [vmem:[%s5051_s29 + $0x1c8] sm:$0xff] }
 0x348   : > { %v2133_v48 = vld [vmem:[%s5051_s29 + $0xf00] sm:$0xff]  ;;  %2543 = vmatpush.msrb.mxu2 %v2069_v47 }
 0x349   : > { %v1937_v49 = vld [vmem:[%s5051_s29 + $0x8e0] sm:$0xff]  ;;  %2563 = vmatpush.msrb.mxu3 %v2133_v48 }
 0x34a   : > { %v2001_v50 = vld [vmem:[%s5051_s29 + $0xae0] sm:$0xff]  ;;  %2504 = vmatpush.msrb.mxu0 %v1937_v49 }
 0x34b   : > { %v2065_v51 = vld [vmem:[%s5051_s29 + $0xce0] sm:$0xff]  ;;  %2524 = vmatpush.msrb.mxu1 %v2001_v50 }
 0x34c   : > { %v2129_v52 = vld [vmem:[%s5051_s29 + $0xee0] sm:$0xff]  ;;  %2544 = vmatpush.msrb.mxu2 %v2065_v51  ;;  %v1706_v51 = vld [vmem:[%s5051_s29 + $0x1a8] sm:$0xff] }
 0x34d   : > { %v1933_v53 = vld [vmem:[%s5051_s29 + $0x8c0] sm:$0xff]  ;;  %2564 = vmatpush.msrb.mxu3 %v2129_v52 }
 0x34e   : > { %v1997_v54 = vld [vmem:[%s5051_s29 + $0xac0] sm:$0xff]  ;;  %2505 = vmatpush.msrb.mxu0 %v1933_v53 }
 0x34f   : > { %v2061_v55 = vld [vmem:[%s5051_s29 + $0xcc0] sm:$0xff]  ;;  %2525 = vmatpush.msrb.mxu1 %v1997_v54 }
 0x350   : > { %v2125_v56 = vld [vmem:[%s5051_s29 + $0xec0] sm:$0xff]  ;;  %2545 = vmatpush.msrb.mxu2 %v2061_v55  ;;  %v1702_v55 = vld [vmem:[%s5051_s29 + $0x188] sm:$0xff] }
 0x351   : > { %v1929_v57 = vld [vmem:[%s5051_s29 + $0x8a0] sm:$0xff]  ;;  %2565 = vmatpush.msrb.mxu3 %v2125_v56 }
 0x352   : > { %v1993_v58 = vld [vmem:[%s5051_s29 + $0xaa0] sm:$0xff]  ;;  %2506 = vmatpush.msrb.mxu0 %v1929_v57 }
 0x353   : > { %v1651_v60 = vld [vmem:[%s5907_s0 + $0x8] sm:$0xff]  ;;  %2526 = vmatpush.msrb.mxu1 %v1993_v58 }
 0x354   : > { %v5174_v0 = vld.sshfl [vmem:[#allocation1 + $0x8] sm:$0xff pattern:$0x73625140]  ;;  %2388 = vst [vmem:[#allocation1 + $0x20] ss:$4 sm:$0xff] %v1651_v60 }
 0x355   : > { %v2057_v1 = vld [vmem:[%s5051_s29 + $0xca0] sm:$0xff]  ;;  %2397 = vst [vmem:[#allocation1] ss:$4 sm:$0xff] %v1652_v59  ;;  %2452 = vmatmul.f32.vlgmr.msra.gmra.mxu1 %v5174_v0  ;;  %v1698_v59 = vld [vmem:[%s5051_s29 + $0x168] sm:$0xff] }
 0x356   : > { %v2121_v2 = vld [vmem:[%s5051_s29 + $0xea0] sm:$0xff]  ;;  %2546 = vmatpush.msrb.mxu2 %v2057_v1 }
 0x357   : > { %v1925_v3 = vld [vmem:[%s5051_s29 + $0x880] sm:$0xff]  ;;  %2566 = vmatpush.msrb.mxu3 %v2121_v2 }
 0x358   : > { %v1989_v4 = vld [vmem:[%s5051_s29 + $0xa80] sm:$0xff]  ;;  %2507 = vmatpush.msrb.mxu0 %v1925_v3  ;;  %v1694_v3 = vld [vmem:[%s5051_s29 + $0x148] sm:$0xff] }
 0x359   : > { %v2053_v5 = vld [vmem:[%s5051_s29 + $0xc80] sm:$0xff]  ;;  %2527 = vmatpush.msrb.mxu1 %v1989_v4 }
 0x35a   : > { %v2117_v6 = vld [vmem:[%s5051_s29 + $0xe80] sm:$0xff]  ;;  %2547 = vmatpush.msrb.mxu2 %v2053_v5 }
 0x35b   : > { %v1921_v7 = vld [vmem:[%s5051_s29 + $0x860] sm:$0xff]  ;;  %2567 = vmatpush.msrb.mxu3 %v2117_v6  ;;  %v5218_v39 = vld.sshfl [vmem:[#allocation1 + $0x30] sm:$0xff pattern:$0x73625140] }
 0x35c   : > { %v1985_v8 = vld [vmem:[%s5051_s29 + $0xa60] sm:$0xff]  ;;  %2508 = vmatpush.msrb.mxu0 %v1921_v7  ;;  %v5220_v40 = vld.sshfl [vmem:[#allocation1 + $0x38] sm:$0xff pattern:$0x73625140]  ;;  %v1690_v7 = vld [vmem:[%s5051_s29 + $0x128] sm:$0xff] }
 0x35d   : > { %v2049_v9 = vld [vmem:[%s5051_s29 + $0xc60] sm:$0xff]  ;;  %2528 = vmatpush.msrb.mxu1 %v1985_v8  ;;  %v5228_v45 = vld.sshfl [vmem:[#allocation1 + $0x20] sm:$0xff pattern:$0x73625140] }
 0x35e   : > { %v2113_v10 = vld [vmem:[%s5051_s29 + $0xe60] sm:$0xff]  ;;  %2548 = vmatpush.msrb.mxu2 %v2049_v9 }
 0x35f   : > { %v1917_v11 = vld [vmem:[%s5051_s29 + $0x840] sm:$0xff]  ;;  %2568 = vmatpush.msrb.mxu3 %v2113_v10 }
 0x360   : > { %v1981_v12 = vld [vmem:[%s5051_s29 + $0xa40] sm:$0xff]  ;;  %2509 = vmatpush.msrb.mxu0 %v1917_v11  ;;  %v1686_v11 = vld [vmem:[%s5051_s29 + $0x108] sm:$0xff] }
 0x361   : > { %v2045_v13 = vld [vmem:[%s5051_s29 + $0xc40] sm:$0xff]  ;;  %2529 = vmatpush.msrb.mxu1 %v1981_v12 }
 0x362   : > { %v2109_v14 = vld [vmem:[%s5051_s29 + $0xe40] sm:$0xff]  ;;  %2549 = vmatpush.msrb.mxu2 %v2045_v13 }
 0x363   : > { %v1913_v15 = vld [vmem:[%s5051_s29 + $0x820] sm:$0xff]  ;;  %2569 = vmatpush.msrb.mxu3 %v2109_v14 }
 0x364   : > { %v1977_v16 = vld [vmem:[%s5051_s29 + $0xa20] sm:$0xff]  ;;  %2510 = vmatpush.msrb.mxu0 %v1913_v15  ;;  %v1682_v15 = vld [vmem:[%s5051_s29 + $0xe8] sm:$0xff] }
 0x365   : > { %v2041_v17 = vld [vmem:[%s5051_s29 + $0xc20] sm:$0xff]  ;;  %2530 = vmatpush.msrb.mxu1 %v1977_v16 }
 0x366   : > { %v2105_v18 = vld [vmem:[%s5051_s29 + $0xe20] sm:$0xff]  ;;  %2550 = vmatpush.msrb.mxu2 %v2041_v17 }
 0x367   : > { %v1909_v19 = vld [vmem:[%s5051_s29 + $0x800] sm:$0xff]  ;;  %2570 = vmatpush.msrb.mxu3 %v2105_v18 }
 0x368   : > { %v1973_v20 = vld [vmem:[%s5051_s29 + $0xa00] sm:$0xff]  ;;  %2511 = vmatpush.msrb.mxu0 %v1909_v19  ;;  %v1678_v19 = vld [vmem:[%s5051_s29 + $0xc8] sm:$0xff] }
 0x369   : > { %v2037_v21 = vld [vmem:[%s5051_s29 + $0xc00] sm:$0xff]  ;;  %2531 = vmatpush.msrb.mxu1 %v1973_v20  ;;  %2512 = vmatmul.f32.vlgmr.msrb.gmra.mxu0 %v5228_v45 }
 0x36a   : > { %v2101_v22 = vld [vmem:[%s5051_s29 + $0xe00] sm:$0xff]  ;;  %2551 = vmatpush.msrb.mxu2 %v2037_v21 }
 0x36b   : > { %v2225_v23 = vld [vmem:[%s5051_s29 + $0x11e0] sm:$0xff]  ;;  %2571 = vmatpush.msrb.mxu3 %v2101_v22  ;;  %2552 = vmatmul.f32.vlgmr.msrb.gmra.mxu2 %v5218_v39 }
 0x36c   : > { %v2289_v24 = vld [vmem:[%s5051_s29 + $0x13e0] sm:$0xff]  ;;  %2576 = vmatpush.msra.mxu0 %v2225_v23  ;;  %2572 = vmatmul.f32.vlgmr.msrb.gmra.mxu3 %v5220_v40  ;;  %v1674_v23 = vld [vmem:[%s5051_s29 + $0xa8] sm:$0xff] }
 0x36d   : > { %v2353_v25 = vld [vmem:[%s5051_s29 + $0x15e0] sm:$0xff]  ;;  %2596 = vmatpush.msra.mxu1 %v2289_v24 }
 0x36e   : > { %v2369_v26 = vld [vmem:[%s5051_s29 + $0x1660] sm:$0xff]  ;;  %2616 = vmatpush.msra.mxu2 %v2353_v25 }
 0x36f   : > { %v2221_v27 = vld [vmem:[%s5051_s29 + $0x11c0] sm:$0xff]  ;;  %2648 = vmatpush.msra.mxu3 %v2369_v26 }
 0x370   : > { %v2285_v28 = vld [vmem:[%s5051_s29 + $0x13c0] sm:$0xff]  ;;  %2577 = vmatpush.msra.mxu0 %v2221_v27  ;;  %v1670_v27 = vld [vmem:[%s5051_s29 + $0x88] sm:$0xff] }
 0x371   : > { %v2349_v29 = vld [vmem:[%s5051_s29 + $0x15c0] sm:$0xff]  ;;  %2597 = vmatpush.msra.mxu1 %v2285_v28 }
 0x372   : > { %v2365_v30 = vld [vmem:[%s5051_s29 + $0x1640] sm:$0xff]  ;;  %2617 = vmatpush.msra.mxu2 %v2349_v29 }
 0x373   : > { %v2217_v31 = vld [vmem:[%s5051_s29 + $0x11a0] sm:$0xff]  ;;  %2649 = vmatpush.msra.mxu3 %v2365_v30 }
 0x374   : > { %v2281_v32 = vld [vmem:[%s5051_s29 + $0x13a0] sm:$0xff]  ;;  %2578 = vmatpush.msra.mxu0 %v2217_v31  ;;  %v5278_v31 = vld.sshfl [vmem:[#allocation1] sm:$0xff pattern:$0x73625140] }
 0x375   : > { %v2345_v33 = vld [vmem:[%s5051_s29 + $0x15a0] sm:$0xff]  ;;  %2598 = vmatpush.msra.mxu1 %v2281_v32  ;;  %v5280_v32 = vld.sshfl [vmem:[#allocation1 + $0x10] sm:$0xff pattern:$0x73625140] }
 0x376   : > { %v2361_v34 = vld [vmem:[%s5051_s29 + $0x1620] sm:$0xff]  ;;  %2618 = vmatpush.msra.mxu2 %v2345_v33  ;;  %v1666_v33 = vld [vmem:[%s5051_s29 + $0x68] sm:$0xff] }
 0x377   : > { %v2213_v35 = vld [vmem:[%s5051_s29 + $0x1180] sm:$0xff]  ;;  %2650 = vmatpush.msra.mxu3 %v2361_v34  ;;  %v1778_v34 = vld [vmem:[%s5051_s29 + $0x3e8] sm:$0xff] }
 0x378   : > { %v2277_v36 = vld [vmem:[%s5051_s29 + $0x1380] sm:$0xff]  ;;  %2579 = vmatpush.msra.mxu0 %v2213_v35  ;;  %v1842_v35 = vld [vmem:[%s5051_s29 + $0x5e8] sm:$0xff] }
 0x379   : > { %v2341_v37 = vld [vmem:[%s5051_s29 + $0x1580] sm:$0xff]  ;;  %2599 = vmatpush.msra.mxu1 %v2277_v36  ;;  %v1906_v36 = vld [vmem:[%s5051_s29 + $0x7e8] sm:$0xff] }
 0x37a   : > { %v2357_v38 = vld [vmem:[%s5051_s29 + $0x1600] sm:$0xff]  ;;  %2619 = vmatpush.msra.mxu2 %v2341_v37 }
 0x37b   : > { %v2209_v42 = vld [vmem:[%s5051_s29 + $0x1160] sm:$0xff]  ;;  %2651 = vmatpush.msra.mxu3 %v2357_v38  ;;  %v5290_v38 = vld.sshfl [vmem:[#allocation1 + $0x18] sm:$0xff pattern:$0x73625140] }
 0x37c   : > { %v2273_v43 = vld [vmem:[%s5051_s29 + $0x1360] sm:$0xff]  ;;  %2580 = vmatpush.msra.mxu0 %v2209_v42  ;;  %v1774_v42 = vld [vmem:[%s5051_s29 + $0x3c8] sm:$0xff]  ;;  %3484 = vmatmul.msk.f32.vlgmr.msra.gmra.mxu3 %vm2413_vm0, %v5290_v38 }
 0x37d   : > { %v2337_v44 = vld [vmem:[%s5051_s29 + $0x1560] sm:$0xff]  ;;  %2656 = vmatpush.msrb.mxu3 %v1714_v41  ;;  %2600 = vmatpush.msra.mxu1 %v2273_v43  ;;  %v1662_v41 = vld [vmem:[%s5051_s29 + $0x48] sm:$0xff] }
 0x37e   : > { %v2205_v47 = vld [vmem:[%s5051_s29 + $0x1140] sm:$0xff]  ;;  %2620 = vmatpush.msra.mxu2 %v2337_v44  ;;  %v1838_v43 = vld [vmem:[%s5051_s29 + $0x5c8] sm:$0xff] }
 0x37f   : > { %v2269_v48 = vld [vmem:[%s5051_s29 + $0x1340] sm:$0xff]  ;;  %2657 = vmatpush.msrb.mxu3 %v1710_v46  ;;  %2581 = vmatpush.msra.mxu0 %v2205_v47  ;;  %v1902_v44 = vld [vmem:[%s5051_s29 + $0x7c8] sm:$0xff] }
 0x380   : > { %v2333_v49 = vld [vmem:[%s5051_s29 + $0x1540] sm:$0xff]  ;;  %2601 = vmatpush.msra.mxu1 %v2269_v48  ;;  %v1658_v46 = vld [vmem:[%s5051_s29 + $0x28] sm:$0xff] }
 0x381   : > { %v5234_v50 = vld.sshfl [vmem:[#allocation1 + $0x28] sm:$0xff pattern:$0x73625140]  ;;  %2621 = vmatpush.msra.mxu2 %v2333_v49  ;;  %2658 = vmatpush.msrb.mxu3 %v1706_v51  ;;  %v1770_v47 = vld [vmem:[%s5051_s29 + $0x3a8] sm:$0xff] }
 0x382   : > { %v2201_v52 = vld [vmem:[%s5051_s29 + $0x1120] sm:$0xff]  ;;  %2532 = vmatmul.f32.vlgmr.msrb.gmra.mxu1 %v5234_v50  ;;  %v1834_v48 = vld [vmem:[%s5051_s29 + $0x5a8] sm:$0xff] }
 0x383   : > { %v2265_v53 = vld [vmem:[%s5051_s29 + $0x1320] sm:$0xff]  ;;  %2582 = vmatpush.msra.mxu0 %v2201_v52  ;;  %2659 = vmatpush.msrb.mxu3 %v1702_v55  ;;  %v1898_v49 = vld [vmem:[%s5051_s29 + $0x7a8] sm:$0xff] }
 0x384   : > { %v2329_v54 = vld [vmem:[%s5051_s29 + $0x1520] sm:$0xff]  ;;  %2602 = vmatpush.msra.mxu1 %v2265_v53  ;;  %v1654_v51 = vld [vmem:[%s5051_s29 + $0x8] sm:$0xff] }
 0x385   : > { %v2197_v56 = vld [vmem:[%s5051_s29 + $0x1100] sm:$0xff]  ;;  %2622 = vmatpush.msra.mxu2 %v2329_v54  ;;  %2660 = vmatpush.msrb.mxu3 %v1698_v59  ;;  %v1766_v52 = vld [vmem:[%s5051_s29 + $0x388] sm:$0xff] }
 0x386   : > { %v2261_v57 = vld [vmem:[%s5051_s29 + $0x1300] sm:$0xff]  ;;  %2583 = vmatpush.msra.mxu0 %v2197_v56  ;;  %v1830_v53 = vld [vmem:[%s5051_s29 + $0x588] sm:$0xff] }
 0x387   : > { %v2325_v58 = vld [vmem:[%s5051_s29 + $0x1500] sm:$0xff]  ;;  %2603 = vmatpush.msra.mxu1 %v2261_v57  ;;  %2661 = vmatpush.msrb.mxu3 %v1694_v3  ;;  %v1894_v54 = vld [vmem:[%s5051_s29 + $0x788] sm:$0xff] }
 0x388   : > { %v2193_v60 = vld [vmem:[%s5051_s29 + $0x10e0] sm:$0xff]  ;;  %2623 = vmatpush.msra.mxu2 %v2325_v58  ;;  %v1970_v55 = vld [vmem:[%s5051_s29 + $0x9e8] sm:$0xff] }
 0x389   : > { %v2257_v1 = vld [vmem:[%s5051_s29 + $0x12e0] sm:$0xff]  ;;  %2584 = vmatpush.msra.mxu0 %v2193_v60  ;;  %2662 = vmatpush.msrb.mxu3 %v1690_v7  ;;  %v1762_v56 = vld [vmem:[%s5051_s29 + $0x368] sm:$0xff] }
 0x38a   : > { %v2321_v2 = vld [vmem:[%s5051_s29 + $0x14e0] sm:$0xff]  ;;  %2604 = vmatpush.msra.mxu1 %v2257_v1  ;;  %v1826_v57 = vld [vmem:[%s5051_s29 + $0x568] sm:$0xff] }
 0x38b   : > { %v2189_v4 = vld [vmem:[%s5051_s29 + $0x10c0] sm:$0xff]  ;;  %2624 = vmatpush.msra.mxu2 %v2321_v2  ;;  %2663 = vmatpush.msrb.mxu3 %v1686_v11  ;;  %v1890_v58 = vld [vmem:[%s5051_s29 + $0x768] sm:$0xff] }
 0x38c   : > { %v2253_v5 = vld [vmem:[%s5051_s29 + $0x12c0] sm:$0xff]  ;;  %2585 = vmatpush.msra.mxu0 %v2189_v4  ;;  %v1966_v59 = vld [vmem:[%s5051_s29 + $0x9c8] sm:$0xff] }
 0x38d   : > { %v2317_v6 = vld [vmem:[%s5051_s29 + $0x14c0] sm:$0xff]  ;;  %2605 = vmatpush.msra.mxu1 %v2253_v5  ;;  %2664 = vmatpush.msrb.mxu3 %v1682_v15  ;;  %v1758_v60 = vld [vmem:[%s5051_s29 + $0x348] sm:$0xff] }
 0x38e   : > { %v2185_v8 = vld [vmem:[%s5051_s29 + $0x10a0] sm:$0xff]  ;;  %2625 = vmatpush.msra.mxu2 %v2317_v6  ;;  %v1822_v1 = vld [vmem:[%s5051_s29 + $0x548] sm:$0xff] }
 0x38f   : > { %v2249_v9 = vld [vmem:[%s5051_s29 + $0x12a0] sm:$0xff]  ;;  %2586 = vmatpush.msra.mxu0 %v2185_v8  ;;  %2665 = vmatpush.msrb.mxu3 %v1678_v19  ;;  %v1886_v2 = vld [vmem:[%s5051_s29 + $0x748] sm:$0xff] }
 0x390   : > { %v2313_v10 = vld [vmem:[%s5051_s29 + $0x14a0] sm:$0xff]  ;;  %2606 = vmatpush.msra.mxu1 %v2249_v9  ;;  %v1962_v3 = vld [vmem:[%s5051_s29 + $0x9a8] sm:$0xff] }
 0x391   : > { %v2181_v12 = vld [vmem:[%s5051_s29 + $0x1080] sm:$0xff]  ;;  %2626 = vmatpush.msra.mxu2 %v2313_v10  ;;  %2666 = vmatpush.msrb.mxu3 %v1674_v23  ;;  %v1754_v4 = vld [vmem:[%s5051_s29 + $0x328] sm:$0xff] }
 0x392   : > { %v2245_v13 = vld [vmem:[%s5051_s29 + $0x1280] sm:$0xff]  ;;  %2587 = vmatpush.msra.mxu0 %v2181_v12  ;;  %v1818_v5 = vld [vmem:[%s5051_s29 + $0x528] sm:$0xff] }
 0x393   : > { %v2309_v14 = vld [vmem:[%s5051_s29 + $0x1480] sm:$0xff]  ;;  %2607 = vmatpush.msra.mxu1 %v2245_v13  ;;  %2667 = vmatpush.msrb.mxu3 %v1670_v27  ;;  %v1882_v6 = vld [vmem:[%s5051_s29 + $0x728] sm:$0xff] }
 0x394   : > { %v2177_v16 = vld [vmem:[%s5051_s29 + $0x1060] sm:$0xff]  ;;  %2627 = vmatpush.msra.mxu2 %v2309_v14  ;;  %v1958_v7 = vld [vmem:[%s5051_s29 + $0x988] sm:$0xff] }
 0x395   : > { %v2241_v17 = vld [vmem:[%s5051_s29 + $0x1260] sm:$0xff]  ;;  %2588 = vmatpush.msra.mxu0 %v2177_v16  ;;  %2668 = vmatpush.msrb.mxu3 %v1666_v33  ;;  %v1750_v8 = vld [vmem:[%s5051_s29 + $0x308] sm:$0xff] }
 0x396   : > { %v2305_v18 = vld [vmem:[%s5051_s29 + $0x1460] sm:$0xff]  ;;  %2608 = vmatpush.msra.mxu1 %v2241_v17  ;;  %v1814_v9 = vld [vmem:[%s5051_s29 + $0x508] sm:$0xff] }
 0x397   : > { %v2173_v20 = vld [vmem:[%s5051_s29 + $0x1040] sm:$0xff]  ;;  %2628 = vmatpush.msra.mxu2 %v2305_v18  ;;  %2669 = vmatpush.msrb.mxu3 %v1662_v41  ;;  %v1878_v10 = vld [vmem:[%s5051_s29 + $0x708] sm:$0xff] }
 0x398   : > { %v2237_v21 = vld [vmem:[%s5051_s29 + $0x1240] sm:$0xff]  ;;  %2589 = vmatpush.msra.mxu0 %v2173_v20  ;;  %v1954_v11 = vld [vmem:[%s5051_s29 + $0x968] sm:$0xff] }
 0x399   : > { %v2301_v22 = vld [vmem:[%s5051_s29 + $0x1440] sm:$0xff]  ;;  %2609 = vmatpush.msra.mxu1 %v2237_v21  ;;  %2670 = vmatpush.msrb.mxu3 %v1658_v46  ;;  %v1746_v12 = vld [vmem:[%s5051_s29 + $0x2e8] sm:$0xff] }
 0x39a   : > { %v2169_v24 = vld [vmem:[%s5051_s29 + $0x1020] sm:$0xff]  ;;  %2629 = vmatpush.msra.mxu2 %v2301_v22  ;;  %v1810_v13 = vld [vmem:[%s5051_s29 + $0x4e8] sm:$0xff] }
 0x39b   : > { %v2233_v25 = vld [vmem:[%s5051_s29 + $0x1220] sm:$0xff]  ;;  %2590 = vmatpush.msra.mxu0 %v2169_v24  ;;  %2671 = vmatpush.msrb.mxu3 %v1654_v51  ;;  %v1874_v14 = vld [vmem:[%s5051_s29 + $0x6e8] sm:$0xff] }
 0x39c   : > { %v2297_v26 = vld [vmem:[%s5051_s29 + $0x1420] sm:$0xff]  ;;  %2610 = vmatpush.msra.mxu1 %v2233_v25  ;;  %v1950_v15 = vld [vmem:[%s5051_s29 + $0x948] sm:$0xff]  ;;  %2672 = vmatmul.f32.vlgmr.msrb.gmra.mxu3 %v5172_v63 }
 0x39d   : > { %v2165_v28 = vld [vmem:[%s5051_s29 + $0x1000] sm:$0xff]  ;;  %2630 = vmatpush.msra.mxu2 %v2297_v26  ;;  %2736 = vmatpush.msra.mxu3 %v1970_v55  ;;  %v1742_v16 = vld [vmem:[%s5051_s29 + $0x2c8] sm:$0xff] }
 0x39e   : > { %v2229_v29 = vld [vmem:[%s5051_s29 + $0x1200] sm:$0xff]  ;;  %2591 = vmatpush.msra.mxu0 %v2165_v28  ;;  %v1806_v17 = vld [vmem:[%s5051_s29 + $0x4c8] sm:$0xff] }
 0x39f   : > { %v2293_v30 = vld [vmem:[%s5051_s29 + $0x1400] sm:$0xff]  ;;  %2611 = vmatpush.msra.mxu1 %v2229_v29  ;;  %2592 = vmatmul.f32.vlgmr.msra.gmra.mxu0 %v5278_v31  ;;  %v1870_v18 = vld [vmem:[%s5051_s29 + $0x6c8] sm:$0xff] }
 0x3a0   : > { %2631 = vmatpush.msra.mxu2 %v2293_v30  ;;  %v5286_v37 = vld.sshfl [vmem:[#allocation1 + $0x8] sm:$0xff pattern:$0x73625140]  ;;  %2676 = vmatpush.msrb.mxu0 %v1778_v34  ;;  %v1946_v19 = vld [vmem:[%s5051_s29 + $0x928] sm:$0xff] }
 0x3a1   : > { %2632 = vmatmul.f32.vlgmr.msra.gmra.mxu2 %v5280_v32  ;;  %2696 = vmatpush.msrb.mxu1 %v1842_v35  ;;  %v1738_v20 = vld [vmem:[%s5051_s29 + $0x2a8] sm:$0xff] }
 0x3a2   : > { %2716 = vmatpush.msrb.mxu2 %v1906_v36  ;;  %2612 = vmatmul.f32.vlgmr.msra.gmra.mxu1 %v5286_v37  ;;  %v1802_v21 = vld [vmem:[%s5051_s29 + $0x4a8] sm:$0xff] }
 0x3a3   : > { %2677 = vmatpush.msrb.mxu0 %v1774_v42  ;;  %2697 = vmatpush.msrb.mxu1 %v1838_v43  ;;  %v1866_v22 = vld [vmem:[%s5051_s29 + $0x6a8] sm:$0xff] }
 0x3a4   : > { %2717 = vmatpush.msrb.mxu2 %v1902_v44  ;;  %2737 = vmatpush.msra.mxu3 %v1966_v59  ;;  %v1942_v23 = vld [vmem:[%s5051_s29 + $0x908] sm:$0xff] }
 0x3a5   : > { %2678 = vmatpush.msrb.mxu0 %v1770_v47  ;;  %2698 = vmatpush.msrb.mxu1 %v1834_v48  ;;  %v1734_v24 = vld [vmem:[%s5051_s29 + $0x288] sm:$0xff] }
 0x3a6   : > { %2718 = vmatpush.msrb.mxu2 %v1898_v49  ;;  %2738 = vmatpush.msra.mxu3 %v1962_v3  ;;  %v1798_v25 = vld [vmem:[%s5051_s29 + $0x488] sm:$0xff] }
 0x3a7   : > { %2679 = vmatpush.msrb.mxu0 %v1766_v52  ;;  %2699 = vmatpush.msrb.mxu1 %v1830_v53  ;;  %v1862_v26 = vld [vmem:[%s5051_s29 + $0x688] sm:$0xff] }
 0x3a8   : > { %2719 = vmatpush.msrb.mxu2 %v1894_v54  ;;  %2739 = vmatpush.msra.mxu3 %v1958_v7  ;;  %v1938_v27 = vld [vmem:[%s5051_s29 + $0x8e8] sm:$0xff] }
 0x3a9   : > { %2680 = vmatpush.msrb.mxu0 %v1762_v56  ;;  %2700 = vmatpush.msrb.mxu1 %v1826_v57  ;;  %v1730_v28 = vld [vmem:[%s5051_s29 + $0x268] sm:$0xff] }
 0x3aa   : > { %2720 = vmatpush.msrb.mxu2 %v1890_v58  ;;  %2740 = vmatpush.msra.mxu3 %v1954_v11  ;;  %v1794_v29 = vld [vmem:[%s5051_s29 + $0x468] sm:$0xff] }
 0x3ab   : > { %2681 = vmatpush.msrb.mxu0 %v1758_v60  ;;  %2701 = vmatpush.msrb.mxu1 %v1822_v1  ;;  %v1858_v30 = vld [vmem:[%s5051_s29 + $0x668] sm:$0xff] }
 0x3ac   : > { %2721 = vmatpush.msrb.mxu2 %v1886_v2  ;;  %2741 = vmatpush.msra.mxu3 %v1950_v15  ;;  %v1934_v33 = vld [vmem:[%s5051_s29 + $0x8c8] sm:$0xff] }
 0x3ad   : > { %2682 = vmatpush.msrb.mxu0 %v1754_v4  ;;  %2702 = vmatpush.msrb.mxu1 %v1818_v5  ;;  %v1726_v34 = vld [vmem:[%s5051_s29 + $0x248] sm:$0xff] }
 0x3ae   : > { %2722 = vmatpush.msrb.mxu2 %v1882_v6  ;;  %2742 = vmatpush.msra.mxu3 %v1946_v19  ;;  %v1790_v35 = vld [vmem:[%s5051_s29 + $0x448] sm:$0xff] }
 0x3af   : > { %2683 = vmatpush.msrb.mxu0 %v1750_v8  ;;  %2703 = vmatpush.msrb.mxu1 %v1814_v9  ;;  %v1854_v36 = vld [vmem:[%s5051_s29 + $0x648] sm:$0xff] }
 0x3b0   : > { %2723 = vmatpush.msrb.mxu2 %v1878_v10  ;;  %2743 = vmatpush.msra.mxu3 %v1942_v23  ;;  %v1930_v41 = vld [vmem:[%s5051_s29 + $0x8a8] sm:$0xff] }
 0x3b1   : > { %2684 = vmatpush.msrb.mxu0 %v1746_v12  ;;  %2704 = vmatpush.msrb.mxu1 %v1810_v13  ;;  %v1722_v42 = vld [vmem:[%s5051_s29 + $0x228] sm:$0xff] }
 0x3b2   : > { %2724 = vmatpush.msrb.mxu2 %v1874_v14  ;;  %2744 = vmatpush.msra.mxu3 %v1938_v27  ;;  %v1786_v43 = vld [vmem:[%s5051_s29 + $0x428] sm:$0xff] }
 0x3b3   : > { %2685 = vmatpush.msrb.mxu0 %v1742_v16  ;;  %2705 = vmatpush.msrb.mxu1 %v1806_v17  ;;  %v1850_v44 = vld [vmem:[%s5051_s29 + $0x628] sm:$0xff] }
 0x3b4   : > { %2725 = vmatpush.msrb.mxu2 %v1870_v18  ;;  %2745 = vmatpush.msra.mxu3 %v1934_v33  ;;  %v1926_v46 = vld [vmem:[%s5051_s29 + $0x888] sm:$0xff] }
 0x3b5   : > { %2686 = vmatpush.msrb.mxu0 %v1738_v20  ;;  %2706 = vmatpush.msrb.mxu1 %v1802_v21  ;;  %v1718_v47 = vld [vmem:[%s5051_s29 + $0x208] sm:$0xff] }
 0x3b6   : > { %2726 = vmatpush.msrb.mxu2 %v1866_v22  ;;  %2746 = vmatpush.msra.mxu3 %v1930_v41  ;;  %v1782_v48 = vld [vmem:[%s5051_s29 + $0x408] sm:$0xff] }
 0x3b7   : > { %2687 = vmatpush.msrb.mxu0 %v1734_v24  ;;  %2707 = vmatpush.msrb.mxu1 %v1798_v25  ;;  %v1846_v49 = vld [vmem:[%s5051_s29 + $0x608] sm:$0xff] }
 0x3b8   : > { %2727 = vmatpush.msrb.mxu2 %v1862_v26  ;;  %v1922_v51 = vld [vmem:[%s5051_s29 + $0x868] sm:$0xff]  ;;  %2747 = vmatpush.msra.mxu3 %v1926_v46 }
 0x3b9   : > { %2688 = vmatpush.msrb.mxu0 %v1730_v28  ;;  %2708 = vmatpush.msrb.mxu1 %v1794_v29  ;;  %v2034_v52 = vld [vmem:[%s5051_s29 + $0xbe8] sm:$0xff] }
 0x3ba   : > { %2728 = vmatpush.msrb.mxu2 %v1858_v30  ;;  %v2098_v53 = vld [vmem:[%s5051_s29 + $0xde8] sm:$0xff]  ;;  %2748 = vmatpush.msra.mxu3 %v1922_v51 }
 0x3bb   : > { %2689 = vmatpush.msrb.mxu0 %v1726_v34  ;;  %2709 = vmatpush.msrb.mxu1 %v1790_v35  ;;  %v2162_v54 = vld [vmem:[%s5051_s29 + $0xfe8] sm:$0xff] }
 0x3bc   : > { %2729 = vmatpush.msrb.mxu2 %v1854_v36  ;;  %v1918_v55 = vld [vmem:[%s5051_s29 + $0x848] sm:$0xff] }
 0x3bd   : > { %2690 = vmatpush.msrb.mxu0 %v1722_v42  ;;  %2710 = vmatpush.msrb.mxu1 %v1786_v43  ;;  %v2030_v56 = vld [vmem:[%s5051_s29 + $0xbc8] sm:$0xff] }
 0x3be   : > { %2730 = vmatpush.msrb.mxu2 %v1850_v44  ;;  %v2094_v57 = vld [vmem:[%s5051_s29 + $0xdc8] sm:$0xff]  ;;  %2749 = vmatpush.msra.mxu3 %v1918_v55 }
 0x3bf   : > { %2691 = vmatpush.msrb.mxu0 %v1718_v47  ;;  %2711 = vmatpush.msrb.mxu1 %v1782_v48  ;;  %v2158_v58 = vld [vmem:[%s5051_s29 + $0xfc8] sm:$0xff] }
 0x3c0   : > { %2731 = vmatpush.msrb.mxu2 %v1846_v49  ;;  %v1914_v59 = vld [vmem:[%s5051_s29 + $0x828] sm:$0xff]  ;;  %2692 = vmatmul.f32.vlgmr.msrb.gmra.mxu0 %v5174_v0 }
 0x3c1   : > { %2756 = vmatpush.msra.mxu0 %v2034_v52  ;;  %2776 = vmatpush.msra.mxu1 %v2098_v53  ;;  %v2026_v60 = vld [vmem:[%s5051_s29 + $0xba8] sm:$0xff] }
 0x3c2   : > { %2796 = vmatpush.msra.mxu2 %v2162_v54  ;;  %v2090_v1 = vld [vmem:[%s5051_s29 + $0xda8] sm:$0xff]  ;;  %2750 = vmatpush.msra.mxu3 %v1914_v59 }
 0x3c3   : > { %2757 = vmatpush.msra.mxu0 %v2030_v56  ;;  %v2154_v2 = vld [vmem:[%s5051_s29 + $0xfa8] sm:$0xff]  ;;  %2777 = vmatpush.msra.mxu1 %v2094_v57 }
 0x3c4   : > { %2797 = vmatpush.msra.mxu2 %v2158_v58  ;;  %v1910_v3 = vld [vmem:[%s5051_s29 + $0x808] sm:$0xff]  ;;  %2712 = vmatmul.f32.vlgmr.msrb.gmra.mxu1 %v5168_v61 }
 0x3c5   : > { %v2022_v4 = vld [vmem:[%s5051_s29 + $0xb88] sm:$0xff]  ;;  %2758 = vmatpush.msra.mxu0 %v2026_v60  ;;  %2778 = vmatpush.msra.mxu1 %v2090_v1 }
 0x3c6   : > { %v2086_v5 = vld [vmem:[%s5051_s29 + $0xd88] sm:$0xff]  ;;  %2798 = vmatpush.msra.mxu2 %v2154_v2  ;;  %2751 = vmatpush.msra.mxu3 %v1910_v3 }
 0x3c7   : > { %v2150_v6 = vld [vmem:[%s5051_s29 + $0xf88] sm:$0xff]  ;;  %2759 = vmatpush.msra.mxu0 %v2022_v4  ;;  %2779 = vmatpush.msra.mxu1 %v2086_v5 }
 0x3c8   : > { %v2018_v7 = vld [vmem:[%s5051_s29 + $0xb68] sm:$0xff]  ;;  %2799 = vmatpush.msra.mxu2 %v2150_v6  ;;  %2752 = vmatmul.f32.vlgmr.msra.gmra.mxu3 %v5228_v45 }
 0x3c9   : > { %v2226_v8 = vld [vmem:[%s5051_s29 + $0x11e8] sm:$0xff]  ;;  %2760 = vmatpush.msra.mxu0 %v2018_v7  ;;  %2732 = vmatmul.f32.vlgmr.msrb.gmra.mxu2 %v5170_v62 }
 0x3ca   : > { %v2082_v9 = vld [vmem:[%s5051_s29 + $0xd68] sm:$0xff]  ;;  %2816 = vmatpush.msrb.mxu3 %v2226_v8 }
 0x3cb   : > { %v2146_v10 = vld [vmem:[%s5051_s29 + $0xf68] sm:$0xff]  ;;  %2780 = vmatpush.msra.mxu1 %v2082_v9 }
 0x3cc   : > { %v2014_v11 = vld [vmem:[%s5051_s29 + $0xb48] sm:$0xff]  ;;  %2800 = vmatpush.msra.mxu2 %v2146_v10 }
 0x3cd   : > { %v2222_v12 = vld [vmem:[%s5051_s29 + $0x11c8] sm:$0xff]  ;;  %2761 = vmatpush.msra.mxu0 %v2014_v11 }
 0x3ce   : > { %v2078_v13 = vld [vmem:[%s5051_s29 + $0xd48] sm:$0xff]  ;;  %2817 = vmatpush.msrb.mxu3 %v2222_v12 }
 0x3cf   : > { %v2142_v14 = vld [vmem:[%s5051_s29 + $0xf48] sm:$0xff]  ;;  %2781 = vmatpush.msra.mxu1 %v2078_v13 }
 0x3d0   : > { %v2010_v15 = vld [vmem:[%s5051_s29 + $0xb28] sm:$0xff]  ;;  %2801 = vmatpush.msra.mxu2 %v2142_v14 }
 0x3d1   : > { %v2218_v16 = vld [vmem:[%s5051_s29 + $0x11a8] sm:$0xff]  ;;  %2762 = vmatpush.msra.mxu0 %v2010_v15  ;;  %v1715_v15 = vld [vmem:[%s5051_s29 + $0x1f0] sm:$0xff] }
 0x3d2   : > { %v2074_v17 = vld [vmem:[%s5051_s29 + $0xd28] sm:$0xff]  ;;  %2818 = vmatpush.msrb.mxu3 %v2218_v16 }
 0x3d3   : > { %v2138_v18 = vld [vmem:[%s5051_s29 + $0xf28] sm:$0xff]  ;;  %2782 = vmatpush.msra.mxu1 %v2074_v17 }
 0x3d4   : > { %v2006_v19 = vld [vmem:[%s5051_s29 + $0xb08] sm:$0xff]  ;;  %2802 = vmatpush.msra.mxu2 %v2138_v18  ;;  %v1711_v18 = vld [vmem:[%s5051_s29 + $0x1d0] sm:$0xff] }
 0x3d5   : > { %v2214_v20 = vld [vmem:[%s5051_s29 + $0x1188] sm:$0xff]  ;;  %2763 = vmatpush.msra.mxu0 %v2006_v19  ;;  %v1779_v19 = vld [vmem:[%s5051_s29 + $0x3f0] sm:$0xff] }
 0x3d6   : > { %v2070_v21 = vld [vmem:[%s5051_s29 + $0xd08] sm:$0xff]  ;;  %2819 = vmatpush.msrb.mxu3 %v2214_v20 }
 0x3d7   : > { %v2134_v22 = vld [vmem:[%s5051_s29 + $0xf08] sm:$0xff]  ;;  %2783 = vmatpush.msra.mxu1 %v2070_v21 }
 0x3d8   : > { %v2002_v23 = vld [vmem:[%s5051_s29 + $0xae8] sm:$0xff]  ;;  %2803 = vmatpush.msra.mxu2 %v2134_v22  ;;  %v1707_v22 = vld [vmem:[%s5051_s29 + $0x1b0] sm:$0xff] }
 0x3d9   : > { %v2210_v24 = vld [vmem:[%s5051_s29 + $0x1168] sm:$0xff]  ;;  %2764 = vmatpush.msra.mxu0 %v2002_v23  ;;  %v1775_v23 = vld [vmem:[%s5051_s29 + $0x3d0] sm:$0xff] }
 0x3da   : > { %v2066_v25 = vld [vmem:[%s5051_s29 + $0xce8] sm:$0xff]  ;;  %2820 = vmatpush.msrb.mxu3 %v2210_v24 }
 0x3db   : > { %v2130_v26 = vld [vmem:[%s5051_s29 + $0xee8] sm:$0xff]  ;;  %2784 = vmatpush.msra.mxu1 %v2066_v25 }
 0x3dc   : > { %v2206_v27 = vld [vmem:[%s5051_s29 + $0x1148] sm:$0xff]  ;;  %2804 = vmatpush.msra.mxu2 %v2130_v26  ;;  %v1771_v26 = vld [vmem:[%s5051_s29 + $0x3b0] sm:$0xff] }
 0x3dd   : > { %v1998_v28 = vld [vmem:[%s5051_s29 + $0xac8] sm:$0xff]  ;;  %2821 = vmatpush.msrb.mxu3 %v2206_v27 }
 0x3de   : > { %v2062_v29 = vld [vmem:[%s5051_s29 + $0xcc8] sm:$0xff]  ;;  %2765 = vmatpush.msra.mxu0 %v1998_v28 }
 0x3df   : > { %v2126_v30 = vld [vmem:[%s5051_s29 + $0xec8] sm:$0xff]  ;;  %2785 = vmatpush.msra.mxu1 %v2062_v29  ;;  %v1699_v29 = vld [vmem:[%s5051_s29 + $0x170] sm:$0xff] }
 0x3e0   : > { %v2202_v33 = vld [vmem:[%s5051_s29 + $0x1128] sm:$0xff]  ;;  %2805 = vmatpush.msra.mxu2 %v2126_v30  ;;  %v1767_v30 = vld [vmem:[%s5051_s29 + $0x390] sm:$0xff] }
 0x3e1   : > { %v1994_v34 = vld [vmem:[%s5051_s29 + $0xaa8] sm:$0xff]  ;;  %2822 = vmatpush.msrb.mxu3 %v2202_v33 }
 0x3e2   : > { %v2058_v35 = vld [vmem:[%s5051_s29 + $0xca8] sm:$0xff]  ;;  %2766 = vmatpush.msra.mxu0 %v1994_v34 }
 0x3e3   : > { %v2122_v36 = vld [vmem:[%s5051_s29 + $0xea8] sm:$0xff]  ;;  %2786 = vmatpush.msra.mxu1 %v2058_v35  ;;  %v2373_v35 = vld [vmem:[%s5466_s12] sm:$0xf] }
 0x3e4   : > { %v2198_v41 = vld [vmem:[%s5051_s29 + $0x1108] sm:$0xff]  ;;  %2806 = vmatpush.msra.mxu2 %v2122_v36  ;;  %v1695_v36 = vld [vmem:[%s5051_s29 + $0x150] sm:$0xff] }
 0x3e5   : > { %v1990_v42 = vld [vmem:[%s5051_s29 + $0xa88] sm:$0xff]  ;;  %2823 = vmatpush.msrb.mxu3 %v2198_v41  ;;  %v1763_v41 = vld [vmem:[%s5051_s29 + $0x370] sm:$0xff] }
 0x3e6   : > { %v2054_v45 = vld [vmem:[%s5051_s29 + $0xc88] sm:$0xff]  ;;  %2767 = vmatpush.msra.mxu0 %v1990_v42 }
 0x3e7   : > { %v2118_v43 = vld [vmem:[%s5051_s29 + $0xe88] sm:$0xff]  ;;  %2787 = vmatpush.msra.mxu1 %v2054_v45 }
 0x3e8   : > { %v2194_v44 = vld [vmem:[%s5051_s29 + $0x10e8] sm:$0xff]  ;;  %2807 = vmatpush.msra.mxu2 %v2118_v43  ;;  %v1691_v43 = vld [vmem:[%s5051_s29 + $0x130] sm:$0xff] }
 0x3e9   : > { %v1986_v46 = vld [vmem:[%s5051_s29 + $0xa68] sm:$0xff]  ;;  %2824 = vmatpush.msrb.mxu3 %v2194_v44  ;;  %v1759_v44 = vld [vmem:[%s5051_s29 + $0x350] sm:$0xff] }
 0x3ea   : > { %v2050_v47 = vld [vmem:[%s5051_s29 + $0xc68] sm:$0xff]  ;;  %2768 = vmatpush.msra.mxu0 %v1986_v46  ;;  %v2375_v46 = vperm.slane %v2373_v35, 0  ;;  %v1895_v35 = vld [vmem:[%s5051_s29 + $0x790] sm:$0xff] }
 0x3eb   : > { %v2114_v48 = vld [vmem:[%s5051_s29 + $0xe68] sm:$0xff]  ;;  %2788 = vmatpush.msra.mxu1 %v2050_v47 }
 0x3ec   : > { %v2190_v49 = vld [vmem:[%s5051_s29 + $0x10c8] sm:$0xff]  ;;  %2808 = vmatpush.msra.mxu2 %v2114_v48 }
 0x3ed   : > { %v1982_v51 = vld [vmem:[%s5051_s29 + $0xa48] sm:$0xff]  ;;  %2825 = vmatpush.msrb.mxu3 %v2190_v49  ;;  %v1687_v49 = vld [vmem:[%s5051_s29 + $0x110] sm:$0xff] }
 0x3ee   : > { %v2046_v52 = vld [vmem:[%s5051_s29 + $0xc48] sm:$0xff]  ;;  %2769 = vmatpush.msra.mxu0 %v1982_v51  ;;  %v1755_v51 = vld [vmem:[%s5051_s29 + $0x330] sm:$0xff] }
 0x3ef   : > { %v2110_v53 = vld [vmem:[%s5051_s29 + $0xe48] sm:$0xff]  ;;  %2789 = vmatpush.msra.mxu1 %v2046_v52 }
 0x3f0   : > { %v2186_v54 = vld [vmem:[%s5051_s29 + $0x10a8] sm:$0xff]  ;;  %2809 = vmatpush.msra.mxu2 %v2110_v53 }
 0x3f1   : > { %v1978_v55 = vld [vmem:[%s5051_s29 + $0xa28] sm:$0xff]  ;;  %2826 = vmatpush.msrb.mxu3 %v2186_v54  ;;  %v2433_v54 = vpop.f32.mrf.mxu0 }
 0x3f2   : > { %v2042_v56 = vld [vmem:[%s5051_s29 + $0xc28] sm:$0xff]  ;;  %2770 = vmatpush.msra.mxu0 %v1978_v55  ;;  %v2453_v55 = vpop.f32.mrf.mxu1 }
 0x3f3   : > { %v2106_v57 = vld [vmem:[%s5051_s29 + $0xe28] sm:$0xff]  ;;  %2790 = vmatpush.msra.mxu1 %v2042_v56  ;;  %v1683_v56 = vld [vmem:[%s5051_s29 + $0xf0] sm:$0xff] }
 0x3f4   : > { %v2182_v58 = vld [vmem:[%s5051_s29 + $0x1088] sm:$0xff]  ;;  %2810 = vmatpush.msra.mxu2 %v2106_v57  ;;  %v1751_v57 = vld [vmem:[%s5051_s29 + $0x310] sm:$0xff] }
 0x3f5   : > { %v1974_v59 = vld [vmem:[%s5051_s29 + $0xa08] sm:$0xff]  ;;  %2827 = vmatpush.msrb.mxu3 %v2182_v58  ;;  %v2434_v58 = vadd.f32 %v2433_v54, %v2375_v46  ;;  %v2035_v46 = vld [vmem:[%s5051_s29 + $0xbf0] sm:$0xff] }
 0x3f6   : > { %v2038_v60 = vld [vmem:[%s5051_s29 + $0xc08] sm:$0xff]  ;;  %2771 = vmatpush.msra.mxu0 %v1974_v59  ;;  %v1959_v54 = vld [vmem:[%s5051_s29 + $0x990] sm:$0xff] }
 0x3f7   : > { %v2102_v1 = vld [vmem:[%s5051_s29 + $0xe08] sm:$0xff]  ;;  %2791 = vmatpush.msra.mxu1 %v2038_v60  ;;  %2772 = vmatmul.f32.vlgmr.msra.gmra.mxu0 %v5234_v50 }
 0x3f8   : > { %v2178_v2 = vld [vmem:[%s5051_s29 + $0x1068] sm:$0xff]  ;;  %2811 = vmatpush.msra.mxu2 %v2102_v1  ;;  %2792 = vmatmul.f32.vlgmr.msra.gmra.mxu1 %v5218_v39  ;;  %v1679_v1 = vld [vmem:[%s5051_s29 + $0xd0] sm:$0xff] }
 0x3f9   : > { %v2290_v3 = vld [vmem:[%s5051_s29 + $0x13e8] sm:$0xff]  ;;  %2812 = vmatmul.f32.vlgmr.msra.gmra.mxu2 %v5220_v40  ;;  %2828 = vmatpush.msrb.mxu3 %v2178_v2  ;;  %v1747_v2 = vld [vmem:[%s5051_s29 + $0x2f0] sm:$0xff] }
 0x3fa   : > { %v2354_v4 = vld [vmem:[%s5051_s29 + $0x15e8] sm:$0xff]  ;;  %2836 = vmatpush.msrb.mxu0 %v2290_v3  ;;  %v2454_v3 = vadd.f32 %v2453_v55, %v2434_v58  ;;  %v2027_v55 = vld [vmem:[%s5051_s29 + $0xbb0] sm:$0xff] }
 0x3fb   : > { %v2370_v5 = vld [vmem:[%s5051_s29 + $0x1668] sm:$0xff]  ;;  %2856 = vmatpush.msrb.mxu1 %v2354_v4  ;;  %v2473_v4 = vpop.f32.mrf.mxu2  ;;  %v1955_v58 = vld [vmem:[%s5051_s29 + $0x970] sm:$0xff] }
 0x3fc   : > { %v2174_v6 = vld [vmem:[%s5051_s29 + $0x1048] sm:$0xff]  ;;  %2888 = vmatpush.msrb.mxu2 %v2370_v5 }
 0x3fd   : > { %v2286_v7 = vld [vmem:[%s5051_s29 + $0x13c8] sm:$0xff]  ;;  %2829 = vmatpush.msrb.mxu3 %v2174_v6 }
 0x3fe   : > { %v2350_v8 = vld [vmem:[%s5051_s29 + $0x15c8] sm:$0xff]  ;;  %2837 = vmatpush.msrb.mxu0 %v2286_v7  ;;  %v2493_v7 = vpop.f32.mrf.mxu3 }
 0x3ff   : > { %v2366_v9 = vld [vmem:[%s5051_s29 + $0x1648] sm:$0xff]  ;;  %2857 = vmatpush.msrb.mxu1 %v2350_v8  ;;  %v1675_v8 = vld [vmem:[%s5051_s29 + $0xb0] sm:$0xff] }
 0x400   : > { %v2170_v50 = vld [vmem:[%s5051_s29 + $0x1028] sm:$0xff]  ;;  %2889 = vmatpush.msrb.mxu2 %v2366_v9  ;;  %v1743_v9 = vld [vmem:[%s5051_s29 + $0x2d0] sm:$0xff] }
 0x401   : > { %v2282_v10 = vld [vmem:[%s5051_s29 + $0x13a8] sm:$0xff]  ;;  %2830 = vmatpush.msrb.mxu3 %v2170_v50  ;;  %v2474_v50 = vadd.f32 %v2473_v4, %v2454_v3  ;;  %v2019_v3 = vld [vmem:[%s5051_s29 + $0xb70] sm:$0xff] }
 0x402   : > { %v2346_v40 = vld [vmem:[%s5051_s29 + $0x15a8] sm:$0xff]  ;;  %2838 = vmatpush.msrb.mxu0 %v2282_v10  ;;  %v1807_v4 = vld [vmem:[%s5051_s29 + $0x4d0] sm:$0xff] }
 0x403   : > { %v2362_v11 = vld [vmem:[%s5051_s29 + $0x1628] sm:$0xff]  ;;  %2858 = vmatpush.msrb.mxu1 %v2346_v40 }
 0x404   : > { %v2166_v12 = vld [vmem:[%s5051_s29 + $0x1008] sm:$0xff]  ;;  %2890 = vmatpush.msrb.mxu2 %v2362_v11  ;;  %v1739_v11 = vld [vmem:[%s5051_s29 + $0x2b0] sm:$0xff] }
 0x405   : > { %v2278_v13 = vld [vmem:[%s5051_s29 + $0x1388] sm:$0xff]  ;;  %2831 = vmatpush.msrb.mxu3 %v2166_v12  ;;  %v2494_v12 = vadd.f32 %v2493_v7, %v2474_v50  ;;  %v2015_v7 = vld [vmem:[%s5051_s29 + $0xb50] sm:$0xff] }
 0x406   : > { %v2342_v14 = vld [vmem:[%s5051_s29 + $0x1588] sm:$0xff]  ;;  %2839 = vmatpush.msrb.mxu0 %v2278_v13  ;;  %2832 = vmatmul.f32.vlgmr.msrb.gmra.mxu3 %v5278_v31  ;;  %v1703_v31 = vld [vmem:[%s5051_s29 + $0x190] sm:$0xff] }
 0x407   : > { %v2358_v39 = vld [vmem:[%s5051_s29 + $0x1608] sm:$0xff]  ;;  %2859 = vmatpush.msrb.mxu1 %v2342_v14  ;;  %2916 = vmatpush.msra.mxu3 %v1779_v19  ;;  %v1671_v13 = vld [vmem:[%s5051_s29 + $0x90] sm:$0xff] }
 0x408   : > { %v2274_v16 = vld [vmem:[%s5051_s29 + $0x1368] sm:$0xff]  ;;  %2891 = vmatpush.msrb.mxu2 %v2358_v39  ;;  %v1663_v19 = vld [vmem:[%s5051_s29 + $0x50] sm:$0xff] }
 0x409   : > { %v2338_v17 = vld [vmem:[%s5051_s29 + $0x1568] sm:$0xff]  ;;  %2840 = vmatpush.msrb.mxu0 %v2274_v16  ;;  %2917 = vmatpush.msra.mxu3 %v1775_v23  ;;  %v1735_v16 = vld [vmem:[%s5051_s29 + $0x290] sm:$0xff] }
 0x40a   : > { %2896 = vmatpush.msra.mxu2 %v1715_v15  ;;  %v2270_v20 = vld [vmem:[%s5051_s29 + $0x1348] sm:$0xff]  ;;  %2860 = vmatpush.msrb.mxu1 %v2338_v17  ;;  %v1667_v15 = vld [vmem:[%s5051_s29 + $0x70] sm:$0xff] }
 0x40b   : > { %v2334_v21 = vld [vmem:[%s5051_s29 + $0x1548] sm:$0xff]  ;;  %2841 = vmatpush.msrb.mxu0 %v2270_v20  ;;  %2918 = vmatpush.msra.mxu3 %v1771_v26  ;;  %v1843_v17 = vld [vmem:[%s5051_s29 + $0x5f0] sm:$0xff]  ;;  %v2513_v20 = vpop.f32.mrf.mxu0 }
 0x40c   : > { %2897 = vmatpush.msra.mxu2 %v1711_v18  ;;  %v2266_v24 = vld [vmem:[%s5051_s29 + $0x1328] sm:$0xff]  ;;  %2861 = vmatpush.msrb.mxu1 %v2334_v21  ;;  %v1907_v18 = vld [vmem:[%s5051_s29 + $0x7f0] sm:$0xff] }
 0x40d   : > { %v2330_v25 = vld [vmem:[%s5051_s29 + $0x1528] sm:$0xff]  ;;  %2842 = vmatpush.msrb.mxu0 %v2266_v24  ;;  %2919 = vmatpush.msra.mxu3 %v1767_v30  ;;  %v1731_v21 = vld [vmem:[%s5051_s29 + $0x270] sm:$0xff]  ;;  %v2573_v30 = vpop.f32.mrf.mxu3 }
 0x40e   : > { %2898 = vmatpush.msra.mxu2 %v1707_v22  ;;  %v2262_v27 = vld [vmem:[%s5051_s29 + $0x1308] sm:$0xff]  ;;  %2862 = vmatpush.msrb.mxu1 %v2330_v25  ;;  %v2514_v22 = vadd.f32 %v2513_v20, %v2494_v12  ;;  %v1903_v23 = vld [vmem:[%s5051_s29 + $0x7d0] sm:$0xff]  ;;  %v2533_v25 = vpop.f32.mrf.mxu1 }
 0x40f   : > { %v2326_v28 = vld [vmem:[%s5051_s29 + $0x1508] sm:$0xff]  ;;  %2843 = vmatpush.msrb.mxu0 %v2262_v27  ;;  %2920 = vmatpush.msra.mxu3 %v1763_v41  ;;  %v1659_v24 = vld [vmem:[%s5051_s29 + $0x30] sm:$0xff]  ;;  %v2553_v27 = vpop.f32.mrf.mxu2 }
 0x410   : > { %2899 = vmatpush.msra.mxu2 %v1703_v31  ;;  %v2258_v33 = vld [vmem:[%s5051_s29 + $0x12e8] sm:$0xff]  ;;  %2863 = vmatpush.msrb.mxu1 %v2326_v28  ;;  %v1835_v31 = vld [vmem:[%s5051_s29 + $0x5b0] sm:$0xff]  ;;  %v2534_v26 = vadd.f32 %v2533_v25, %v2514_v22 }
 0x411   : > { %v2322_v34 = vld [vmem:[%s5051_s29 + $0x14e8] sm:$0xff]  ;;  %2844 = vmatpush.msrb.mxu0 %v2258_v33  ;;  %2921 = vmatpush.msra.mxu3 %v1759_v44  ;;  %v1899_v28 = vld [vmem:[%s5051_s29 + $0x7b0] sm:$0xff] }
 0x412   : > { %2900 = vmatpush.msra.mxu2 %v1699_v29  ;;  %v2254_v42 = vld [vmem:[%s5051_s29 + $0x12c8] sm:$0xff]  ;;  %2864 = vmatpush.msrb.mxu1 %v2322_v34  ;;  %v1655_v29 = vld [vmem:[%s5051_s29 + $0x10] sm:$0xff]  ;;  %v2554_v34 = vadd.f32 %v2553_v27, %v2534_v26 }
 0x413   : > { %v2318_v45 = vld [vmem:[%s5051_s29 + $0x14c8] sm:$0xff]  ;;  %2845 = vmatpush.msrb.mxu0 %v2254_v42  ;;  %2922 = vmatpush.msra.mxu3 %v1755_v51  ;;  %v1723_v33 = vld [vmem:[%s5051_s29 + $0x230] sm:$0xff] }
 0x414   : > { %2901 = vmatpush.msra.mxu2 %v1695_v36  ;;  %v2250_v47 = vld [vmem:[%s5051_s29 + $0x12a8] sm:$0xff]  ;;  %2865 = vmatpush.msrb.mxu1 %v2318_v45  ;;  %v1971_v36 = vld [vmem:[%s5051_s29 + $0x9f0] sm:$0xff]  ;;  %v5526_v45 = vadd.f32 %v2573_v30, %v2554_v34 }
 0x415   : > { %v2314_v48 = vld [vmem:[%s5051_s29 + $0x14a8] sm:$0xff]  ;;  %2846 = vmatpush.msrb.mxu0 %v2250_v47  ;;  %2923 = vmatpush.msra.mxu3 %v1751_v57  ;;  %v1719_v41 = vld [vmem:[%s5051_s29 + $0x210] sm:$0xff] }
 0x416   : > { %2902 = vmatpush.msra.mxu2 %v1691_v43  ;;  %v2246_v52 = vld [vmem:[%s5051_s29 + $0x1288] sm:$0xff]  ;;  %2866 = vmatpush.msrb.mxu1 %v2314_v48  ;;  %v1827_v42 = vld [vmem:[%s5051_s29 + $0x570] sm:$0xff] }
 0x417   : > { %v2310_v53 = vld [vmem:[%s5051_s29 + $0x1488] sm:$0xff]  ;;  %2847 = vmatpush.msrb.mxu0 %v2246_v52  ;;  %2924 = vmatpush.msra.mxu3 %v1747_v2  ;;  %v1891_v43 = vld [vmem:[%s5051_s29 + $0x770] sm:$0xff] }
 0x418   : > { %2903 = vmatpush.msra.mxu2 %v1687_v49  ;;  %v2242_v59 = vld [vmem:[%s5051_s29 + $0x1268] sm:$0xff]  ;;  %2867 = vmatpush.msrb.mxu1 %v2310_v53  ;;  %v1967_v44 = vld [vmem:[%s5051_s29 + $0x9d0] sm:$0xff] }
 0x419   : > { %v2306_v60 = vld [vmem:[%s5051_s29 + $0x1468] sm:$0xff]  ;;  %2848 = vmatpush.msrb.mxu0 %v2242_v59  ;;  %2925 = vmatpush.msra.mxu3 %v1743_v9  ;;  %v1823_v47 = vld [vmem:[%s5051_s29 + $0x550] sm:$0xff] }
 0x41a   : > { %2904 = vmatpush.msra.mxu2 %v1683_v56  ;;  %v2238_v5 = vld [vmem:[%s5051_s29 + $0x1248] sm:$0xff]  ;;  %2868 = vmatpush.msrb.mxu1 %v2306_v60  ;;  %v1887_v48 = vld [vmem:[%s5051_s29 + $0x750] sm:$0xff] }
 0x41b   : > { %v2302_v6 = vld [vmem:[%s5051_s29 + $0x1448] sm:$0xff]  ;;  %2849 = vmatpush.msrb.mxu0 %v2238_v5  ;;  %3485 = vmatmul.msk.f32.vlgmr.msrb.gmra.mxu2 %vm2413_vm0, %v5290_v38  ;;  %v1839_v38 = vld [vmem:[%s5051_s29 + $0x5d0] sm:$0xff] }
 0x41c   : > { %2905 = vmatpush.msra.mxu2 %v1679_v1  ;;  %v2234_v10 = vld [vmem:[%s5051_s29 + $0x1228] sm:$0xff]  ;;  %2869 = vmatpush.msrb.mxu1 %v2302_v6  ;;  %v1963_v49 = vld [vmem:[%s5051_s29 + $0x9b0] sm:$0xff] }
 0x41d   : > { %v2298_v40 = vld [vmem:[%s5051_s29 + $0x1428] sm:$0xff]  ;;  %2850 = vmatpush.msrb.mxu0 %v2234_v10  ;;  %2926 = vmatpush.msra.mxu3 %v1739_v11  ;;  %v2031_v51 = vld [vmem:[%s5051_s29 + $0xbd0] sm:$0xff] }
 0x41e   : > { %2906 = vmatpush.msra.mxu2 %v1675_v8  ;;  %v2230_v14 = vld [vmem:[%s5051_s29 + $0x1208] sm:$0xff]  ;;  %2870 = vmatpush.msrb.mxu1 %v2298_v40  ;;  %v1819_v52 = vld [vmem:[%s5051_s29 + $0x530] sm:$0xff] }
 0x41f   : > { %v2294_v39 = vld [vmem:[%s5051_s29 + $0x1408] sm:$0xff]  ;;  %2851 = vmatpush.msrb.mxu0 %v2230_v14  ;;  %2927 = vmatpush.msra.mxu3 %v1735_v16  ;;  %v1883_v53 = vld [vmem:[%s5051_s29 + $0x730] sm:$0xff] }
 0x420   : > { %2907 = vmatpush.msra.mxu2 %v1671_v13  ;;  %2871 = vmatpush.msrb.mxu1 %v2294_v39  ;;  %v1815_v56 = vld [vmem:[%s5051_s29 + $0x510] sm:$0xff]  ;;  %v2593_v39 = vpop.f32.mrf.mxu0 }
 0x421   : > { %2852 = vmatmul.f32.vlgmr.msrb.gmra.mxu0 %v5286_v37  ;;  %2872 = vmatmul.f32.vlgmr.msrb.gmra.mxu1 %v5280_v32  ;;  %v1727_v37 = vld [vmem:[%s5051_s29 + $0x250] sm:$0xff] }
 0x422   : > { %2908 = vmatpush.msra.mxu2 %v1667_v15  ;;  %2936 = vmatpush.msra.mxu0 %v1843_v17  ;;  %v1831_v32 = vld [vmem:[%s5051_s29 + $0x590] sm:$0xff]  ;;  %v2594_v17 = vadd.f32 %v2593_v39, %v5526_v45 }
 0x423   : > { %2956 = vmatpush.msra.mxu1 %v1907_v18  ;;  %2928 = vmatpush.msra.mxu3 %v1731_v21  ;;  %v1879_v57 = vld [vmem:[%s5051_s29 + $0x710] sm:$0xff] }
 0x424   : > { %2909 = vmatpush.msra.mxu2 %v1663_v19  ;;  %2937 = vmatpush.msra.mxu0 %v1839_v38  ;;  %v2023_v59 = vld [vmem:[%s5051_s29 + $0xb90] sm:$0xff]  ;;  %v2613_v38 = vpop.f32.mrf.mxu1  ;;  %v2633_v27 = vpop.f32.mrf.mxu2 }
 0x425   : > { %2957 = vmatpush.msra.mxu1 %v1903_v23  ;;  %2929 = vmatpush.msra.mxu3 %v1727_v37  ;;  %v1811_v60 = vld [vmem:[%s5051_s29 + $0x4f0] sm:$0xff] }
 0x426   : > { %2910 = vmatpush.msra.mxu2 %v1659_v24  ;;  %2938 = vmatpush.msra.mxu0 %v1835_v31  ;;  %v1875_v1 = vld [vmem:[%s5051_s29 + $0x6f0] sm:$0xff]  ;;  %v2614_v24 = vadd.f32 %v2613_v38, %v2594_v17 }
 0x427   : > { %2958 = vmatpush.msra.mxu1 %v1899_v28  ;;  %2930 = vmatpush.msra.mxu3 %v1723_v33  ;;  %v1951_v2 = vld [vmem:[%s5051_s29 + $0x950] sm:$0xff] }
 0x428   : > { %2911 = vmatpush.msra.mxu2 %v1655_v29  ;;  %2939 = vmatpush.msra.mxu0 %v1831_v32  ;;  %v1871_v5 = vld [vmem:[%s5051_s29 + $0x6d0] sm:$0xff]  ;;  %v2634_v30 = vadd.f32 %v2633_v27, %v2614_v24 }
 0x429   : > { %2959 = vmatpush.msra.mxu1 %v1895_v35  ;;  %2931 = vmatpush.msra.mxu3 %v1719_v41  ;;  %v1947_v6 = vld [vmem:[%s5051_s29 + $0x930] sm:$0xff] }
 0x42a   : > { %2976 = vmatpush.msrb.mxu2 %v1971_v36  ;;  %2940 = vmatpush.msra.mxu0 %v1827_v42  ;;  %v1803_v8 = vld [vmem:[%s5051_s29 + $0x4b0] sm:$0xff]  ;;  %v2653_v36 = vpop.f32.mrf.mxu3 }
 0x42b   : > { %2960 = vmatpush.msra.mxu1 %v1891_v43  ;;  %2996 = vmatpush.msrb.mxu3 %v2035_v46  ;;  %v1867_v9 = vld [vmem:[%s5051_s29 + $0x6b0] sm:$0xff]  ;;  %v5581_v45 = vadd.f32 %v2653_v36, %v2634_v30 }
 0x42c   : > { %2977 = vmatpush.msrb.mxu2 %v1967_v44  ;;  %2941 = vmatpush.msra.mxu0 %v1823_v47  ;;  %v1943_v50 = vld [vmem:[%s5051_s29 + $0x910] sm:$0xff] }
 0x42d   : > { %2961 = vmatpush.msra.mxu1 %v1887_v48  ;;  %2997 = vmatpush.msrb.mxu3 %v2031_v51  ;;  %v2011_v10 = vld [vmem:[%s5051_s29 + $0xb30] sm:$0xff] }
 0x42e   : > { %2978 = vmatpush.msrb.mxu2 %v1963_v49  ;;  %2942 = vmatpush.msra.mxu0 %v1819_v52  ;;  %v1799_v40 = vld [vmem:[%s5051_s29 + $0x490] sm:$0xff] }
 0x42f   : > { %2962 = vmatpush.msra.mxu1 %v1883_v53  ;;  %2998 = vmatpush.msrb.mxu3 %v2027_v55  ;;  %v1863_v11 = vld [vmem:[%s5051_s29 + $0x690] sm:$0xff] }
 0x430   : > { %2979 = vmatpush.msrb.mxu2 %v1959_v54  ;;  %2943 = vmatpush.msra.mxu0 %v1815_v56  ;;  %v1939_v12 = vld [vmem:[%s5051_s29 + $0x8f0] sm:$0xff] }
 0x431   : > { %2963 = vmatpush.msra.mxu1 %v1879_v57  ;;  %2999 = vmatpush.msrb.mxu3 %v2023_v59  ;;  %v2007_v13 = vld [vmem:[%s5051_s29 + $0xb10] sm:$0xff] }
 0x432   : > { %2980 = vmatpush.msrb.mxu2 %v1955_v58  ;;  %2944 = vmatpush.msra.mxu0 %v1811_v60  ;;  %v1795_v14 = vld [vmem:[%s5051_s29 + $0x470] sm:$0xff] }
 0x433   : > { %2964 = vmatpush.msra.mxu1 %v1875_v1  ;;  %3000 = vmatpush.msrb.mxu3 %v2019_v3  ;;  %v1859_v15 = vld [vmem:[%s5051_s29 + $0x670] sm:$0xff] }
 0x434   : > { %2981 = vmatpush.msrb.mxu2 %v1951_v2  ;;  %2945 = vmatpush.msra.mxu0 %v1807_v4  ;;  %v1935_v16 = vld [vmem:[%s5051_s29 + $0x8d0] sm:$0xff] }
 0x435   : > { %2965 = vmatpush.msra.mxu1 %v1871_v5  ;;  %3001 = vmatpush.msrb.mxu3 %v2015_v7  ;;  %v2003_v18 = vld [vmem:[%s5051_s29 + $0xaf0] sm:$0xff] }
 0x436   : > { %2982 = vmatpush.msrb.mxu2 %v1947_v6  ;;  %2946 = vmatpush.msra.mxu0 %v1803_v8  ;;  %v1791_v19 = vld [vmem:[%s5051_s29 + $0x450] sm:$0xff] }
 0x437   : > { %2966 = vmatpush.msra.mxu1 %v1867_v9  ;;  %3002 = vmatpush.msrb.mxu3 %v2011_v10  ;;  %v1855_v20 = vld [vmem:[%s5051_s29 + $0x650] sm:$0xff] }
 0x438   : > { %2983 = vmatpush.msrb.mxu2 %v1943_v50  ;;  %2947 = vmatpush.msra.mxu0 %v1799_v40  ;;  %v1931_v21 = vld [vmem:[%s5051_s29 + $0x8b0] sm:$0xff] }
 0x439   : > { %2967 = vmatpush.msra.mxu1 %v1863_v11  ;;  %3003 = vmatpush.msrb.mxu3 %v2007_v13  ;;  %v1999_v22 = vld [vmem:[%s5051_s29 + $0xad0] sm:$0xff] }
 0x43a   : > { %2984 = vmatpush.msrb.mxu2 %v1939_v12  ;;  %2948 = vmatpush.msra.mxu0 %v1795_v14  ;;  %v1787_v23 = vld [vmem:[%s5051_s29 + $0x430] sm:$0xff]  ;;  %v5614_v12 = vld.sshfl [vmem:[#allocation1 + $0x20] sm:$0xff pattern:$0x73625140] }
 0x43b   : > { %2968 = vmatpush.msra.mxu1 %v1859_v15  ;;  %3004 = vmatpush.msrb.mxu3 %v2003_v18  ;;  %v1851_v25 = vld [vmem:[%s5051_s29 + $0x630] sm:$0xff] }
 0x43c   : > { %2985 = vmatpush.msrb.mxu2 %v1935_v16  ;;  %2949 = vmatpush.msra.mxu0 %v1791_v19  ;;  %v1927_v37 = vld [vmem:[%s5051_s29 + $0x890] sm:$0xff]  ;;  %v5622_v16 = vld.sshfl [vmem:[#allocation1 + $0x28] sm:$0xff pattern:$0x73625140] }
 0x43d   : > { %2969 = vmatpush.msra.mxu1 %v1855_v20  ;;  %v1995_v31 = vld [vmem:[%s5051_s29 + $0xab0] sm:$0xff]  ;;  %3005 = vmatpush.msrb.mxu3 %v1999_v22 }
 0x43e   : > { %2986 = vmatpush.msrb.mxu2 %v1931_v21  ;;  %v1783_v26 = vld [vmem:[%s5051_s29 + $0x410] sm:$0xff]  ;;  %2950 = vmatpush.msra.mxu0 %v1787_v23 }
 0x43f   : > { %v1847_v28 = vld [vmem:[%s5051_s29 + $0x610] sm:$0xff]  ;;  %2970 = vmatpush.msra.mxu1 %v1851_v25  ;;  %3006 = vmatpush.msrb.mxu3 %v1995_v31 }
 0x440   : > { %v1923_v29 = vld [vmem:[%s5051_s29 + $0x870] sm:$0xff]  ;;  %2987 = vmatpush.msrb.mxu2 %v1927_v37  ;;  %2951 = vmatpush.msra.mxu0 %v1783_v26 }
 0x441   : > { %v1991_v33 = vld [vmem:[%s5051_s29 + $0xa90] sm:$0xff]  ;;  %2971 = vmatpush.msra.mxu1 %v1847_v28  ;;  %2912 = vmatmul.f32.vlgmr.msra.gmra.mxu2 %v5172_v63 }
 0x442   : > { %v2099_v32 = vld [vmem:[%s5051_s29 + $0xdf0] sm:$0xff]  ;;  %2988 = vmatpush.msrb.mxu2 %v1923_v29  ;;  %3007 = vmatpush.msrb.mxu3 %v1991_v33 }
 0x443   : > { %v2163_v34 = vld [vmem:[%s5051_s29 + $0xff0] sm:$0xff]  ;;  %3016 = vmatpush.msrb.mxu0 %v2099_v32  ;;  %2932 = vmatmul.f32.vlgmr.msra.gmra.mxu3 %v5174_v0 }
 0x444   : > { %v1919_v35 = vld [vmem:[%s5051_s29 + $0x850] sm:$0xff]  ;;  %3036 = vmatpush.msrb.mxu1 %v2163_v34  ;;  %2952 = vmatmul.f32.vlgmr.msra.gmra.mxu0 %v5168_v61 }
 0x445   : > { %v1987_v41 = vld [vmem:[%s5051_s29 + $0xa70] sm:$0xff]  ;;  %2989 = vmatpush.msrb.mxu2 %v1919_v35  ;;  %2972 = vmatmul.f32.vlgmr.msra.gmra.mxu1 %v5170_v62 }
 0x446   : > { %v2095_v42 = vld [vmem:[%s5051_s29 + $0xdd0] sm:$0xff]  ;;  %3008 = vmatpush.msrb.mxu3 %v1987_v41 }
 0x447   : > { %v2159_v43 = vld [vmem:[%s5051_s29 + $0xfd0] sm:$0xff]  ;;  %3017 = vmatpush.msrb.mxu0 %v2095_v42 }
 0x448   : > { %v1915_v44 = vld [vmem:[%s5051_s29 + $0x830] sm:$0xff]  ;;  %3037 = vmatpush.msrb.mxu1 %v2159_v43 }
 0x449   : > { %v1983_v46 = vld [vmem:[%s5051_s29 + $0xa50] sm:$0xff]  ;;  %2990 = vmatpush.msrb.mxu2 %v1915_v44 }
 0x44a   : > { %v2091_v47 = vld [vmem:[%s5051_s29 + $0xdb0] sm:$0xff]  ;;  %3009 = vmatpush.msrb.mxu3 %v1983_v46 }
 0x44b   : > { %v2155_v48 = vld [vmem:[%s5051_s29 + $0xfb0] sm:$0xff]  ;;  %3018 = vmatpush.msrb.mxu0 %v2091_v47 }
 0x44c   : > { %v1911_v49 = vld [vmem:[%s5051_s29 + $0x810] sm:$0xff]  ;;  %3038 = vmatpush.msrb.mxu1 %v2155_v48  ;;  %v5654_v48 = vld.sshfl [vmem:[#allocation1 + $0x30] sm:$0xff pattern:$0x73625140] }
 0x44d   : > { %v1979_v51 = vld [vmem:[%s5051_s29 + $0xa30] sm:$0xff]  ;;  %2991 = vmatpush.msrb.mxu2 %v1911_v49 }
 0x44e   : > { %v2087_v52 = vld [vmem:[%s5051_s29 + $0xd90] sm:$0xff]  ;;  %3010 = vmatpush.msrb.mxu3 %v1979_v51  ;;  %2992 = vmatmul.f32.vlgmr.msrb.gmra.mxu2 %v5614_v12 }
 0x44f   : > { %v2151_v53 = vld [vmem:[%s5051_s29 + $0xf90] sm:$0xff]  ;;  %3019 = vmatpush.msrb.mxu0 %v2087_v52 }
 0x450   : > { %v2227_v54 = vld [vmem:[%s5051_s29 + $0x11f0] sm:$0xff]  ;;  %3039 = vmatpush.msrb.mxu1 %v2151_v53 }
 0x451   : > { %v1975_v55 = vld [vmem:[%s5051_s29 + $0xa10] sm:$0xff]  ;;  %3056 = vmatpush.msra.mxu2 %v2227_v54 }
 0x452   : > { %v2083_v56 = vld [vmem:[%s5051_s29 + $0xd70] sm:$0xff]  ;;  %3011 = vmatpush.msrb.mxu3 %v1975_v55 }
 0x453   : > { %v2147_v57 = vld [vmem:[%s5051_s29 + $0xf70] sm:$0xff]  ;;  %3020 = vmatpush.msrb.mxu0 %v2083_v56  ;;  %3012 = vmatmul.f32.vlgmr.msrb.gmra.mxu3 %v5622_v16 }
 0x454   : > { %v2223_v58 = vld [vmem:[%s5051_s29 + $0x11d0] sm:$0xff]  ;;  %3040 = vmatpush.msrb.mxu1 %v2147_v57 }
 0x455   : > { %v2291_v59 = vld [vmem:[%s5051_s29 + $0x13f0] sm:$0xff]  ;;  %3057 = vmatpush.msra.mxu2 %v2223_v58 }
 0x456   : > { %v2079_v60 = vld [vmem:[%s5051_s29 + $0xd50] sm:$0xff]  ;;  %3076 = vmatpush.msra.mxu3 %v2291_v59 }
 0x457   : > { %v2143_v1 = vld [vmem:[%s5051_s29 + $0xf50] sm:$0xff]  ;;  %3021 = vmatpush.msrb.mxu0 %v2079_v60 }
 0x458   : > { %v2219_v2 = vld [vmem:[%s5051_s29 + $0x11b0] sm:$0xff]  ;;  %3041 = vmatpush.msrb.mxu1 %v2143_v1 }
 0x459   : > { %v2287_v3 = vld [vmem:[%s5051_s29 + $0x13d0] sm:$0xff]  ;;  %3058 = vmatpush.msra.mxu2 %v2219_v2 }
 0x45a   : > { %v2075_v4 = vld [vmem:[%s5051_s29 + $0xd30] sm:$0xff]  ;;  %3077 = vmatpush.msra.mxu3 %v2287_v3  ;;  %v1716_v3 = vld [vmem:[%s5051_s29 + $0x1f8] sm:$0xff] }
 0x45b   : > { %v2139_v5 = vld [vmem:[%s5051_s29 + $0xf30] sm:$0xff]  ;;  %3022 = vmatpush.msrb.mxu0 %v2075_v4  ;;  %v1780_v4 = vld [vmem:[%s5051_s29 + $0x3f8] sm:$0xff] }
 0x45c   : > { %v2215_v6 = vld [vmem:[%s5051_s29 + $0x1190] sm:$0xff]  ;;  %3042 = vmatpush.msrb.mxu1 %v2139_v5 }
 0x45d   : > { %v2283_v7 = vld [vmem:[%s5051_s29 + $0x13b0] sm:$0xff]  ;;  %3059 = vmatpush.msra.mxu2 %v2215_v6 }
 0x45e   : > { %v2071_v8 = vld [vmem:[%s5051_s29 + $0xd10] sm:$0xff]  ;;  %3078 = vmatpush.msra.mxu3 %v2283_v7  ;;  %v5676_v7 = vld.sshfl [vmem:[#allocation1] sm:$0xff pattern:$0x73625140] }
 0x45f   : > { %v2135_v9 = vld [vmem:[%s5051_s29 + $0xf10] sm:$0xff]  ;;  %3023 = vmatpush.msrb.mxu0 %v2071_v8  ;;  %v1712_v8 = vld [vmem:[%s5051_s29 + $0x1d8] sm:$0xff] }
 0x460   : > { %v2211_v50 = vld [vmem:[%s5051_s29 + $0x1170] sm:$0xff]  ;;  %3043 = vmatpush.msrb.mxu1 %v2135_v9  ;;  %v1776_v9 = vld [vmem:[%s5051_s29 + $0x3d8] sm:$0xff] }
 0x461   : > { %v2279_v10 = vld [vmem:[%s5051_s29 + $0x1390] sm:$0xff]  ;;  %3060 = vmatpush.msra.mxu2 %v2211_v50  ;;  %v1844_v50 = vld [vmem:[%s5051_s29 + $0x5f8] sm:$0xff] }
 0x462   : > { %v2067_v40 = vld [vmem:[%s5051_s29 + $0xcf0] sm:$0xff]  ;;  %3079 = vmatpush.msra.mxu3 %v2279_v10 }
 0x463   : > { %v2131_v11 = vld [vmem:[%s5051_s29 + $0xef0] sm:$0xff]  ;;  %3024 = vmatpush.msrb.mxu0 %v2067_v40  ;;  %v1708_v40 = vld [vmem:[%s5051_s29 + $0x1b8] sm:$0xff] }
 0x464   : > { %v2207_v13 = vld [vmem:[%s5051_s29 + $0x1150] sm:$0xff]  ;;  %3044 = vmatpush.msrb.mxu1 %v2131_v11  ;;  %v5684_v11 = vld.sshfl [vmem:[#allocation1 + $0x8] sm:$0xff pattern:$0x73625140] }
 0x465   : > { %v2275_v14 = vld [vmem:[%s5051_s29 + $0x1370] sm:$0xff]  ;;  %3061 = vmatpush.msra.mxu2 %v2207_v13  ;;  %v1772_v13 = vld [vmem:[%s5051_s29 + $0x3b8] sm:$0xff] }
 0x466   : > { %v2063_v39 = vld [vmem:[%s5051_s29 + $0xcd0] sm:$0xff]  ;;  %3080 = vmatpush.msra.mxu3 %v2275_v14  ;;  %v1840_v14 = vld [vmem:[%s5051_s29 + $0x5d8] sm:$0xff] }
 0x467   : > { %v2127_v15 = vld [vmem:[%s5051_s29 + $0xed0] sm:$0xff]  ;;  %3025 = vmatpush.msrb.mxu0 %v2063_v39 }
 0x468   : > { %v2203_v17 = vld [vmem:[%s5051_s29 + $0x1130] sm:$0xff]  ;;  %3045 = vmatpush.msrb.mxu1 %v2127_v15  ;;  %v1704_v15 = vld [vmem:[%s5051_s29 + $0x198] sm:$0xff] }
 0x469   : > { %v2271_v18 = vld [vmem:[%s5051_s29 + $0x1350] sm:$0xff]  ;;  %3062 = vmatpush.msra.mxu2 %v2203_v17  ;;  %v1768_v17 = vld [vmem:[%s5051_s29 + $0x398] sm:$0xff] }
 0x46a   : > { %v2059_v19 = vld [vmem:[%s5051_s29 + $0xcb0] sm:$0xff]  ;;  %3081 = vmatpush.msra.mxu3 %v2271_v18  ;;  %v1836_v18 = vld [vmem:[%s5051_s29 + $0x5b8] sm:$0xff] }
 0x46b   : > { %v2123_v20 = vld [vmem:[%s5051_s29 + $0xeb0] sm:$0xff]  ;;  %3026 = vmatpush.msrb.mxu0 %v2059_v19 }
 0x46c   : > { %v2199_v21 = vld [vmem:[%s5051_s29 + $0x1110] sm:$0xff]  ;;  %3046 = vmatpush.msrb.mxu1 %v2123_v20  ;;  %v1700_v20 = vld [vmem:[%s5051_s29 + $0x178] sm:$0xff] }
 0x46d   : > { %v2267_v38 = vld [vmem:[%s5051_s29 + $0x1330] sm:$0xff]  ;;  %3063 = vmatpush.msra.mxu2 %v2199_v21  ;;  %v1764_v21 = vld [vmem:[%s5051_s29 + $0x378] sm:$0xff] }
 0x46e   : > { %v2055_v22 = vld [vmem:[%s5051_s29 + $0xc90] sm:$0xff]  ;;  %3082 = vmatpush.msra.mxu3 %v2267_v38  ;;  %v1832_v38 = vld [vmem:[%s5051_s29 + $0x598] sm:$0xff] }
 0x46f   : > { %v2119_v23 = vld [vmem:[%s5051_s29 + $0xe90] sm:$0xff]  ;;  %3027 = vmatpush.msrb.mxu0 %v2055_v22 }
 0x470   : > { %v2195_v24 = vld [vmem:[%s5051_s29 + $0x10f0] sm:$0xff]  ;;  %3047 = vmatpush.msrb.mxu1 %v2119_v23  ;;  %v1696_v23 = vld [vmem:[%s5051_s29 + $0x158] sm:$0xff] }
 0x471   : > { %v2263_v25 = vld [vmem:[%s5051_s29 + $0x1310] sm:$0xff]  ;;  %3064 = vmatpush.msra.mxu2 %v2195_v24  ;;  %v1760_v24 = vld [vmem:[%s5051_s29 + $0x358] sm:$0xff] }
 0x472   : > { %v2051_v37 = vld [vmem:[%s5051_s29 + $0xc70] sm:$0xff]  ;;  %3083 = vmatpush.msra.mxu3 %v2263_v25  ;;  %v1828_v25 = vld [vmem:[%s5051_s29 + $0x578] sm:$0xff] }
 0x473   : > { %v2115_v31 = vld [vmem:[%s5051_s29 + $0xe70] sm:$0xff]  ;;  %3028 = vmatpush.msrb.mxu0 %v2051_v37 }
 0x474   : > { %v2191_v26 = vld [vmem:[%s5051_s29 + $0x10d0] sm:$0xff]  ;;  %3048 = vmatpush.msrb.mxu1 %v2115_v31  ;;  %v1692_v31 = vld [vmem:[%s5051_s29 + $0x138] sm:$0xff] }
 0x475   : > { %v2259_v27 = vld [vmem:[%s5051_s29 + $0x12f0] sm:$0xff]  ;;  %3065 = vmatpush.msra.mxu2 %v2191_v26  ;;  %v1756_v26 = vld [vmem:[%s5051_s29 + $0x338] sm:$0xff] }
 0x476   : > { %v2047_v28 = vld [vmem:[%s5051_s29 + $0xc50] sm:$0xff]  ;;  %3084 = vmatpush.msra.mxu3 %v2259_v27  ;;  %v1824_v27 = vld [vmem:[%s5051_s29 + $0x558] sm:$0xff] }
 0x477   : > { %v2111_v29 = vld [vmem:[%s5051_s29 + $0xe50] sm:$0xff]  ;;  %3029 = vmatpush.msrb.mxu0 %v2047_v28 }
 0x478   : > { %v2187_v30 = vld [vmem:[%s5051_s29 + $0x10b0] sm:$0xff]  ;;  %3049 = vmatpush.msrb.mxu1 %v2111_v29  ;;  %v1688_v29 = vld [vmem:[%s5051_s29 + $0x118] sm:$0xff] }
 0x479   : > { %v2255_v33 = vld [vmem:[%s5051_s29 + $0x12d0] sm:$0xff]  ;;  %3066 = vmatpush.msra.mxu2 %v2187_v30  ;;  %v1752_v30 = vld [vmem:[%s5051_s29 + $0x318] sm:$0xff] }
 0x47a   : > { %v2043_v32 = vld [vmem:[%s5051_s29 + $0xc30] sm:$0xff]  ;;  %3085 = vmatpush.msra.mxu3 %v2255_v33  ;;  %v1820_v33 = vld [vmem:[%s5051_s29 + $0x538] sm:$0xff] }
 0x47b   : > { %v2107_v34 = vld [vmem:[%s5051_s29 + $0xe30] sm:$0xff]  ;;  %3030 = vmatpush.msrb.mxu0 %v2043_v32 }
 0x47c   : > { %v2183_v35 = vld [vmem:[%s5051_s29 + $0x1090] sm:$0xff]  ;;  %3050 = vmatpush.msrb.mxu1 %v2107_v34  ;;  %v1684_v34 = vld [vmem:[%s5051_s29 + $0xf8] sm:$0xff] }
 0x47d   : > { %v2251_v36 = vld [vmem:[%s5051_s29 + $0x12b0] sm:$0xff]  ;;  %3067 = vmatpush.msra.mxu2 %v2183_v35  ;;  %v1748_v35 = vld [vmem:[%s5051_s29 + $0x2f8] sm:$0xff] }
 0x47e   : > { %v2039_v41 = vld [vmem:[%s5051_s29 + $0xc10] sm:$0xff]  ;;  %3086 = vmatpush.msra.mxu3 %v2251_v36  ;;  %v1816_v36 = vld [vmem:[%s5051_s29 + $0x518] sm:$0xff] }
 0x47f   : > { %v2103_v42 = vld [vmem:[%s5051_s29 + $0xe10] sm:$0xff]  ;;  %3031 = vmatpush.msrb.mxu0 %v2039_v41 }
 0x480   : > { %v2179_v43 = vld [vmem:[%s5051_s29 + $0x1070] sm:$0xff]  ;;  %3051 = vmatpush.msrb.mxu1 %v2103_v42  ;;  %3032 = vmatmul.f32.vlgmr.msrb.gmra.mxu0 %v5654_v48  ;;  %v1680_v42 = vld [vmem:[%s5051_s29 + $0xd8] sm:$0xff] }
 0x481   : > { %v2247_v44 = vld [vmem:[%s5051_s29 + $0x1290] sm:$0xff]  ;;  %3068 = vmatpush.msra.mxu2 %v2179_v43  ;;  %v1744_v43 = vld [vmem:[%s5051_s29 + $0x2d8] sm:$0xff] }
 0x482   : > { %v2355_v46 = vld [vmem:[%s5051_s29 + $0x15f0] sm:$0xff]  ;;  %3087 = vmatpush.msra.mxu3 %v2247_v44  ;;  %v1812_v44 = vld [vmem:[%s5051_s29 + $0x4f8] sm:$0xff] }
 0x483   : > { %v2371_v47 = vld [vmem:[%s5051_s29 + $0x1670] sm:$0xff]  ;;  %3096 = vmatpush.msra.mxu0 %v2355_v46 }
 0x484   : > { %v2175_v49 = vld [vmem:[%s5051_s29 + $0x1050] sm:$0xff]  ;;  %3128 = vmatpush.msra.mxu1 %v2371_v47  ;;  %v1676_v47 = vld [vmem:[%s5051_s29 + $0xb8] sm:$0xff] }
 0x485   : > { %v2243_v51 = vld [vmem:[%s5051_s29 + $0x1270] sm:$0xff]  ;;  %3069 = vmatpush.msra.mxu2 %v2175_v49  ;;  %v1740_v49 = vld [vmem:[%s5051_s29 + $0x2b8] sm:$0xff] }
 0x486   : > { %v2351_v52 = vld [vmem:[%s5051_s29 + $0x15d0] sm:$0xff]  ;;  %3088 = vmatpush.msra.mxu3 %v2243_v51  ;;  %v1808_v51 = vld [vmem:[%s5051_s29 + $0x4d8] sm:$0xff] }
 0x487   : > { %v2367_v53 = vld [vmem:[%s5051_s29 + $0x1650] sm:$0xff]  ;;  %3097 = vmatpush.msra.mxu0 %v2351_v52 }
 0x488   : > { %v2171_v54 = vld [vmem:[%s5051_s29 + $0x1030] sm:$0xff]  ;;  %3129 = vmatpush.msra.mxu1 %v2367_v53  ;;  %v1672_v53 = vld [vmem:[%s5051_s29 + $0x98] sm:$0xff] }
 0x489   : > { %v5662_v55 = vld.sshfl [vmem:[#allocation1 + $0x38] sm:$0xff pattern:$0x73625140]  ;;  %3070 = vmatpush.msra.mxu2 %v2171_v54  ;;  %v1736_v54 = vld [vmem:[%s5051_s29 + $0x298] sm:$0xff] }
 0x48a   : > { %3052 = vmatmul.f32.vlgmr.msrb.gmra.mxu1 %v5662_v55  ;;  %v2239_v56 = vld [vmem:[%s5051_s29 + $0x1250] sm:$0xff] }
 0x48b   : > { %v2347_v57 = vld [vmem:[%s5051_s29 + $0x15b0] sm:$0xff]  ;;  %3089 = vmatpush.msra.mxu3 %v2239_v56  ;;  %v1804_v56 = vld [vmem:[%s5051_s29 + $0x4b8] sm:$0xff] }
 0x48c   : > { %v2363_v58 = vld [vmem:[%s5051_s29 + $0x1630] sm:$0xff]  ;;  %3098 = vmatpush.msra.mxu0 %v2347_v57 }
 0x48d   : > { %v2167_v59 = vld [vmem:[%s5051_s29 + $0x1010] sm:$0xff]  ;;  %3130 = vmatpush.msra.mxu1 %v2363_v58  ;;  %v1668_v58 = vld [vmem:[%s5051_s29 + $0x78] sm:$0xff] }
 0x48e   : > { %v2235_v60 = vld [vmem:[%s5051_s29 + $0x1230] sm:$0xff]  ;;  %3071 = vmatpush.msra.mxu2 %v2167_v59  ;;  %v1732_v59 = vld [vmem:[%s5051_s29 + $0x278] sm:$0xff] }
 0x48f   : > { %v2343_v1 = vld [vmem:[%s5051_s29 + $0x1590] sm:$0xff]  ;;  %3090 = vmatpush.msra.mxu3 %v2235_v60  ;;  %3072 = vmatmul.f32.vlgmr.msra.gmra.mxu2 %v5676_v7  ;;  %v1800_v60 = vld [vmem:[%s5051_s29 + $0x498] sm:$0xff] }
 0x490   : > { %v2359_v2 = vld [vmem:[%s5051_s29 + $0x1610] sm:$0xff]  ;;  %3099 = vmatpush.msra.mxu0 %v2343_v1  ;;  %3156 = vmatpush.msrb.mxu2 %v1780_v4  ;;  %v1908_v1 = vld [vmem:[%s5051_s29 + $0x7f8] sm:$0xff] }
 0x491   : > { %v2231_v5 = vld [vmem:[%s5051_s29 + $0x1210] sm:$0xff]  ;;  %3131 = vmatpush.msra.mxu1 %v2359_v2  ;;  %v1728_v2 = vld [vmem:[%s5051_s29 + $0x258] sm:$0xff] }
 0x492   : > { %v2339_v6 = vld [vmem:[%s5051_s29 + $0x1570] sm:$0xff]  ;;  %3091 = vmatpush.msra.mxu3 %v2231_v5  ;;  %3157 = vmatpush.msrb.mxu2 %v1776_v9  ;;  %v1664_v4 = vld [vmem:[%s5051_s29 + $0x58] sm:$0xff] }
 0x493   : > { %3136 = vmatpush.msrb.mxu1 %v1716_v3  ;;  %3100 = vmatpush.msra.mxu0 %v2339_v6  ;;  %v2335_v10 = vld [vmem:[%s5051_s29 + $0x1550] sm:$0xff]  ;;  %v5731_v3 = vld.sshfl [vmem:[#allocation1 + $0x10] sm:$0xff pattern:$0x73625140]  ;;  %v1796_v5 = vld [vmem:[%s5051_s29 + $0x478] sm:$0xff] }
 0x494   : > { %3092 = vmatmul.f32.vlgmr.msra.gmra.mxu3 %v5684_v11  ;;  %v2331_v39 = vld [vmem:[%s5051_s29 + $0x1530] sm:$0xff]  ;;  %3158 = vmatpush.msrb.mxu2 %v1772_v13  ;;  %v1904_v6 = vld [vmem:[%s5051_s29 + $0x7d8] sm:$0xff] }
 0x495   : > { %3137 = vmatpush.msrb.mxu1 %v1712_v8  ;;  %3176 = vmatpush.msrb.mxu3 %v1844_v50  ;;  %v2327_v19 = vld [vmem:[%s5051_s29 + $0x1510] sm:$0xff]  ;;  %v1724_v8 = vld [vmem:[%s5051_s29 + $0x238] sm:$0xff] }
 0x496   : > { %3101 = vmatpush.msra.mxu0 %v2335_v10  ;;  %3159 = vmatpush.msrb.mxu2 %v1768_v17  ;;  %v2323_v22 = vld [vmem:[%s5051_s29 + $0x14f0] sm:$0xff]  ;;  %v1660_v50 = vld [vmem:[%s5051_s29 + $0x38] sm:$0xff] }
 0x497   : > { %3138 = vmatpush.msrb.mxu1 %v1708_v40  ;;  %3177 = vmatpush.msrb.mxu3 %v1840_v14  ;;  %v2319_v37 = vld [vmem:[%s5051_s29 + $0x14d0] sm:$0xff]  ;;  %v1792_v10 = vld [vmem:[%s5051_s29 + $0x458] sm:$0xff] }
 0x498   : > { %3102 = vmatpush.msra.mxu0 %v2331_v39  ;;  %3160 = vmatpush.msrb.mxu2 %v1764_v21  ;;  %v2315_v28 = vld [vmem:[%s5051_s29 + $0x14b0] sm:$0xff]  ;;  %v1900_v40 = vld [vmem:[%s5051_s29 + $0x7b8] sm:$0xff] }
 0x499   : > { %3139 = vmatpush.msrb.mxu1 %v1704_v15  ;;  %3178 = vmatpush.msrb.mxu3 %v1836_v18  ;;  %v2311_v32 = vld [vmem:[%s5051_s29 + $0x1490] sm:$0xff]  ;;  %v1720_v13 = vld [vmem:[%s5051_s29 + $0x218] sm:$0xff] }
 0x49a   : > { %3103 = vmatpush.msra.mxu0 %v2327_v19  ;;  %3161 = vmatpush.msrb.mxu2 %v1760_v24  ;;  %v2307_v41 = vld [vmem:[%s5051_s29 + $0x1470] sm:$0xff]  ;;  %v1656_v14 = vld [vmem:[%s5051_s29 + $0x18] sm:$0xff] }
 0x49b   : > { %3140 = vmatpush.msrb.mxu1 %v1700_v20  ;;  %3179 = vmatpush.msrb.mxu3 %v1832_v38  ;;  %v2303_v46 = vld [vmem:[%s5051_s29 + $0x1450] sm:$0xff]  ;;  %v1788_v39 = vld [vmem:[%s5051_s29 + $0x438] sm:$0xff] }
 0x49c   : > { %3104 = vmatpush.msra.mxu0 %v2323_v22  ;;  %3162 = vmatpush.msrb.mxu2 %v1756_v26  ;;  %v2299_v52 = vld [vmem:[%s5051_s29 + $0x1430] sm:$0xff]  ;;  %v1896_v15 = vld [vmem:[%s5051_s29 + $0x798] sm:$0xff] }
 0x49d   : > { %3141 = vmatpush.msrb.mxu1 %v1696_v23  ;;  %3180 = vmatpush.msrb.mxu3 %v1828_v25  ;;  %v2295_v57 = vld [vmem:[%s5051_s29 + $0x1410] sm:$0xff]  ;;  %v1972_v17 = vld [vmem:[%s5051_s29 + $0x9f8] sm:$0xff] }
 0x49e   : > { %3105 = vmatpush.msra.mxu0 %v2319_v37  ;;  %3163 = vmatpush.msrb.mxu2 %v1752_v30  ;;  %v5738_v9 = vld.sshfl [vmem:[#allocation1 + $0x18] sm:$0xff pattern:$0x73625140]  ;;  %v2036_v18 = vld [vmem:[%s5051_s29 + $0xbf8] sm:$0xff] }
 0x49f   : > { %3142 = vmatpush.msrb.mxu1 %v1692_v31  ;;  %3181 = vmatpush.msrb.mxu3 %v1824_v27  ;;  %v1784_v19 = vld [vmem:[%s5051_s29 + $0x418] sm:$0xff] }
 0x4a0   : > { %3106 = vmatpush.msra.mxu0 %v2315_v28  ;;  %3164 = vmatpush.msrb.mxu2 %v1748_v35  ;;  %v1892_v20 = vld [vmem:[%s5051_s29 + $0x778] sm:$0xff] }
 0x4a1   : > { %3143 = vmatpush.msrb.mxu1 %v1688_v29  ;;  %3182 = vmatpush.msrb.mxu3 %v1820_v33  ;;  %v1968_v21 = vld [vmem:[%s5051_s29 + $0x9d8] sm:$0xff] }
 0x4a2   : > { %3107 = vmatpush.msra.mxu0 %v2311_v32  ;;  %3165 = vmatpush.msrb.mxu2 %v1744_v43  ;;  %v2032_v38 = vld [vmem:[%s5051_s29 + $0xbd8] sm:$0xff] }
 0x4a3   : > { %3144 = vmatpush.msrb.mxu1 %v1684_v34  ;;  %3183 = vmatpush.msrb.mxu3 %v1816_v36  ;;  %v2100_v22 = vld [vmem:[%s5051_s29 + $0xdf8] sm:$0xff] }
 0x4a4   : > { %3108 = vmatpush.msra.mxu0 %v2307_v41  ;;  %3166 = vmatpush.msrb.mxu2 %v1740_v49  ;;  %v1888_v23 = vld [vmem:[%s5051_s29 + $0x758] sm:$0xff] }
 0x4a5   : > { %3145 = vmatpush.msrb.mxu1 %v1680_v42  ;;  %3184 = vmatpush.msrb.mxu3 %v1812_v44  ;;  %v1964_v24 = vld [vmem:[%s5051_s29 + $0x9b8] sm:$0xff] }
 0x4a6   : > { %3109 = vmatpush.msra.mxu0 %v2303_v46  ;;  %3167 = vmatpush.msrb.mxu2 %v1736_v54  ;;  %v2028_v25 = vld [vmem:[%s5051_s29 + $0xbb8] sm:$0xff] }
 0x4a7   : > { %3146 = vmatpush.msrb.mxu1 %v1676_v47  ;;  %3185 = vmatpush.msrb.mxu3 %v1808_v51  ;;  %v2096_v37 = vld [vmem:[%s5051_s29 + $0xdd8] sm:$0xff] }
 0x4a8   : > { %3110 = vmatpush.msra.mxu0 %v2299_v52  ;;  %3168 = vmatpush.msrb.mxu2 %v1732_v59  ;;  %v1884_v31 = vld [vmem:[%s5051_s29 + $0x738] sm:$0xff] }
 0x4a9   : > { %3147 = vmatpush.msrb.mxu1 %v1672_v53  ;;  %3186 = vmatpush.msrb.mxu3 %v1804_v56  ;;  %v1960_v26 = vld [vmem:[%s5051_s29 + $0x998] sm:$0xff] }
 0x4aa   : > { %3111 = vmatpush.msra.mxu0 %v2295_v57  ;;  %3486 = vmatmul.msk.f32.vlgmr.msra.gmra.mxu1 %vm2413_vm0, %v5738_v9  ;;  %v2024_v27 = vld [vmem:[%s5051_s29 + $0xb98] sm:$0xff] }
 0x4ab   : > { %3148 = vmatpush.msrb.mxu1 %v1668_v58  ;;  %3112 = vmatmul.f32.vlgmr.msra.gmra.mxu0 %v5731_v3  ;;  %v2092_v28 = vld [vmem:[%s5051_s29 + $0xdb8] sm:$0xff] }
 0x4ac   : > { %3187 = vmatpush.msrb.mxu3 %v1800_v60  ;;  %3196 = vmatpush.msrb.mxu0 %v1908_v1  ;;  %v1880_v29 = vld [vmem:[%s5051_s29 + $0x718] sm:$0xff] }
 0x4ad   : > { %3169 = vmatpush.msrb.mxu2 %v1728_v2  ;;  %3149 = vmatpush.msrb.mxu1 %v1664_v4  ;;  %v1956_v30 = vld [vmem:[%s5051_s29 + $0x978] sm:$0xff] }
 0x4ae   : > { %3188 = vmatpush.msrb.mxu3 %v1796_v5  ;;  %3197 = vmatpush.msrb.mxu0 %v1904_v6  ;;  %v2020_v33 = vld [vmem:[%s5051_s29 + $0xb78] sm:$0xff] }
 0x4af   : > { %3170 = vmatpush.msrb.mxu2 %v1724_v8  ;;  %3150 = vmatpush.msrb.mxu1 %v1660_v50  ;;  %v2088_v32 = vld [vmem:[%s5051_s29 + $0xd98] sm:$0xff] }
 0x4b0   : > { %3189 = vmatpush.msrb.mxu3 %v1792_v10  ;;  %3198 = vmatpush.msrb.mxu0 %v1900_v40  ;;  %v1876_v34 = vld [vmem:[%s5051_s29 + $0x6f8] sm:$0xff] }
 0x4b1   : > { %3171 = vmatpush.msrb.mxu2 %v1720_v13  ;;  %3151 = vmatpush.msrb.mxu1 %v1656_v14  ;;  %v1952_v35 = vld [vmem:[%s5051_s29 + $0x958] sm:$0xff] }
 0x4b2   : > { %3190 = vmatpush.msrb.mxu3 %v1788_v39  ;;  %3199 = vmatpush.msrb.mxu0 %v1896_v15  ;;  %v2016_v36 = vld [vmem:[%s5051_s29 + $0xb58] sm:$0xff] }
 0x4b3   : > { %3216 = vmatpush.msra.mxu1 %v1972_v17  ;;  %3236 = vmatpush.msra.mxu2 %v2036_v18  ;;  %v2084_v41 = vld [vmem:[%s5051_s29 + $0xd78] sm:$0xff] }
 0x4b4   : > { %3191 = vmatpush.msrb.mxu3 %v1784_v19  ;;  %3200 = vmatpush.msrb.mxu0 %v1892_v20  ;;  %v1872_v42 = vld [vmem:[%s5051_s29 + $0x6d8] sm:$0xff] }
 0x4b5   : > { %3217 = vmatpush.msra.mxu1 %v1968_v21  ;;  %3237 = vmatpush.msra.mxu2 %v2032_v38  ;;  %v1948_v43 = vld [vmem:[%s5051_s29 + $0x938] sm:$0xff] }
 0x4b6   : > { %3256 = vmatpush.msra.mxu3 %v2100_v22  ;;  %3201 = vmatpush.msrb.mxu0 %v1888_v23  ;;  %v2012_v44 = vld [vmem:[%s5051_s29 + $0xb38] sm:$0xff] }
 0x4b7   : > { %3218 = vmatpush.msra.mxu1 %v1964_v24  ;;  %3238 = vmatpush.msra.mxu2 %v2028_v25  ;;  %v2080_v46 = vld [vmem:[%s5051_s29 + $0xd58] sm:$0xff] }
 0x4b8   : > { %3257 = vmatpush.msra.mxu3 %v2096_v37  ;;  %3202 = vmatpush.msrb.mxu0 %v1884_v31  ;;  %v1868_v47 = vld [vmem:[%s5051_s29 + $0x6b8] sm:$0xff] }
 0x4b9   : > { %3219 = vmatpush.msra.mxu1 %v1960_v26  ;;  %3239 = vmatpush.msra.mxu2 %v2024_v27  ;;  %v1944_v49 = vld [vmem:[%s5051_s29 + $0x918] sm:$0xff] }
 0x4ba   : > { %3258 = vmatpush.msra.mxu3 %v2092_v28  ;;  %3203 = vmatpush.msrb.mxu0 %v1880_v29  ;;  %v2008_v51 = vld [vmem:[%s5051_s29 + $0xb18] sm:$0xff] }
 0x4bb   : > { %3220 = vmatpush.msra.mxu1 %v1956_v30  ;;  %3240 = vmatpush.msra.mxu2 %v2020_v33  ;;  %v2076_v52 = vld [vmem:[%s5051_s29 + $0xd38] sm:$0xff] }
 0x4bc   : > { %3259 = vmatpush.msra.mxu3 %v2088_v32  ;;  %3204 = vmatpush.msrb.mxu0 %v1876_v34  ;;  %v1864_v53 = vld [vmem:[%s5051_s29 + $0x698] sm:$0xff] }
 0x4bd   : > { %3221 = vmatpush.msra.mxu1 %v1952_v35  ;;  %3241 = vmatpush.msra.mxu2 %v2016_v36  ;;  %v1940_v54 = vld [vmem:[%s5051_s29 + $0x8f8] sm:$0xff] }
 0x4be   : > { %3260 = vmatpush.msra.mxu3 %v2084_v41  ;;  %3205 = vmatpush.msrb.mxu0 %v1872_v42  ;;  %v2004_v56 = vld [vmem:[%s5051_s29 + $0xaf8] sm:$0xff] }
 0x4bf   : > { %3222 = vmatpush.msra.mxu1 %v1948_v43  ;;  %3242 = vmatpush.msra.mxu2 %v2012_v44  ;;  %v2072_v57 = vld [vmem:[%s5051_s29 + $0xd18] sm:$0xff] }
 0x4c0   : > { %3261 = vmatpush.msra.mxu3 %v2080_v46  ;;  %3206 = vmatpush.msrb.mxu0 %v1868_v47  ;;  %v1860_v58 = vld [vmem:[%s5051_s29 + $0x678] sm:$0xff] }
 0x4c1   : > { %3223 = vmatpush.msra.mxu1 %v1944_v49  ;;  %3243 = vmatpush.msra.mxu2 %v2008_v51  ;;  %v1936_v59 = vld [vmem:[%s5051_s29 + $0x8d8] sm:$0xff] }
 0x4c2   : > { %3262 = vmatpush.msra.mxu3 %v2076_v52  ;;  %3207 = vmatpush.msrb.mxu0 %v1864_v53  ;;  %v2000_v60 = vld [vmem:[%s5051_s29 + $0xad8] sm:$0xff] }
 0x4c3   : > { %3224 = vmatpush.msra.mxu1 %v1940_v54  ;;  %v2068_v1 = vld [vmem:[%s5051_s29 + $0xcf8] sm:$0xff]  ;;  %3244 = vmatpush.msra.mxu2 %v2004_v56 }
 0x4c4   : > { %3263 = vmatpush.msra.mxu3 %v2072_v57  ;;  %v1856_v2 = vld [vmem:[%s5051_s29 + $0x658] sm:$0xff]  ;;  %3208 = vmatpush.msrb.mxu0 %v1860_v58 }
 0x4c5   : > { %v1932_v4 = vld [vmem:[%s5051_s29 + $0x8b8] sm:$0xff]  ;;  %3225 = vmatpush.msra.mxu1 %v1936_v59  ;;  %3245 = vmatpush.msra.mxu2 %v2000_v60 }
 0x4c6   : > { %v1996_v5 = vld [vmem:[%s5051_s29 + $0xab8] sm:$0xff]  ;;  %3264 = vmatpush.msra.mxu3 %v2068_v1  ;;  %3209 = vmatpush.msrb.mxu0 %v1856_v2 }
 0x4c7   : > { %v2064_v6 = vld [vmem:[%s5051_s29 + $0xcd8] sm:$0xff]  ;;  %3226 = vmatpush.msra.mxu1 %v1932_v4  ;;  %3246 = vmatpush.msra.mxu2 %v1996_v5 }
 0x4c8   : > { %v1852_v8 = vld [vmem:[%s5051_s29 + $0x638] sm:$0xff]  ;;  %3265 = vmatpush.msra.mxu3 %v2064_v6  ;;  %3152 = vmatmul.f32.vlgmr.msrb.gmra.mxu1 %v5172_v63 }
 0x4c9   : > { %v1928_v50 = vld [vmem:[%s5051_s29 + $0x898] sm:$0xff]  ;;  %3210 = vmatpush.msrb.mxu0 %v1852_v8  ;;  %3172 = vmatmul.f32.vlgmr.msrb.gmra.mxu2 %v5174_v0 }
 0x4ca   : > { %v1992_v10 = vld [vmem:[%s5051_s29 + $0xa98] sm:$0xff]  ;;  %3227 = vmatpush.msra.mxu1 %v1928_v50  ;;  %3192 = vmatmul.f32.vlgmr.msrb.gmra.mxu3 %v5168_v61 }
 0x4cb   : > { %v2060_v40 = vld [vmem:[%s5051_s29 + $0xcb8] sm:$0xff]  ;;  %3247 = vmatpush.msra.mxu2 %v1992_v10 }
 0x4cc   : > { %v1848_v13 = vld [vmem:[%s5051_s29 + $0x618] sm:$0xff]  ;;  %3266 = vmatpush.msra.mxu3 %v2060_v40 }
 0x4cd   : > { %v1924_v14 = vld [vmem:[%s5051_s29 + $0x878] sm:$0xff]  ;;  %3211 = vmatpush.msrb.mxu0 %v1848_v13 }
 0x4ce   : > { %v1988_v39 = vld [vmem:[%s5051_s29 + $0xa78] sm:$0xff]  ;;  %3228 = vmatpush.msra.mxu1 %v1924_v14  ;;  %3212 = vmatmul.f32.vlgmr.msrb.gmra.mxu0 %v5170_v62 }
 0x4cf   : > { %v2056_v15 = vld [vmem:[%s5051_s29 + $0xc98] sm:$0xff]  ;;  %3248 = vmatpush.msra.mxu2 %v1988_v39 }
 0x4d0   : > { %v2164_v17 = vld [vmem:[%s5051_s29 + $0xff8] sm:$0xff]  ;;  %3267 = vmatpush.msra.mxu3 %v2056_v15 }
 0x4d1   : > { %v1920_v18 = vld [vmem:[%s5051_s29 + $0x858] sm:$0xff]  ;;  %3276 = vmatpush.msra.mxu0 %v2164_v17 }
 0x4d2   : > { %v1984_v19 = vld [vmem:[%s5051_s29 + $0xa58] sm:$0xff]  ;;  %3229 = vmatpush.msra.mxu1 %v1920_v18 }
 0x4d3   : > { %v2052_v20 = vld [vmem:[%s5051_s29 + $0xc78] sm:$0xff]  ;;  %3249 = vmatpush.msra.mxu2 %v1984_v19 }
 0x4d4   : > { %v2160_v21 = vld [vmem:[%s5051_s29 + $0xfd8] sm:$0xff]  ;;  %3268 = vmatpush.msra.mxu3 %v2052_v20 }
 0x4d5   : > { %v1916_v38 = vld [vmem:[%s5051_s29 + $0x838] sm:$0xff]  ;;  %3277 = vmatpush.msra.mxu0 %v2160_v21 }
 0x4d6   : > { %v1980_v22 = vld [vmem:[%s5051_s29 + $0xa38] sm:$0xff]  ;;  %3230 = vmatpush.msra.mxu1 %v1916_v38 }
 0x4d7   : > { %v2048_v23 = vld [vmem:[%s5051_s29 + $0xc58] sm:$0xff]  ;;  %3250 = vmatpush.msra.mxu2 %v1980_v22 }
 0x4d8   : > { %v2156_v24 = vld [vmem:[%s5051_s29 + $0xfb8] sm:$0xff]  ;;  %3269 = vmatpush.msra.mxu3 %v2048_v23 }
 0x4d9   : > { %v1912_v25 = vld [vmem:[%s5051_s29 + $0x818] sm:$0xff]  ;;  %3278 = vmatpush.msra.mxu0 %v2156_v24 }
 0x4da   : > { %v1976_v37 = vld [vmem:[%s5051_s29 + $0xa18] sm:$0xff]  ;;  %3231 = vmatpush.msra.mxu1 %v1912_v25 }
 0x4db   : > { %v2044_v31 = vld [vmem:[%s5051_s29 + $0xc38] sm:$0xff]  ;;  %3251 = vmatpush.msra.mxu2 %v1976_v37  ;;  %3232 = vmatmul.f32.vlgmr.msra.gmra.mxu1 %v5614_v12 }
 0x4dc   : > { %v2152_v26 = vld [vmem:[%s5051_s29 + $0xf98] sm:$0xff]  ;;  %3270 = vmatpush.msra.mxu3 %v2044_v31  ;;  %3252 = vmatmul.f32.vlgmr.msra.gmra.mxu2 %v5622_v16 }
 0x4dd   : > { %v2228_v27 = vld [vmem:[%s5051_s29 + $0x11f8] sm:$0xff]  ;;  %3279 = vmatpush.msra.mxu0 %v2152_v26 }
 0x4de   : > { %v2292_v28 = vld [vmem:[%s5051_s29 + $0x13f8] sm:$0xff]  ;;  %3296 = vmatpush.msrb.mxu1 %v2228_v27 }
 0x4df   : > { %v2040_v29 = vld [vmem:[%s5051_s29 + $0xc18] sm:$0xff]  ;;  %3316 = vmatpush.msrb.mxu2 %v2292_v28 }
 0x4e0   : > { %v2148_v30 = vld [vmem:[%s5051_s29 + $0xf78] sm:$0xff]  ;;  %3271 = vmatpush.msra.mxu3 %v2040_v29 }
 0x4e1   : > { %v2224_v33 = vld [vmem:[%s5051_s29 + $0x11d8] sm:$0xff]  ;;  %3280 = vmatpush.msra.mxu0 %v2148_v30  ;;  %3272 = vmatmul.f32.vlgmr.msra.gmra.mxu3 %v5654_v48 }
 0x4e2   : > { %v2288_v32 = vld [vmem:[%s5051_s29 + $0x13d8] sm:$0xff]  ;;  %3297 = vmatpush.msrb.mxu1 %v2224_v33 }
 0x4e3   : > { %v2356_v34 = vld [vmem:[%s5051_s29 + $0x15f8] sm:$0xff]  ;;  %3317 = vmatpush.msrb.mxu2 %v2288_v32 }
 0x4e4   : > { %v2144_v35 = vld [vmem:[%s5051_s29 + $0xf58] sm:$0xff]  ;;  %3336 = vmatpush.msrb.mxu3 %v2356_v34  ;;  %v2713_v34 = vpop.f32.mrf.mxu1 }
 0x4e5   : > { %v2220_v63 = vld [vmem:[%s5051_s29 + $0x11b8] sm:$0xff]  ;;  %3281 = vmatpush.msra.mxu0 %v2144_v35  ;;  %v2733_v35 = vpop.f32.mrf.mxu2 }
 0x4e6   : > { %v2284_v36 = vld [vmem:[%s5051_s29 + $0x13b8] sm:$0xff]  ;;  %3298 = vmatpush.msrb.mxu1 %v2220_v63  ;;  %v2673_v63 = vpop.f32.mrf.mxu3 }
 0x4e7   : > { %v2352_v0 = vld [vmem:[%s5051_s29 + $0x15d8] sm:$0xff]  ;;  %3318 = vmatpush.msrb.mxu2 %v2284_v36 }
 0x4e8   : > { %v2140_v41 = vld [vmem:[%s5051_s29 + $0xf38] sm:$0xff]  ;;  %3337 = vmatpush.msrb.mxu3 %v2352_v0 }
 0x4e9   : > { %v2216_v42 = vld [vmem:[%s5051_s29 + $0x1198] sm:$0xff]  ;;  %3282 = vmatpush.msra.mxu0 %v2140_v41  ;;  %v2693_v41 = vpop.f32.mrf.mxu0 }
 0x4ea   : > { %v2280_v43 = vld [vmem:[%s5051_s29 + $0x1398] sm:$0xff]  ;;  %3299 = vmatpush.msrb.mxu1 %v2216_v42 }
 0x4eb   : > { %v2348_v44 = vld [vmem:[%s5051_s29 + $0x15b8] sm:$0xff]  ;;  %3319 = vmatpush.msrb.mxu2 %v2280_v43 }
 0x4ec   : > { %v2136_v46 = vld [vmem:[%s5051_s29 + $0xf18] sm:$0xff]  ;;  %3338 = vmatpush.msrb.mxu3 %v2348_v44  ;;  %v2793_v36 = vpop.f32.mrf.mxu1 }
 0x4ed   : > { %v2212_v61 = vld [vmem:[%s5051_s29 + $0x1178] sm:$0xff]  ;;  %3283 = vmatpush.msra.mxu0 %v2136_v46  ;;  %v2813_v0 = vpop.f32.mrf.mxu2 }
 0x4ee   : > { %v2276_v47 = vld [vmem:[%s5051_s29 + $0x1378] sm:$0xff]  ;;  %3300 = vmatpush.msrb.mxu1 %v2212_v61  ;;  %v2753_v42 = vpop.f32.mrf.mxu3 }
 0x4ef   : > { %v2344_v49 = vld [vmem:[%s5051_s29 + $0x1598] sm:$0xff]  ;;  %3320 = vmatpush.msrb.mxu2 %v2276_v47 }
 0x4f0   : > { %v2132_v51 = vld [vmem:[%s5051_s29 + $0xef8] sm:$0xff]  ;;  %3339 = vmatpush.msrb.mxu3 %v2344_v49 }
 0x4f1   : > { %v2208_v52 = vld [vmem:[%s5051_s29 + $0x1158] sm:$0xff]  ;;  %3284 = vmatpush.msra.mxu0 %v2132_v51 }
 0x4f2   : > { %v2272_v53 = vld [vmem:[%s5051_s29 + $0x1358] sm:$0xff]  ;;  %3301 = vmatpush.msrb.mxu1 %v2208_v52 }
 0x4f3   : > { %v2340_v54 = vld [vmem:[%s5051_s29 + $0x1578] sm:$0xff]  ;;  %3321 = vmatpush.msrb.mxu2 %v2272_v53 }
 0x4f4   : > { %v2128_v56 = vld [vmem:[%s5051_s29 + $0xed8] sm:$0xff]  ;;  %3340 = vmatpush.msrb.mxu3 %v2340_v54  ;;  %v2873_v43 = vpop.f32.mrf.mxu1 }
 0x4f5   : > { %v2204_v16 = vld [vmem:[%s5051_s29 + $0x1138] sm:$0xff]  ;;  %3285 = vmatpush.msra.mxu0 %v2128_v56  ;;  %v2893_v44 = vpop.f32.mrf.mxu2 }
 0x4f6   : > { %v2268_v57 = vld [vmem:[%s5051_s29 + $0x1338] sm:$0xff]  ;;  %3302 = vmatpush.msrb.mxu1 %v2204_v16  ;;  %v2833_v46 = vpop.f32.mrf.mxu3 }
 0x4f7   : > { %v2336_v58 = vld [vmem:[%s5051_s29 + $0x1558] sm:$0xff]  ;;  %3322 = vmatpush.msrb.mxu2 %v2268_v57 }
 0x4f8   : > { %v2124_v59 = vld [vmem:[%s5051_s29 + $0xeb8] sm:$0xff]  ;;  %3341 = vmatpush.msrb.mxu3 %v2336_v58 }
 0x4f9   : > { %v2200_v48 = vld [vmem:[%s5051_s29 + $0x1118] sm:$0xff]  ;;  %3286 = vmatpush.msra.mxu0 %v2124_v59 }
 0x4fa   : > { %v2264_v60 = vld [vmem:[%s5051_s29 + $0x1318] sm:$0xff]  ;;  %3303 = vmatpush.msrb.mxu1 %v2200_v48 }
 0x4fb   : > { %v2332_v62 = vld [vmem:[%s5051_s29 + $0x1538] sm:$0xff]  ;;  %3323 = vmatpush.msrb.mxu2 %v2264_v60 }
 0x4fc   : > { %v2120_v1 = vld [vmem:[%s5051_s29 + $0xe98] sm:$0xff]  ;;  %3342 = vmatpush.msrb.mxu3 %v2332_v62 }
 0x4fd   : > { %v2196_v2 = vld [vmem:[%s5051_s29 + $0x10f8] sm:$0xff]  ;;  %3287 = vmatpush.msra.mxu0 %v2120_v1  ;;  %v2913_v61 = vpop.f32.mrf.mxu2 }
 0x4fe   : > { %v2260_v4 = vld [vmem:[%s5051_s29 + $0x12f8] sm:$0xff]  ;;  %3304 = vmatpush.msrb.mxu1 %v2196_v2  ;;  %v2933_v49 = vpop.f32.mrf.mxu3 }
 0x4ff   : > { %v2328_v5 = vld [vmem:[%s5051_s29 + $0x1518] sm:$0xff]  ;;  %3324 = vmatpush.msrb.mxu2 %v2260_v4 }
 0x500   : > { %v2116_v12 = vld [vmem:[%s5051_s29 + $0xe78] sm:$0xff]  ;;  %3343 = vmatpush.msrb.mxu3 %v2328_v5 }
 0x501   : > { %v2192_v6 = vld [vmem:[%s5051_s29 + $0x10d8] sm:$0xff]  ;;  %3288 = vmatpush.msra.mxu0 %v2116_v12 }
 0x502   : > { %v2256_v8 = vld [vmem:[%s5051_s29 + $0x12d8] sm:$0xff]  ;;  %3305 = vmatpush.msrb.mxu1 %v2192_v6 }
 0x503   : > { %v2324_v50 = vld [vmem:[%s5051_s29 + $0x14f8] sm:$0xff]  ;;  %3325 = vmatpush.msrb.mxu2 %v2256_v8 }
 0x504   : > { %v2112_v10 = vld [vmem:[%s5051_s29 + $0xe58] sm:$0xff]  ;;  %3344 = vmatpush.msrb.mxu3 %v2324_v50 }
 0x505   : > { %v2188_v40 = vld [vmem:[%s5051_s29 + $0x10b8] sm:$0xff]  ;;  %3289 = vmatpush.msra.mxu0 %v2112_v10  ;;  %v2993_v54 = vpop.f32.mrf.mxu2 }
 0x506   : > { %v2252_v13 = vld [vmem:[%s5051_s29 + $0x12b8] sm:$0xff]  ;;  %3306 = vmatpush.msrb.mxu1 %v2188_v40  ;;  %v3013_v57 = vpop.f32.mrf.mxu3 }
 0x507   : > { %v2320_v14 = vld [vmem:[%s5051_s29 + $0x14d8] sm:$0xff]  ;;  %3326 = vmatpush.msrb.mxu2 %v2252_v13 }
 0x508   : > { %v2108_v39 = vld [vmem:[%s5051_s29 + $0xe38] sm:$0xff]  ;;  %3345 = vmatpush.msrb.mxu3 %v2320_v14 }
 0x509   : > { %v2184_v15 = vld [vmem:[%s5051_s29 + $0x1098] sm:$0xff]  ;;  %3290 = vmatpush.msra.mxu0 %v2108_v39 }
 0x50a   : > { %v2248_v17 = vld [vmem:[%s5051_s29 + $0x1298] sm:$0xff]  ;;  %3307 = vmatpush.msrb.mxu1 %v2184_v15 }
 0x50b   : > { %v2316_v18 = vld [vmem:[%s5051_s29 + $0x14b8] sm:$0xff]  ;;  %3327 = vmatpush.msrb.mxu2 %v2248_v17 }
 0x50c   : > { %v2104_v19 = vld [vmem:[%s5051_s29 + $0xe18] sm:$0xff]  ;;  %3346 = vmatpush.msrb.mxu3 %v2316_v18 }
 0x50d   : > { %v2180_v20 = vld [vmem:[%s5051_s29 + $0x1078] sm:$0xff]  ;;  %3291 = vmatpush.msra.mxu0 %v2104_v19 }
 0x50e   : > { %v2244_v21 = vld [vmem:[%s5051_s29 + $0x1278] sm:$0xff]  ;;  %3292 = vmatmul.f32.vlgmr.msra.gmra.mxu0 %v5662_v55  ;;  %3308 = vmatpush.msrb.mxu1 %v2180_v20 }
 0x50f   : > { %v2312_v38 = vld [vmem:[%s5051_s29 + $0x1498] sm:$0xff]  ;;  %3328 = vmatpush.msrb.mxu2 %v2244_v21 }
 0x510   : > { %v2176_v22 = vld [vmem:[%s5051_s29 + $0x1058] sm:$0xff]  ;;  %3347 = vmatpush.msrb.mxu3 %v2312_v38 }
 0x511   : > { %v2372_v23 = vld [vmem:[%s5051_s29 + $0x1678] sm:$0xff]  ;;  %3309 = vmatpush.msrb.mxu1 %v2176_v22 }
 0x512   : > { %v2240_v24 = vld [vmem:[%s5051_s29 + $0x1258] sm:$0xff]  ;;  %3368 = vmatpush.msrb.mxu0 %v2372_v23  ;;  %v3073_v62 = vpop.f32.mrf.mxu2 }
 0x513   : > { %v2308_v25 = vld [vmem:[%s5051_s29 + $0x1478] sm:$0xff]  ;;  %3329 = vmatpush.msrb.mxu2 %v2240_v24 }
 0x514   : > { %v2172_v37 = vld [vmem:[%s5051_s29 + $0x1038] sm:$0xff]  ;;  %3348 = vmatpush.msrb.mxu3 %v2308_v25 }
 0x515   : > { %v2368_v31 = vld [vmem:[%s5051_s29 + $0x1658] sm:$0xff]  ;;  %3310 = vmatpush.msrb.mxu1 %v2172_v37 }
 0x516   : > { %v2236_v26 = vld [vmem:[%s5051_s29 + $0x1238] sm:$0xff]  ;;  %3369 = vmatpush.msrb.mxu0 %v2368_v31 }
 0x517   : > { %v2304_v27 = vld [vmem:[%s5051_s29 + $0x1458] sm:$0xff]  ;;  %3330 = vmatpush.msrb.mxu2 %v2236_v26  ;;  %v3093_v5 = vpop.f32.mrf.mxu3 }
 0x518   : > { %v2168_v28 = vld [vmem:[%s5051_s29 + $0x1018] sm:$0xff]  ;;  %3349 = vmatpush.msrb.mxu3 %v2304_v27 }
 0x519   : > { %v2364_v29 = vld [vmem:[%s5051_s29 + $0x1638] sm:$0xff]  ;;  %3311 = vmatpush.msrb.mxu1 %v2168_v28 }
 0x51a   : > { %v2232_v55 = vld [vmem:[%s5051_s29 + $0x1218] sm:$0xff]  ;;  %3370 = vmatpush.msrb.mxu0 %v2364_v29  ;;  %3312 = vmatmul.f32.vlgmr.msrb.gmra.mxu1 %v5676_v7  ;;  %v2773_v7 = vpop.f32.mrf.mxu0 }
 0x51b   : > { %v2300_v30 = vld [vmem:[%s5051_s29 + $0x1438] sm:$0xff]  ;;  %3331 = vmatpush.msrb.mxu2 %v2232_v55 }
 0x51c   : > { %v2296_v33 = vld [vmem:[%s5051_s29 + $0x1418] sm:$0xff]  ;;  %3350 = vmatpush.msrb.mxu3 %v2300_v30  ;;  %3332 = vmatmul.f32.vlgmr.msrb.gmra.mxu2 %v5684_v11  ;;  %v2973_v11 = vpop.f32.mrf.mxu1 }
 0x51d   : > { %v2360_v32 = vld [vmem:[%s5051_s29 + $0x1618] sm:$0xff] }
 0x51e   : > { %3351 = vmatpush.msrb.mxu3 %v2296_v33  ;;  %3371 = vmatpush.msrb.mxu0 %v2360_v32  ;;  %v3525_v51 = vld [vmem:[%s5466_s12] sm:$0xf] }
 0x51f   : > { %3352 = vmatmul.f32.vlgmr.msrb.gmra.mxu3 %v5731_v3  ;;  %3487 = vmatmul.msk.f32.vlgmr.msrb.gmra.mxu0 %vm2413_vm0, %v5738_v9  ;;  %v2376_v52 = vperm.slane %v3525_v51, 1  ;;  %v2377_v9 = vperm.slane %v3525_v51, 2  ;;  %v2378_v4 = vperm.slane %v3525_v51, 3  ;;  %v3376_v51 = vmax.f32 %v5581_v45, 0.0 }
 0x521   : > { %v2674_v56 = vadd.f32 %v2673_v63, %v2376_v52  ;;  %v2914_v16 = vadd.f32 %v2913_v61, %v2377_v9 }
 0x522   : > { %v2853_v47 = vpop.f32.mrf.mxu0 }
 0x523   : > { %v2694_v59 = vadd.f32 %v2693_v41, %v2674_v56  ;;  %v2934_v48 = vadd.f32 %v2933_v49, %v2914_v16 }
 0x524   : > { %v3053_v3 = vpop.f32.mrf.mxu1 }
 0x525   : > { %v2714_v1 = vadd.f32 %v2713_v34, %v2694_v59 }
 0x527   : > { %v2734_v6 = vadd.f32 %v2733_v35, %v2714_v1 }
 0x529   : > { %v2754_v13 = vadd.f32 %v2753_v42, %v2734_v6 }
 0x52a   : > { %v2953_v53 = vpop.f32.mrf.mxu0 }
 0x52b   : > { %v2954_v2 = vadd.f32 %v2953_v53, %v2934_v48  ;;  %v2774_v17 = vadd.f32 %v2773_v7, %v2754_v13 }
 0x52c   : > { %v3133_v58 = vpop.f32.mrf.mxu1 }
 0x52d   : > { %v2974_v8 = vadd.f32 %v2973_v11, %v2954_v2  ;;  %v2794_v21 = vadd.f32 %v2793_v36, %v2774_v17 }
 0x52f   : > { %v2994_v14 = vadd.f32 %v2993_v54, %v2974_v8  ;;  %v2814_v22 = vadd.f32 %v2813_v0, %v2794_v21  ;;  %v3380_v54 = vmin.f32 %v3376_v51, 6.0 }
 0x531   : > { %v3014_v18 = vadd.f32 %v3013_v57, %v2994_v14  ;;  %v2834_v25 = vadd.f32 %v2833_v46, %v2814_v22  ;;  %v3384_v59 = vmul.f32 0.5, %v3380_v54 }
 0x532   : > { %v3033_v60 = vpop.f32.mrf.mxu0 }
 0x533   : > { %v3034_v38 = vadd.f32 %v3033_v60, %v3014_v18  ;;  %v2854_v31 = vadd.f32 %v2853_v47, %v2834_v25 }
 0x535   : > { %v3054_v37 = vadd.f32 %v3053_v3, %v3034_v38  ;;  %v2874_v29 = vadd.f32 %v2873_v43, %v2854_v31 }
 0x537   : > { %v3074_v26 = vadd.f32 %v3073_v62, %v3054_v37  ;;  %v2894_v35 = vadd.f32 %v2893_v44, %v2874_v29 }
 0x539   : > { %v3094_v55 = vadd.f32 %v3093_v5, %v3074_v26  ;;  %v3377_v0 = vmax.f32 %v2894_v35, 0.0 }
 0x53a   : > { %v3113_v10 = vpop.f32.mrf.mxu0 }
 0x53b   : > { %v3114_v32 = vadd.f32 %v3113_v10, %v3094_v55  ;;  %v3381_v3 = vmin.f32 %v3377_v0, 6.0 }
 0x53d   : > { %v3134_v36 = vadd.f32 %v3133_v58, %v3114_v32  ;;  %v3385_v53 = vmul.f32 0.5, %v3381_v3 }
 0x53f   : > { %v3378_v46 = vmax.f32 %v3134_v36, 0.0  ;;  %v3392_v57 = vrot.slane %v3385_v53, 6 }
 0x541   : > { %v3382_v52 = vmin.f32 %v3378_v46, 6.0  ;;  %v3396_v45 = vsel %vm3395_vm1, %v3384_v59, %v3392_v57 }
 0x543   : > { %v3386_v56 = vmul.f32 0.5, %v3382_v52 }
 0x545   : > { %v3153_v12 = vpop.f32.mrf.mxu1  ;;  %v3393_v48 = vrot.slane %v3386_v56, 4 }
 0x546   : > { %v3154_v50 = vadd.f32 %v3153_v12, %v2378_v4 }
 0x54b   : > { %v3213_v20 = vpop.f32.mrf.mxu0 }
 0x54c   : > { %v3173_v40 = vpop.f32.mrf.mxu2 }
 0x54d   : > { %v3174_v39 = vadd.f32 %v3173_v40, %v3154_v50  ;;  %v3193_v15 = vpop.f32.mrf.mxu3 }
 0x54f   : > { %v3194_v19 = vadd.f32 %v3193_v15, %v3174_v39 }
 0x551   : > { %v3214_v23 = vadd.f32 %v3213_v20, %v3194_v19 }
 0x558   : > { %v3233_v24 = vpop.f32.mrf.mxu1 }
 0x559   : > { %v3234_v27 = vadd.f32 %v3233_v24, %v3214_v23 }
 0x55f   : > { %v3253_v28 = vpop.f32.mrf.mxu2 }
 0x560   : > { %v3254_v30 = vadd.f32 %v3253_v28, %v3234_v27 }
 0x564   : > { %v3273_v33 = vpop.f32.mrf.mxu3 }
 0x565   : > { %v3274_v63 = vadd.f32 %v3273_v33, %v3254_v30 }
 0x58b   : > { %v3293_v34 = vpop.f32.mrf.mxu0 }
 0x58c   : > { %v3294_v42 = vadd.f32 %v3293_v34, %v3274_v63 }
 0x597   : > { %v3313_v41 = vpop.f32.mrf.mxu1 }
 0x598   : > { %v3314_v7 = vadd.f32 %v3313_v41, %v3294_v42 }
 0x59c   : > { %v3373_v49 = vpop.f32.mrf.mxu0 }
 0x59f   : > { %v3333_v11 = vpop.f32.mrf.mxu2 }
 0x5a0   : > { %v3334_v61 = vadd.f32 %v3333_v11, %v3314_v7 }
 0x5a2   : > { %v3353_v47 = vpop.f32.mrf.mxu3 }
 0x5a3   : > { %v3354_v43 = vadd.f32 %v3353_v47, %v3334_v61 }
 0x5a5   : > { %v3374_v9 = vadd.f32 %v3373_v49, %v3354_v43 }
 0x5a7   : > { %v3379_v44 = vmax.f32 %v3374_v9, 0.0 }
 0x5a9   : > { %v3383_v16 = vmin.f32 %v3379_v44, 6.0 }
 0x5ab   : > { %v3387_v58 = vmul.f32 0.5, %v3383_v16 }
 0x5ad   : > { %v3394_v60 = vrot.slane %v3387_v58, 2 }
 0x5af   : > { %v3398_v62 = vsel %vm3397_vm2, %v3393_v48, %v3394_v60 }
 0x5b0   : > { %v3400_v1 = vsel %vm3399_vm3, %v3396_v45, %v3398_v62 }
 0x5b1   : > { %3402 = vst [vmem:[%s1648_s18] sm:$0xff] %v3400_v1 }
 0x5b2 PF: > { %p10_p9 = scmp.ge.s32.totalorder %s3587_s16, 4   ;;  %s5911_s12 = smov %s3544_s13 }
 0x5b3   : > { %s5912_s13 = smov %s3596_s19  ;;  %s5913_s14 = smov %s3587_s16 }
 0x5b4   :  { %12 = sbr.rel (!%p10_p9) target bundleno = 2 (0x2), region = 94 }

</bundles_post_ra>
